<compile_context>
chip_gen: v7x
topology: tpu7x:2x2x1
jax: 0.10.0
libtpu: 0.0.40
codegen_flags: <defaults>
</compile_context>

<pallas_src>
import jax
import jax.numpy as jnp
from jax import lax
from jax.experimental import pallas as pl
from jax.experimental.pallas import tpu as pltpu


def decoder_kernel(H_ref, Hw1_ref, Y_ref,
                   w1r_ref,     # (2*HID, T*F)   [w1d tiled ; w1c tiled]
                   w2bd_ref,    # (T*F, T)       block-diagonal copies of w2
                   wg_ref,      # (HID+F, 4*HID) [Whh ; fcw@wih]
                   ffw_ref,     # (HID+F, 2)     [ffwd ; ffwc]
                   small_ref,   # (1, 8*HID+2)   [scale_y | bias_g | ffb]
                   out_ref):
    B, T, F = H_ref.shape
    G = wg_ref.shape[1]
    HID = G // 4

    # ---- small loop-invariant prologue (kept intentionally tiny) ----
    Hv = H_ref[...]                                          # (B, T, F)
    Hw1 = Hw1_ref[...]                                       # (B, T*F), +b1 folded
    Yv = Y_ref[...]                                          # (B, T)
    syb = jnp.broadcast_to(small_ref[:, 0:G], (B, G))        # (B, 4H)
    bgb = jnp.broadcast_to(small_ref[:, G:2 * G], (B, G))    # (B, 4H)
    ffb = small_ref[:, 2 * G:2 * G + 2]                      # (1, 2)

    # recurrent state lives in vregs
    d = jnp.zeros((B, HID), jnp.float32)
    c = jnp.zeros((B, HID), jnp.float32)
    ctx = jnp.zeros((B, F), jnp.float32)

    # fully unrolled recurrence (T is a static compile-time constant;
    # switch to lax.fori_loop(..., unroll=2-4) if T grows past ~16-32)
    for t in range(T):
        if t == 0:
            # d == c == 0 at step 0: skip the three recurrent MXU pushes.
            gates_d = bgb
            pre = Hw1
        else:
            # d-only gate half first: only depends on d, so the MXU can chew
            # on it while the attention EUP/XLU/softmax chain runs; also
            # removes the [ctx|d] concat from the post-attention tail.
            gates_d = jnp.dot(d, wg_ref[0:HID, :],
                              preferred_element_type=jnp.float32) + bgb
            # lane-dense attention pre-activation (B, T*F): two accumulating
            # MXU pushes against sublane slices of w1r (no [d|c] concat).
            pre = (jnp.dot(d, w1r_ref[0:HID, :],
                           preferred_element_type=jnp.float32)
                   + jnp.dot(c, w1r_ref[HID:2 * HID, :],
                             preferred_element_type=jnp.float32)
                   + Hw1)

        h1 = jnp.tanh(pre)                                   # 2 full-width EUP pushes
        # per-timestep segmented reduction sum_f h1[b,t,f]*w2[f] as one MXU
        # matmul against the block-diagonal w2 copy (b2 dropped: softmax is
        # shift-invariant).
        scores = jnp.dot(h1, w2bd_ref[...],
                         preferred_element_type=jnp.float32)  # (B, T)

        # softmax over timesteps; EUP approx reciprocal + one Newton step.
        m = jnp.max(scores, axis=1, keepdims=True)
        e = jnp.exp(scores - m)
        s = jnp.sum(e, axis=1, keepdims=True)
        r = pl.reciprocal(s, approx=True)
        r = r * (2.0 - s * r)                                 # refine to ~fp32
        beta = e * r                                          # (B, T)

        # context = bmm(beta, H)
        ctx = jnp.sum(beta[:, :, None] * Hv, axis=1)          # (B, F)

        # fused fc + LSTM gates:
        #   gates = d@Whh (issued above) + ctx@(fcw@wih) + y_t*scale_y + bias_g
        y_t = Yv[:, t:t + 1]                                  # (B, 1)
        gates = (gates_d
                 + jnp.dot(ctx, wg_ref[HID:HID + F, :],
                           preferred_element_type=jnp.float32)
                 + y_t * syb)                                 # (B, 4H)

        # two full-width EUP pushes instead of four quarter-vreg ones
        sg = jax.nn.sigmoid(gates)
        tg = jnp.tanh(gates)
        i_g = sg[:, 0:HID]
        f_g = sg[:, HID:2 * HID]
        g_g = tg[:, 2 * HID:3 * HID]
        o_g = sg[:, 3 * HID:4 * HID]
        c = f_g * c + i_g * g_g
        d = o_g * jnp.tanh(c)

    # logits = fc_final(concat(d_n[0], context)) without the concat; log_softmax
    logits = (jnp.dot(d, ffw_ref[0:HID, :], preferred_element_type=jnp.float32)
              + jnp.dot(ctx, ffw_ref[HID:HID + F, :],
                        preferred_element_type=jnp.float32)
              + ffb)                                          # (B, 2)
    mx = jnp.max(logits, axis=1, keepdims=True)
    sh = logits - mx
    lse = jnp.log(jnp.sum(jnp.exp(sh), axis=1, keepdims=True))
    out_ref[...] = sh - lse


def class_decoder_forward(H, Y, params):
    B, T, F = H.shape
    HID = params["whh"].shape[0]
    G = 4 * HID
    f32 = jnp.float32

    # ---- one-time algebraic weight prep (cacheable alongside the params) ----
    # attention layer-1 recurrent weights, replicated T times along the output
    # so the in-kernel dot directly produces the lane-dense (B, T*F) pre-act.
    w1r = jnp.concatenate([jnp.tile(params["w1d"], (1, T)),
                           jnp.tile(params["w1c"], (1, T))], axis=0)  # (2H, T*F)
    # block-diagonal copy of w2: column t holds w2 in rows [t*F, (t+1)*F).
    w2bd = jnp.kron(jnp.eye(T, dtype=f32), params["w2"].T)            # (T*F, T)
    # loop-invariant H @ w1h + b1, lane-dense (full f32 precision).
    Hw1 = (jnp.dot(H.reshape(B * T, F), params["w1h"],
                   precision=lax.Precision.HIGHEST)
           + params["b1"]).reshape(B, T * F)                          # (B, T*F)
    # fc folded into the LSTM input path:
    #   y_tilde@wih == ctx@(fcw@wih) + y*(fcy*wih) + fcb*wih
    wg = jnp.concatenate([params["whh"],
                          params["fcw"] @ params["wih"]], axis=0)     # (H+F, 4H)
    scale_y = params["fcy"][0, 0] * params["wih"]                     # (1, 4H)
    bias_g = params["fcb"][0, 0] * params["wih"] + params["lb"]       # (1, 4H)
    # fc_final over [d ; ctx] (sliced by sublanes in-kernel, no concat there)
    ffw = jnp.concatenate([params["ffwd"], params["ffwc"]], axis=0)   # (H+F, 2)
    # pack the 1-row params into a single input (fewer DMA descriptors)
    small = jnp.concatenate([scale_y, bias_g, params["ffb"]], axis=1)  # (1, 2G+2)

    ins = (H, Hw1, Y, w1r, w2bd, wg, ffw, small)
    vmem = pl.BlockSpec(memory_space=pltpu.MemorySpace.VMEM)
    # Grid-less single invocation: everything fits VMEM comfortably at these
    # shapes.  For v7x with B >= 16, add a leading batch grid axis with
    # compiler_params=pltpu.CompilerParams(dimension_semantics=("parallel",))
    # and set vmem_limit_bytes as B*T*F grows.
    return pl.pallas_call(
        decoder_kernel,
        out_shape=jax.ShapeDtypeStruct((B, 2), jnp.float32),
        in_specs=[vmem] * len(ins),
        out_specs=vmem,
    )(*ins)


def class_decoder_ref(H, Y, params):
    """Pure-JAX reference mirroring the PyTorch forward exactly."""
    B, T, F = H.shape
    HID = params["whh"].shape[0]
    d = jnp.zeros((B, HID), jnp.float32)
    c = jnp.zeros((B, HID), jnp.float32)
    ctx = jnp.zeros((B, F), jnp.float32)
    for t in range(T):
        x = jnp.concatenate([jnp.broadcast_to(d[:, None, :], (B, T, HID)),
                             jnp.broadcast_to(c[:, None, :], (B, T, HID)),
                             H], axis=2)                          # (B, T, 2*HID+F)
        W1 = jnp.concatenate([params["w1d"], params["w1c"], params["w1h"]], axis=0)
        h1 = jnp.tanh(x @ W1 + params["b1"])
        scores = (h1 @ params["w2"].T + params["b2"][0, 0])[..., 0]   # (B, T)
        beta = jax.nn.softmax(scores, axis=1)
        ctx = jnp.einsum('bt,btf->bf', beta, H)
        fcw_full = jnp.concatenate([params["fcw"], params["fcy"]], axis=0)
        y_tilde = jnp.concatenate([ctx, Y[:, t:t + 1]], axis=1) @ fcw_full + params["fcb"][0, 0]
        gates = y_tilde @ params["wih"] + d @ params["whh"] + params["lb"]
        i_g = jax.nn.sigmoid(gates[:, 0:HID])
        f_g = jax.nn.sigmoid(gates[:, HID:2 * HID])
        g_g = jnp.tanh(gates[:, 2 * HID:3 * HID])
        o_g = jax.nn.sigmoid(gates[:, 3 * HID:4 * HID])
        c = f_g * c + i_g * g_g
        d = o_g * jnp.tanh(c)
    logits = (jnp.concatenate([d, ctx], axis=1)
              @ jnp.concatenate([params["ffwd"], params["ffwc"]], axis=0)
              + params["ffb"])
    return jax.nn.log_softmax(logits, axis=1)


def make_params(key, feat_dim, hid_dim):
    ks = jax.random.split(key, 12)
    sc = 0.1
    p = {
        # attn layer 1: Linear(2*hid+feat, feat), weight.T split into [d | c | H]
        "w1d": sc * jax.random.normal(ks[0], (hid_dim, feat_dim), jnp.float32),
        "w1c": sc * jax.random.normal(ks[1], (hid_dim, feat_dim), jnp.float32),
        "w1h": sc * jax.random.normal(ks[2], (feat_dim, feat_dim), jnp.float32),
        "b1": sc * jax.random.normal(ks[3], (1, feat_dim), jnp.float32),
        # attn layer 2: Linear(feat, 1)  (kept as (1, feat) row vector)
        "w2": sc * jax.random.normal(ks[4], (1, feat_dim), jnp.float32),
        "b2": sc * jax.random.normal(ks[5], (1, 1), jnp.float32),
        # fc: Linear(feat+1, 1) split into context part and scalar Y part
        "fcw": sc * jax.random.normal(ks[6], (feat_dim, 1), jnp.float32),
        "fcy": sc * jax.random.normal(ks[7], (1, 1), jnp.float32),
        "fcb": sc * jax.random.normal(ks[8], (1, 1), jnp.float32),
        # LSTM(input_size=1, hidden_size=hid): W_ih.T, W_hh.T, (b_ih + b_hh)
        "wih": sc * jax.random.normal(ks[9], (1, 4 * hid_dim), jnp.float32),
        "whh": sc * jax.random.normal(ks[10], (hid_dim, 4 * hid_dim), jnp.float32),
        "lb": sc * jax.random.normal(ks[11], (1, 4 * hid_dim), jnp.float32),
        # fc_final: Linear(hid+feat, 2) split into d part and context part
        "ffwd": sc * jax.random.normal(jax.random.fold_in(key, 100), (hid_dim, 2), jnp.float32),
        "ffwc": sc * jax.random.normal(jax.random.fold_in(key, 101), (feat_dim, 2), jnp.float32),
        "ffb": sc * jax.random.normal(jax.random.fold_in(key, 102), (1, 2), jnp.float32),
    }
    return p


if __name__ == "__main__":
    # TODO(synk): the PyTorch DEBUG np.save / ipdb branch and the self.count
    # host-side counter are intentionally omitted (no device-side equivalent).
    B, T, F, HID = 8, 8, 32, 32   # batch, timesteps, feat_dim (enc hidden), dec hid_dim
    key = jax.random.PRNGKey(0)
    kH, kY, kP = jax.random.split(key, 3)
    H = jax.random.normal(kH, (B, T, F), jnp.float32)
    Y = jax.random.normal(kY, (B, T), jnp.float32)
    params = make_params(kP, F, HID)

    out = jax.block_until_ready(class_decoder_forward(H, Y, params))
    ref = class_decoder_ref(H, Y, params)
    assert out.shape == (B, 2)
    # Relaxed slightly vs exact-division baseline: covers the Newton-refined
    # approx reciprocal, fcw@wih pre-fusion, and MXU fp reordering of the
    # block-diagonal score reduction.
    max_err = float(jnp.max(jnp.abs(out - ref)))
    assert jnp.allclose(out, ref, atol=5e-4, rtol=2e-3), (max_err, out, ref)
    print("KERNEL_OK")
</pallas_src>

<mosaic_0001>
module attributes {stable_mosaic.version = 11 : i64} {
  func.func @decoder_kernel(%arg0: memref<8x8x32xf32, #tpu.memory_space<vmem>>, %arg1: memref<8x256xf32, #tpu.memory_space<vmem>>, %arg2: memref<8x8xf32, #tpu.memory_space<vmem>>, %arg3: memref<64x256xf32, #tpu.memory_space<vmem>>, %arg4: memref<256x8xf32, #tpu.memory_space<vmem>>, %arg5: memref<64x128xf32, #tpu.memory_space<vmem>>, %arg6: memref<64x2xf32, #tpu.memory_space<vmem>>, %arg7: memref<1x258xf32, #tpu.memory_space<vmem>>, %arg8: memref<8x2xf32, #tpu.memory_space<vmem>>) attributes {dimension_semantics = [], scalar_prefetch = 0 : i64, scratch_operands = 0 : i64, tpu.core_type = #tpu.core_type<tc>} {
    %c0 = arith.constant 0 : index
    %c0_0 = arith.constant 0 : index
    %c0_1 = arith.constant 0 : index
    %0 = vector.load %arg0[%c0, %c0_0, %c0_1] : memref<8x8x32xf32, #tpu.memory_space<vmem>>, vector<8x8x32xf32>
    %c0_2 = arith.constant 0 : index
    %c0_3 = arith.constant 0 : index
    %1 = vector.load %arg1[%c0_2, %c0_3] : memref<8x256xf32, #tpu.memory_space<vmem>>, vector<8x256xf32>
    %c0_4 = arith.constant 0 : index
    %c0_5 = arith.constant 0 : index
    %2 = vector.load %arg2[%c0_4, %c0_5] : memref<8x8xf32, #tpu.memory_space<vmem>>, vector<8x8xf32>
    %c0_6 = arith.constant 0 : index
    %c0_7 = arith.constant 0 : index
    %3 = vector.load %arg7[%c0_6, %c0_7] : memref<1x258xf32, #tpu.memory_space<vmem>>, vector<1x128xf32>
    %4 = vector.shape_cast %3 : vector<1x128xf32> to vector<1x128xf32>
    %5 = vector.broadcast %4 : vector<1x128xf32> to vector<8x128xf32>
    %c0_8 = arith.constant 0 : index
    %c128 = arith.constant 128 : index
    %6 = vector.load %arg7[%c0_8, %c128] : memref<1x258xf32, #tpu.memory_space<vmem>>, vector<1x128xf32>
    %7 = vector.shape_cast %6 : vector<1x128xf32> to vector<1x128xf32>
    %8 = vector.broadcast %7 : vector<1x128xf32> to vector<8x128xf32>
    %c0_9 = arith.constant 0 : index
    %c256 = arith.constant 256 : index
    %9 = vector.load %arg7[%c0_9, %c256] : memref<1x258xf32, #tpu.memory_space<vmem>>, vector<1x2xf32>
    %cst = arith.constant 0.000000e+00 : f32
    %10 = vector.broadcast %cst : f32 to vector<8x32xf32>
    %11 = math.tanh %1 : vector<8x256xf32>
    %c0_10 = arith.constant 0 : index
    %c0_11 = arith.constant 0 : index
    %12 = vector.load %arg4[%c0_10, %c0_11] : memref<256x8xf32, #tpu.memory_space<vmem>>, vector<256x8xf32>
    %cst_12 = arith.constant dense<0.000000e+00> : vector<8x8xf32>
    %13 = tpu.matmul %11, %12, %cst_12 {dimension_numbers = #tpu.dot_dimension_numbers<[1], [0], [0], [1], [0, 0, 1, 1], [], []>} : vector<8x256xf32>, vector<256x8xf32>, vector<8x8xf32> -> vector<8x8xf32>
    %cst_13 = arith.constant dense<0xFF800000> : vector<8xf32>
    %14 = vector.multi_reduction <maximumf>, %13, %cst_13 [1] : vector<8x8xf32> to vector<8xf32>
    %15 = vector.shape_cast %14 : vector<8xf32> to vector<8x1xf32>
    %16 = vector.broadcast %15 : vector<8x1xf32> to vector<8x8xf32>
    %17 = arith.subf %13, %16 : vector<8x8xf32>
    %18 = math.exp %17 : vector<8x8xf32>
    %cst_14 = arith.constant dense<0.000000e+00> : vector<8xf32>
    %19 = vector.multi_reduction <add>, %18, %cst_14 [1] : vector<8x8xf32> to vector<8xf32>
    %20 = vector.shape_cast %19 : vector<8xf32> to vector<8x1xf32>
    %21 = tpu.reciprocal %20 {approx = true} : vector<8x1xf32> -> vector<8x1xf32>
    %22 = arith.mulf %20, %21 : vector<8x1xf32>
    %cst_15 = arith.constant 2.000000e+00 : f32
    %23 = vector.broadcast %cst_15 : f32 to vector<8x1xf32>
    %24 = arith.subf %23, %22 : vector<8x1xf32>
    %25 = arith.mulf %21, %24 : vector<8x1xf32>
    %26 = vector.broadcast %25 : vector<8x1xf32> to vector<8x8xf32>
    %27 = arith.mulf %18, %26 : vector<8x8xf32>
    %28 = vector.shape_cast %27 : vector<8x8xf32> to vector<8x8x1xf32>
    %29 = vector.broadcast %28 : vector<8x8x1xf32> to vector<8x8x32xf32>
    %30 = arith.mulf %29, %0 : vector<8x8x32xf32>
    %cst_16 = arith.constant dense<0.000000e+00> : vector<8x32xf32>
    %31 = vector.multi_reduction <add>, %30, %cst_16 [1] : vector<8x8x32xf32> to vector<8x32xf32>
    %32 = vector.extract_strided_slice %2 {offsets = [0, 0], sizes = [8, 1], strides = [1, 1]} : vector<8x8xf32> to vector<8x1xf32>
    %c32 = arith.constant 32 : index
    %c0_17 = arith.constant 0 : index
    %33 = vector.load %arg5[%c32, %c0_17] : memref<64x128xf32, #tpu.memory_space<vmem>>, vector<32x128xf32>
    %cst_18 = arith.constant dense<0.000000e+00> : vector<8x128xf32>
    %34 = tpu.matmul %31, %33, %cst_18 {dimension_numbers = #tpu.dot_dimension_numbers<[1], [0], [0], [1], [0, 0, 1, 1], [], []>} : vector<8x32xf32>, vector<32x128xf32>, vector<8x128xf32> -> vector<8x128xf32>
    %35 = arith.addf %8, %34 : vector<8x128xf32>
    %36 = vector.broadcast %32 : vector<8x1xf32> to vector<8x128xf32>
    %37 = arith.mulf %36, %5 : vector<8x128xf32>
    %38 = arith.addf %35, %37 : vector<8x128xf32>
    %39 = arith.negf %38 : vector<8x128xf32>
    %40 = math.exp %39 : vector<8x128xf32>
    %cst_19 = arith.constant 1.000000e+00 : f32
    %41 = vector.broadcast %cst_19 : f32 to vector<8x128xf32>
    %42 = arith.addf %41, %40 : vector<8x128xf32>
    %43 = arith.divf %41, %42 : vector<8x128xf32>
    %44 = math.tanh %38 : vector<8x128xf32>
    %45 = vector.extract_strided_slice %43 {offsets = [0, 0], sizes = [8, 32], strides = [1, 1]} : vector<8x128xf32> to vector<8x32xf32>
    %46 = vector.extract_strided_slice %43 {offsets = [0, 32], sizes = [8, 32], strides = [1, 1]} : vector<8x128xf32> to vector<8x32xf32>
    %47 = vector.extract_strided_slice %44 {offsets = [0, 64], sizes = [8, 32], strides = [1, 1]} : vector<8x128xf32> to vector<8x32xf32>
    %48 = vector.extract_strided_slice %43 {offsets = [0, 96], sizes = [8, 32], strides = [1, 1]} : vector<8x128xf32> to vector<8x32xf32>
    %49 = arith.mulf %46, %10 : vector<8x32xf32>
    %50 = arith.mulf %45, %47 : vector<8x32xf32>
    %51 = arith.addf %49, %50 : vector<8x32xf32>
    %52 = math.tanh %51 : vector<8x32xf32>
    %53 = arith.mulf %48, %52 : vector<8x32xf32>
    %c0_20 = arith.constant 0 : index
    %c0_21 = arith.constant 0 : index
    %54 = vector.load %arg5[%c0_20, %c0_21] : memref<64x128xf32, #tpu.memory_space<vmem>>, vector<32x128xf32>
    %cst_22 = arith.constant dense<0.000000e+00> : vector<8x128xf32>
    %55 = tpu.matmul %53, %54, %cst_22 {dimension_numbers = #tpu.dot_dimension_numbers<[1], [0], [0], [1], [0, 0, 1, 1], [], []>} : vector<8x32xf32>, vector<32x128xf32>, vector<8x128xf32> -> vector<8x128xf32>
    %56 = arith.addf %55, %8 : vector<8x128xf32>
    %c0_23 = arith.constant 0 : index
    %c0_24 = arith.constant 0 : index
    %57 = vector.load %arg3[%c0_23, %c0_24] : memref<64x256xf32, #tpu.memory_space<vmem>>, vector<32x256xf32>
    %cst_25 = arith.constant dense<0.000000e+00> : vector<8x256xf32>
    %58 = tpu.matmul %53, %57, %cst_25 {dimension_numbers = #tpu.dot_dimension_numbers<[1], [0], [0], [1], [0, 0, 1, 1], [], []>} : vector<8x32xf32>, vector<32x256xf32>, vector<8x256xf32> -> vector<8x256xf32>
    %c32_26 = arith.constant 32 : index
    %c0_27 = arith.constant 0 : index
    %59 = vector.load %arg3[%c32_26, %c0_27] : memref<64x256xf32, #tpu.memory_space<vmem>>, vector<32x256xf32>
    %cst_28 = arith.constant dense<0.000000e+00> : vector<8x256xf32>
    %60 = tpu.matmul %51, %59, %cst_28 {dimension_numbers = #tpu.dot_dimension_numbers<[1], [0], [0], [1], [0, 0, 1, 1], [], []>} : vector<8x32xf32>, vector<32x256xf32>, vector<8x256xf32> -> vector<8x256xf32>
    %61 = arith.addf %58, %60 : vector<8x256xf32>
    %62 = arith.addf %61, %1 : vector<8x256xf32>
    %63 = math.tanh %62 : vector<8x256xf32>
    %c0_29 = arith.constant 0 : index
    %c0_30 = arith.constant 0 : index
    %64 = vector.load %arg4[%c0_29, %c0_30] : memref<256x8xf32, #tpu.memory_space<vmem>>, vector<256x8xf32>
    %cst_31 = arith.constant dense<0.000000e+00> : vector<8x8xf32>
    %65 = tpu.matmul %63, %64, %cst_31 {dimension_numbers = #tpu.dot_dimension_numbers<[1], [0], [0], [1], [0, 0, 1, 1], [], []>} : vector<8x256xf32>, vector<256x8xf32>, vector<8x8xf32> -> vector<8x8xf32>
    %cst_32 = arith.constant dense<0xFF800000> : vector<8xf32>
    %66 = vector.multi_reduction <maximumf>, %65, %cst_32 [1] : vector<8x8xf32> to vector<8xf32>
    %67 = vector.shape_cast %66 : vector<8xf32> to vector<8x1xf32>
    %68 = vector.broadcast %67 : vector<8x1xf32> to vector<8x8xf32>
    %69 = arith.subf %65, %68 : vector<8x8xf32>
    %70 = math.exp %69 : vector<8x8xf32>
    %cst_33 = arith.constant dense<0.000000e+00> : vector<8xf32>
    %71 = vector.multi_reduction <add>, %70, %cst_33 [1] : vector<8x8xf32> to vector<8xf32>
    %72 = vector.shape_cast %71 : vector<8xf32> to vector<8x1xf32>
    %73 = tpu.reciprocal %72 {approx = true} : vector<8x1xf32> -> vector<8x1xf32>
    %74 = arith.mulf %72, %73 : vector<8x1xf32>
    %cst_34 = arith.constant 2.000000e+00 : f32
    %75 = vector.broadcast %cst_34 : f32 to vector<8x1xf32>
    %76 = arith.subf %75, %74 : vector<8x1xf32>
    %77 = arith.mulf %73, %76 : vector<8x1xf32>
    %78 = vector.broadcast %77 : vector<8x1xf32> to vector<8x8xf32>
    %79 = arith.mulf %70, %78 : vector<8x8xf32>
    %80 = vector.shape_cast %79 : vector<8x8xf32> to vector<8x8x1xf32>
    %81 = vector.broadcast %80 : vector<8x8x1xf32> to vector<8x8x32xf32>
    %82 = arith.mulf %81, %0 : vector<8x8x32xf32>
    %cst_35 = arith.constant dense<0.000000e+00> : vector<8x32xf32>
    %83 = vector.multi_reduction <add>, %82, %cst_35 [1] : vector<8x8x32xf32> to vector<8x32xf32>
    %84 = vector.extract_strided_slice %2 {offsets = [0, 1], sizes = [8, 1], strides = [1, 1]} : vector<8x8xf32> to vector<8x1xf32>
    %c32_36 = arith.constant 32 : index
    %c0_37 = arith.constant 0 : index
    %85 = vector.load %arg5[%c32_36, %c0_37] : memref<64x128xf32, #tpu.memory_space<vmem>>, vector<32x128xf32>
    %cst_38 = arith.constant dense<0.000000e+00> : vector<8x128xf32>
    %86 = tpu.matmul %83, %85, %cst_38 {dimension_numbers = #tpu.dot_dimension_numbers<[1], [0], [0], [1], [0, 0, 1, 1], [], []>} : vector<8x32xf32>, vector<32x128xf32>, vector<8x128xf32> -> vector<8x128xf32>
    %87 = arith.addf %56, %86 : vector<8x128xf32>
    %88 = vector.broadcast %84 : vector<8x1xf32> to vector<8x128xf32>
    %89 = arith.mulf %88, %5 : vector<8x128xf32>
    %90 = arith.addf %87, %89 : vector<8x128xf32>
    %91 = arith.negf %90 : vector<8x128xf32>
    %92 = math.exp %91 : vector<8x128xf32>
    %cst_39 = arith.constant 1.000000e+00 : f32
    %93 = vector.broadcast %cst_39 : f32 to vector<8x128xf32>
    %94 = arith.addf %93, %92 : vector<8x128xf32>
    %95 = arith.divf %93, %94 : vector<8x128xf32>
    %96 = math.tanh %90 : vector<8x128xf32>
    %97 = vector.extract_strided_slice %95 {offsets = [0, 0], sizes = [8, 32], strides = [1, 1]} : vector<8x128xf32> to vector<8x32xf32>
    %98 = vector.extract_strided_slice %95 {offsets = [0, 32], sizes = [8, 32], strides = [1, 1]} : vector<8x128xf32> to vector<8x32xf32>
    %99 = vector.extract_strided_slice %96 {offsets = [0, 64], sizes = [8, 32], strides = [1, 1]} : vector<8x128xf32> to vector<8x32xf32>
    %100 = vector.extract_strided_slice %95 {offsets = [0, 96], sizes = [8, 32], strides = [1, 1]} : vector<8x128xf32> to vector<8x32xf32>
    %101 = arith.mulf %98, %51 : vector<8x32xf32>
    %102 = arith.mulf %97, %99 : vector<8x32xf32>
    %103 = arith.addf %101, %102 : vector<8x32xf32>
    %104 = math.tanh %103 : vector<8x32xf32>
    %105 = arith.mulf %100, %104 : vector<8x32xf32>
    %c0_40 = arith.constant 0 : index
    %c0_41 = arith.constant 0 : index
    %106 = vector.load %arg5[%c0_40, %c0_41] : memref<64x128xf32, #tpu.memory_space<vmem>>, vector<32x128xf32>
    %cst_42 = arith.constant dense<0.000000e+00> : vector<8x128xf32>
    %107 = tpu.matmul %105, %106, %cst_42 {dimension_numbers = #tpu.dot_dimension_numbers<[1], [0], [0], [1], [0, 0, 1, 1], [], []>} : vector<8x32xf32>, vector<32x128xf32>, vector<8x128xf32> -> vector<8x128xf32>
    %108 = arith.addf %107, %8 : vector<8x128xf32>
    %c0_43 = arith.constant 0 : index
    %c0_44 = arith.constant 0 : index
    %109 = vector.load %arg3[%c0_43, %c0_44] : memref<64x256xf32, #tpu.memory_space<vmem>>, vector<32x256xf32>
    %cst_45 = arith.constant dense<0.000000e+00> : vector<8x256xf32>
    %110 = tpu.matmul %105, %109, %cst_45 {dimension_numbers = #tpu.dot_dimension_numbers<[1], [0], [0], [1], [0, 0, 1, 1], [], []>} : vector<8x32xf32>, vector<32x256xf32>, vector<8x256xf32> -> vector<8x256xf32>
    %c32_46 = arith.constant 32 : index
    %c0_47 = arith.constant 0 : index
    %111 = vector.load %arg3[%c32_46, %c0_47] : memref<64x256xf32, #tpu.memory_space<vmem>>, vector<32x256xf32>
    %cst_48 = arith.constant dense<0.000000e+00> : vector<8x256xf32>
    %112 = tpu.matmul %103, %111, %cst_48 {dimension_numbers = #tpu.dot_dimension_numbers<[1], [0], [0], [1], [0, 0, 1, 1], [], []>} : vector<8x32xf32>, vector<32x256xf32>, vector<8x256xf32> -> vector<8x256xf32>
    %113 = arith.addf %110, %112 : vector<8x256xf32>
    %114 = arith.addf %113, %1 : vector<8x256xf32>
    %115 = math.tanh %114 : vector<8x256xf32>
    %c0_49 = arith.constant 0 : index
    %c0_50 = arith.constant 0 : index
    %116 = vector.load %arg4[%c0_49, %c0_50] : memref<256x8xf32, #tpu.memory_space<vmem>>, vector<256x8xf32>
    %cst_51 = arith.constant dense<0.000000e+00> : vector<8x8xf32>
    %117 = tpu.matmul %115, %116, %cst_51 {dimension_numbers = #tpu.dot_dimension_numbers<[1], [0], [0], [1], [0, 0, 1, 1], [], []>} : vector<8x256xf32>, vector<256x8xf32>, vector<8x8xf32> -> vector<8x8xf32>
    %cst_52 = arith.constant dense<0xFF800000> : vector<8xf32>
    %118 = vector.multi_reduction <maximumf>, %117, %cst_52 [1] : vector<8x8xf32> to vector<8xf32>
    %119 = vector.shape_cast %118 : vector<8xf32> to vector<8x1xf32>
    %120 = vector.broadcast %119 : vector<8x1xf32> to vector<8x8xf32>
    %121 = arith.subf %117, %120 : vector<8x8xf32>
    %122 = math.exp %121 : vector<8x8xf32>
    %cst_53 = arith.constant dense<0.000000e+00> : vector<8xf32>
    %123 = vector.multi_reduction <add>, %122, %cst_53 [1] : vector<8x8xf32> to vector<8xf32>
    %124 = vector.shape_cast %123 : vector<8xf32> to vector<8x1xf32>
    %125 = tpu.reciprocal %124 {approx = true} : vector<8x1xf32> -> vector<8x1xf32>
    %126 = arith.mulf %124, %125 : vector<8x1xf32>
    %cst_54 = arith.constant 2.000000e+00 : f32
    %127 = vector.broadcast %cst_54 : f32 to vector<8x1xf32>
    %128 = arith.subf %127, %126 : vector<8x1xf32>
    %129 = arith.mulf %125, %128 : vector<8x1xf32>
    %130 = vector.broadcast %129 : vector<8x1xf32> to vector<8x8xf32>
    %131 = arith.mulf %122, %130 : vector<8x8xf32>
    %132 = vector.shape_cast %131 : vector<8x8xf32> to vector<8x8x1xf32>
    %133 = vector.broadcast %132 : vector<8x8x1xf32> to vector<8x8x32xf32>
    %134 = arith.mulf %133, %0 : vector<8x8x32xf32>
    %cst_55 = arith.constant dense<0.000000e+00> : vector<8x32xf32>
    %135 = vector.multi_reduction <add>, %134, %cst_55 [1] : vector<8x8x32xf32> to vector<8x32xf32>
    %136 = vector.extract_strided_slice %2 {offsets = [0, 2], sizes = [8, 1], strides = [1, 1]} : vector<8x8xf32> to vector<8x1xf32>
    %c32_56 = arith.constant 32 : index
    %c0_57 = arith.constant 0 : index
    %137 = vector.load %arg5[%c32_56, %c0_57] : memref<64x128xf32, #tpu.memory_space<vmem>>, vector<32x128xf32>
    %cst_58 = arith.constant dense<0.000000e+00> : vector<8x128xf32>
    %138 = tpu.matmul %135, %137, %cst_58 {dimension_numbers = #tpu.dot_dimension_numbers<[1], [0], [0], [1], [0, 0, 1, 1], [], []>} : vector<8x32xf32>, vector<32x128xf32>, vector<8x128xf32> -> vector<8x128xf32>
    %139 = arith.addf %108, %138 : vector<8x128xf32>
    %140 = vector.broadcast %136 : vector<8x1xf32> to vector<8x128xf32>
    %141 = arith.mulf %140, %5 : vector<8x128xf32>
    %142 = arith.addf %139, %141 : vector<8x128xf32>
    %143 = arith.negf %142 : vector<8x128xf32>
    %144 = math.exp %143 : vector<8x128xf32>
    %cst_59 = arith.constant 1.000000e+00 : f32
    %145 = vector.broadcast %cst_59 : f32 to vector<8x128xf32>
    %146 = arith.addf %145, %144 : vector<8x128xf32>
    %147 = arith.divf %145, %146 : vector<8x128xf32>
    %148 = math.tanh %142 : vector<8x128xf32>
    %149 = vector.extract_strided_slice %147 {offsets = [0, 0], sizes = [8, 32], strides = [1, 1]} : vector<8x128xf32> to vector<8x32xf32>
    %150 = vector.extract_strided_slice %147 {offsets = [0, 32], sizes = [8, 32], strides = [1, 1]} : vector<8x128xf32> to vector<8x32xf32>
    %151 = vector.extract_strided_slice %148 {offsets = [0, 64], sizes = [8, 32], strides = [1, 1]} : vector<8x128xf32> to vector<8x32xf32>
    %152 = vector.extract_strided_slice %147 {offsets = [0, 96], sizes = [8, 32], strides = [1, 1]} : vector<8x128xf32> to vector<8x32xf32>
    %153 = arith.mulf %150, %103 : vector<8x32xf32>
    %154 = arith.mulf %149, %151 : vector<8x32xf32>
    %155 = arith.addf %153, %154 : vector<8x32xf32>
    %156 = math.tanh %155 : vector<8x32xf32>
    %157 = arith.mulf %152, %156 : vector<8x32xf32>
    %c0_60 = arith.constant 0 : index
    %c0_61 = arith.constant 0 : index
    %158 = vector.load %arg5[%c0_60, %c0_61] : memref<64x128xf32, #tpu.memory_space<vmem>>, vector<32x128xf32>
    %cst_62 = arith.constant dense<0.000000e+00> : vector<8x128xf32>
    %159 = tpu.matmul %157, %158, %cst_62 {dimension_numbers = #tpu.dot_dimension_numbers<[1], [0], [0], [1], [0, 0, 1, 1], [], []>} : vector<8x32xf32>, vector<32x128xf32>, vector<8x128xf32> -> vector<8x128xf32>
    %160 = arith.addf %159, %8 : vector<8x128xf32>
    %c0_63 = arith.constant 0 : index
    %c0_64 = arith.constant 0 : index
    %161 = vector.load %arg3[%c0_63, %c0_64] : memref<64x256xf32, #tpu.memory_space<vmem>>, vector<32x256xf32>
    %cst_65 = arith.constant dense<0.000000e+00> : vector<8x256xf32>
    %162 = tpu.matmul %157, %161, %cst_65 {dimension_numbers = #tpu.dot_dimension_numbers<[1], [0], [0], [1], [0, 0, 1, 1], [], []>} : vector<8x32xf32>, vector<32x256xf32>, vector<8x256xf32> -> vector<8x256xf32>
    %c32_66 = arith.constant 32 : index
    %c0_67 = arith.constant 0 : index
    %163 = vector.load %arg3[%c32_66, %c0_67] : memref<64x256xf32, #tpu.memory_space<vmem>>, vector<32x256xf32>
    %cst_68 = arith.constant dense<0.000000e+00> : vector<8x256xf32>
    %164 = tpu.matmul %155, %163, %cst_68 {dimension_numbers = #tpu.dot_dimension_numbers<[1], [0], [0], [1], [0, 0, 1, 1], [], []>} : vector<8x32xf32>, vector<32x256xf32>, vector<8x256xf32> -> vector<8x256xf32>
    %165 = arith.addf %162, %164 : vector<8x256xf32>
    %166 = arith.addf %165, %1 : vector<8x256xf32>
    %167 = math.tanh %166 : vector<8x256xf32>
    %c0_69 = arith.constant 0 : index
    %c0_70 = arith.constant 0 : index
    %168 = vector.load %arg4[%c0_69, %c0_70] : memref<256x8xf32, #tpu.memory_space<vmem>>, vector<256x8xf32>
    %cst_71 = arith.constant dense<0.000000e+00> : vector<8x8xf32>
    %169 = tpu.matmul %167, %168, %cst_71 {dimension_numbers = #tpu.dot_dimension_numbers<[1], [0], [0], [1], [0, 0, 1, 1], [], []>} : vector<8x256xf32>, vector<256x8xf32>, vector<8x8xf32> -> vector<8x8xf32>
    %cst_72 = arith.constant dense<0xFF800000> : vector<8xf32>
    %170 = vector.multi_reduction <maximumf>, %169, %cst_72 [1] : vector<8x8xf32> to vector<8xf32>
    %171 = vector.shape_cast %170 : vector<8xf32> to vector<8x1xf32>
    %172 = vector.broadcast %171 : vector<8x1xf32> to vector<8x8xf32>
    %173 = arith.subf %169, %172 : vector<8x8xf32>
    %174 = math.exp %173 : vector<8x8xf32>
    %cst_73 = arith.constant dense<0.000000e+00> : vector<8xf32>
    %175 = vector.multi_reduction <add>, %174, %cst_73 [1] : vector<8x8xf32> to vector<8xf32>
    %176 = vector.shape_cast %175 : vector<8xf32> to vector<8x1xf32>
    %177 = tpu.reciprocal %176 {approx = true} : vector<8x1xf32> -> vector<8x1xf32>
    %178 = arith.mulf %176, %177 : vector<8x1xf32>
    %cst_74 = arith.constant 2.000000e+00 : f32
    %179 = vector.broadcast %cst_74 : f32 to vector<8x1xf32>
    %180 = arith.subf %179, %178 : vector<8x1xf32>
    %181 = arith.mulf %177, %180 : vector<8x1xf32>
    %182 = vector.broadcast %181 : vector<8x1xf32> to vector<8x8xf32>
    %183 = arith.mulf %174, %182 : vector<8x8xf32>
    %184 = vector.shape_cast %183 : vector<8x8xf32> to vector<8x8x1xf32>
    %185 = vector.broadcast %184 : vector<8x8x1xf32> to vector<8x8x32xf32>
    %186 = arith.mulf %185, %0 : vector<8x8x32xf32>
    %cst_75 = arith.constant dense<0.000000e+00> : vector<8x32xf32>
    %187 = vector.multi_reduction <add>, %186, %cst_75 [1] : vector<8x8x32xf32> to vector<8x32xf32>
    %188 = vector.extract_strided_slice %2 {offsets = [0, 3], sizes = [8, 1], strides = [1, 1]} : vector<8x8xf32> to vector<8x1xf32>
    %c32_76 = arith.constant 32 : index
    %c0_77 = arith.constant 0 : index
    %189 = vector.load %arg5[%c32_76, %c0_77] : memref<64x128xf32, #tpu.memory_space<vmem>>, vector<32x128xf32>
    %cst_78 = arith.constant dense<0.000000e+00> : vector<8x128xf32>
    %190 = tpu.matmul %187, %189, %cst_78 {dimension_numbers = #tpu.dot_dimension_numbers<[1], [0], [0], [1], [0, 0, 1, 1], [], []>} : vector<8x32xf32>, vector<32x128xf32>, vector<8x128xf32> -> vector<8x128xf32>
    %191 = arith.addf %160, %190 : vector<8x128xf32>
    %192 = vector.broadcast %188 : vector<8x1xf32> to vector<8x128xf32>
    %193 = arith.mulf %192, %5 : vector<8x128xf32>
    %194 = arith.addf %191, %193 : vector<8x128xf32>
    %195 = arith.negf %194 : vector<8x128xf32>
    %196 = math.exp %195 : vector<8x128xf32>
    %cst_79 = arith.constant 1.000000e+00 : f32
    %197 = vector.broadcast %cst_79 : f32 to vector<8x128xf32>
    %198 = arith.addf %197, %196 : vector<8x128xf32>
    %199 = arith.divf %197, %198 : vector<8x128xf32>
    %200 = math.tanh %194 : vector<8x128xf32>
    %201 = vector.extract_strided_slice %199 {offsets = [0, 0], sizes = [8, 32], strides = [1, 1]} : vector<8x128xf32> to vector<8x32xf32>
    %202 = vector.extract_strided_slice %199 {offsets = [0, 32], sizes = [8, 32], strides = [1, 1]} : vector<8x128xf32> to vector<8x32xf32>
    %203 = vector.extract_strided_slice %200 {offsets = [0, 64], sizes = [8, 32], strides = [1, 1]} : vector<8x128xf32> to vector<8x32xf32>
    %204 = vector.extract_strided_slice %199 {offsets = [0, 96], sizes = [8, 32], strides = [1, 1]} : vector<8x128xf32> to vector<8x32xf32>
    %205 = arith.mulf %202, %155 : vector<8x32xf32>
    %206 = arith.mulf %201, %203 : vector<8x32xf32>
    %207 = arith.addf %205, %206 : vector<8x32xf32>
    %208 = math.tanh %207 : vector<8x32xf32>
    %209 = arith.mulf %204, %208 : vector<8x32xf32>
    %c0_80 = arith.constant 0 : index
    %c0_81 = arith.constant 0 : index
    %210 = vector.load %arg5[%c0_80, %c0_81] : memref<64x128xf32, #tpu.memory_space<vmem>>, vector<32x128xf32>
    %cst_82 = arith.constant dense<0.000000e+00> : vector<8x128xf32>
    %211 = tpu.matmul %209, %210, %cst_82 {dimension_numbers = #tpu.dot_dimension_numbers<[1], [0], [0], [1], [0, 0, 1, 1], [], []>} : vector<8x32xf32>, vector<32x128xf32>, vector<8x128xf32> -> vector<8x128xf32>
    %212 = arith.addf %211, %8 : vector<8x128xf32>
    %c0_83 = arith.constant 0 : index
    %c0_84 = arith.constant 0 : index
    %213 = vector.load %arg3[%c0_83, %c0_84] : memref<64x256xf32, #tpu.memory_space<vmem>>, vector<32x256xf32>
    %cst_85 = arith.constant dense<0.000000e+00> : vector<8x256xf32>
    %214 = tpu.matmul %209, %213, %cst_85 {dimension_numbers = #tpu.dot_dimension_numbers<[1], [0], [0], [1], [0, 0, 1, 1], [], []>} : vector<8x32xf32>, vector<32x256xf32>, vector<8x256xf32> -> vector<8x256xf32>
    %c32_86 = arith.constant 32 : index
    %c0_87 = arith.constant 0 : index
    %215 = vector.load %arg3[%c32_86, %c0_87] : memref<64x256xf32, #tpu.memory_space<vmem>>, vector<32x256xf32>
    %cst_88 = arith.constant dense<0.000000e+00> : vector<8x256xf32>
    %216 = tpu.matmul %207, %215, %cst_88 {dimension_numbers = #tpu.dot_dimension_numbers<[1], [0], [0], [1], [0, 0, 1, 1], [], []>} : vector<8x32xf32>, vector<32x256xf32>, vector<8x256xf32> -> vector<8x256xf32>
    %217 = arith.addf %214, %216 : vector<8x256xf32>
    %218 = arith.addf %217, %1 : vector<8x256xf32>
    %219 = math.tanh %218 : vector<8x256xf32>
    %c0_89 = arith.constant 0 : index
    %c0_90 = arith.constant 0 : index
    %220 = vector.load %arg4[%c0_89, %c0_90] : memref<256x8xf32, #tpu.memory_space<vmem>>, vector<256x8xf32>
    %cst_91 = arith.constant dense<0.000000e+00> : vector<8x8xf32>
    %221 = tpu.matmul %219, %220, %cst_91 {dimension_numbers = #tpu.dot_dimension_numbers<[1], [0], [0], [1], [0, 0, 1, 1], [], []>} : vector<8x256xf32>, vector<256x8xf32>, vector<8x8xf32> -> vector<8x8xf32>
    %cst_92 = arith.constant dense<0xFF800000> : vector<8xf32>
    %222 = vector.multi_reduction <maximumf>, %221, %cst_92 [1] : vector<8x8xf32> to vector<8xf32>
    %223 = vector.shape_cast %222 : vector<8xf32> to vector<8x1xf32>
    %224 = vector.broadcast %223 : vector<8x1xf32> to vector<8x8xf32>
    %225 = arith.subf %221, %224 : vector<8x8xf32>
    %226 = math.exp %225 : vector<8x8xf32>
    %cst_93 = arith.constant dense<0.000000e+00> : vector<8xf32>
    %227 = vector.multi_reduction <add>, %226, %cst_93 [1] : vector<8x8xf32> to vector<8xf32>
    %228 = vector.shape_cast %227 : vector<8xf32> to vector<8x1xf32>
    %229 = tpu.reciprocal %228 {approx = true} : vector<8x1xf32> -> vector<8x1xf32>
    %230 = arith.mulf %228, %229 : vector<8x1xf32>
    %cst_94 = arith.constant 2.000000e+00 : f32
    %231 = vector.broadcast %cst_94 : f32 to vector<8x1xf32>
    %232 = arith.subf %231, %230 : vector<8x1xf32>
    %233 = arith.mulf %229, %232 : vector<8x1xf32>
    %234 = vector.broadcast %233 : vector<8x1xf32> to vector<8x8xf32>
    %235 = arith.mulf %226, %234 : vector<8x8xf32>
    %236 = vector.shape_cast %235 : vector<8x8xf32> to vector<8x8x1xf32>
    %237 = vector.broadcast %236 : vector<8x8x1xf32> to vector<8x8x32xf32>
    %238 = arith.mulf %237, %0 : vector<8x8x32xf32>
    %cst_95 = arith.constant dense<0.000000e+00> : vector<8x32xf32>
    %239 = vector.multi_reduction <add>, %238, %cst_95 [1] : vector<8x8x32xf32> to vector<8x32xf32>
    %240 = vector.extract_strided_slice %2 {offsets = [0, 4], sizes = [8, 1], strides = [1, 1]} : vector<8x8xf32> to vector<8x1xf32>
    %c32_96 = arith.constant 32 : index
    %c0_97 = arith.constant 0 : index
    %241 = vector.load %arg5[%c32_96, %c0_97] : memref<64x128xf32, #tpu.memory_space<vmem>>, vector<32x128xf32>
    %cst_98 = arith.constant dense<0.000000e+00> : vector<8x128xf32>
    %242 = tpu.matmul %239, %241, %cst_98 {dimension_numbers = #tpu.dot_dimension_numbers<[1], [0], [0], [1], [0, 0, 1, 1], [], []>} : vector<8x32xf32>, vector<32x128xf32>, vector<8x128xf32> -> vector<8x128xf32>
    %243 = arith.addf %212, %242 : vector<8x128xf32>
    %244 = vector.broadcast %240 : vector<8x1xf32> to vector<8x128xf32>
    %245 = arith.mulf %244, %5 : vector<8x128xf32>
    %246 = arith.addf %243, %245 : vector<8x128xf32>
    %247 = arith.negf %246 : vector<8x128xf32>
    %248 = math.exp %247 : vector<8x128xf32>
    %cst_99 = arith.constant 1.000000e+00 : f32
    %249 = vector.broadcast %cst_99 : f32 to vector<8x128xf32>
    %250 = arith.addf %249, %248 : vector<8x128xf32>
    %251 = arith.divf %249, %250 : vector<8x128xf32>
    %252 = math.tanh %246 : vector<8x128xf32>
    %253 = vector.extract_strided_slice %251 {offsets = [0, 0], sizes = [8, 32], strides = [1, 1]} : vector<8x128xf32> to vector<8x32xf32>
    %254 = vector.extract_strided_slice %251 {offsets = [0, 32], sizes = [8, 32], strides = [1, 1]} : vector<8x128xf32> to vector<8x32xf32>
    %255 = vector.extract_strided_slice %252 {offsets = [0, 64], sizes = [8, 32], strides = [1, 1]} : vector<8x128xf32> to vector<8x32xf32>
    %256 = vector.extract_strided_slice %251 {offsets = [0, 96], sizes = [8, 32], strides = [1, 1]} : vector<8x128xf32> to vector<8x32xf32>
    %257 = arith.mulf %254, %207 : vector<8x32xf32>
    %258 = arith.mulf %253, %255 : vector<8x32xf32>
    %259 = arith.addf %257, %258 : vector<8x32xf32>
    %260 = math.tanh %259 : vector<8x32xf32>
    %261 = arith.mulf %256, %260 : vector<8x32xf32>
    %c0_100 = arith.constant 0 : index
    %c0_101 = arith.constant 0 : index
    %262 = vector.load %arg5[%c0_100, %c0_101] : memref<64x128xf32, #tpu.memory_space<vmem>>, vector<32x128xf32>
    %cst_102 = arith.constant dense<0.000000e+00> : vector<8x128xf32>
    %263 = tpu.matmul %261, %262, %cst_102 {dimension_numbers = #tpu.dot_dimension_numbers<[1], [0], [0], [1], [0, 0, 1, 1], [], []>} : vector<8x32xf32>, vector<32x128xf32>, vector<8x128xf32> -> vector<8x128xf32>
    %264 = arith.addf %263, %8 : vector<8x128xf32>
    %c0_103 = arith.constant 0 : index
    %c0_104 = arith.constant 0 : index
    %265 = vector.load %arg3[%c0_103, %c0_104] : memref<64x256xf32, #tpu.memory_space<vmem>>, vector<32x256xf32>
    %cst_105 = arith.constant dense<0.000000e+00> : vector<8x256xf32>
    %266 = tpu.matmul %261, %265, %cst_105 {dimension_numbers = #tpu.dot_dimension_numbers<[1], [0], [0], [1], [0, 0, 1, 1], [], []>} : vector<8x32xf32>, vector<32x256xf32>, vector<8x256xf32> -> vector<8x256xf32>
    %c32_106 = arith.constant 32 : index
    %c0_107 = arith.constant 0 : index
    %267 = vector.load %arg3[%c32_106, %c0_107] : memref<64x256xf32, #tpu.memory_space<vmem>>, vector<32x256xf32>
    %cst_108 = arith.constant dense<0.000000e+00> : vector<8x256xf32>
    %268 = tpu.matmul %259, %267, %cst_108 {dimension_numbers = #tpu.dot_dimension_numbers<[1], [0], [0], [1], [0, 0, 1, 1], [], []>} : vector<8x32xf32>, vector<32x256xf32>, vector<8x256xf32> -> vector<8x256xf32>
    %269 = arith.addf %266, %268 : vector<8x256xf32>
    %270 = arith.addf %269, %1 : vector<8x256xf32>
    %271 = math.tanh %270 : vector<8x256xf32>
    %c0_109 = arith.constant 0 : index
    %c0_110 = arith.constant 0 : index
    %272 = vector.load %arg4[%c0_109, %c0_110] : memref<256x8xf32, #tpu.memory_space<vmem>>, vector<256x8xf32>
    %cst_111 = arith.constant dense<0.000000e+00> : vector<8x8xf32>
    %273 = tpu.matmul %271, %272, %cst_111 {dimension_numbers = #tpu.dot_dimension_numbers<[1], [0], [0], [1], [0, 0, 1, 1], [], []>} : vector<8x256xf32>, vector<256x8xf32>, vector<8x8xf32> -> vector<8x8xf32>
    %cst_112 = arith.constant dense<0xFF800000> : vector<8xf32>
    %274 = vector.multi_reduction <maximumf>, %273, %cst_112 [1] : vector<8x8xf32> to vector<8xf32>
    %275 = vector.shape_cast %274 : vector<8xf32> to vector<8x1xf32>
    %276 = vector.broadcast %275 : vector<8x1xf32> to vector<8x8xf32>
    %277 = arith.subf %273, %276 : vector<8x8xf32>
    %278 = math.exp %277 : vector<8x8xf32>
    %cst_113 = arith.constant dense<0.000000e+00> : vector<8xf32>
    %279 = vector.multi_reduction <add>, %278, %cst_113 [1] : vector<8x8xf32> to vector<8xf32>
    %280 = vector.shape_cast %279 : vector<8xf32> to vector<8x1xf32>
    %281 = tpu.reciprocal %280 {approx = true} : vector<8x1xf32> -> vector<8x1xf32>
    %282 = arith.mulf %280, %281 : vector<8x1xf32>
    %cst_114 = arith.constant 2.000000e+00 : f32
    %283 = vector.broadcast %cst_114 : f32 to vector<8x1xf32>
    %284 = arith.subf %283, %282 : vector<8x1xf32>
    %285 = arith.mulf %281, %284 : vector<8x1xf32>
    %286 = vector.broadcast %285 : vector<8x1xf32> to vector<8x8xf32>
    %287 = arith.mulf %278, %286 : vector<8x8xf32>
    %288 = vector.shape_cast %287 : vector<8x8xf32> to vector<8x8x1xf32>
    %289 = vector.broadcast %288 : vector<8x8x1xf32> to vector<8x8x32xf32>
    %290 = arith.mulf %289, %0 : vector<8x8x32xf32>
    %cst_115 = arith.constant dense<0.000000e+00> : vector<8x32xf32>
    %291 = vector.multi_reduction <add>, %290, %cst_115 [1] : vector<8x8x32xf32> to vector<8x32xf32>
    %292 = vector.extract_strided_slice %2 {offsets = [0, 5], sizes = [8, 1], strides = [1, 1]} : vector<8x8xf32> to vector<8x1xf32>
    %c32_116 = arith.constant 32 : index
    %c0_117 = arith.constant 0 : index
    %293 = vector.load %arg5[%c32_116, %c0_117] : memref<64x128xf32, #tpu.memory_space<vmem>>, vector<32x128xf32>
    %cst_118 = arith.constant dense<0.000000e+00> : vector<8x128xf32>
    %294 = tpu.matmul %291, %293, %cst_118 {dimension_numbers = #tpu.dot_dimension_numbers<[1], [0], [0], [1], [0, 0, 1, 1], [], []>} : vector<8x32xf32>, vector<32x128xf32>, vector<8x128xf32> -> vector<8x128xf32>
    %295 = arith.addf %264, %294 : vector<8x128xf32>
    %296 = vector.broadcast %292 : vector<8x1xf32> to vector<8x128xf32>
    %297 = arith.mulf %296, %5 : vector<8x128xf32>
    %298 = arith.addf %295, %297 : vector<8x128xf32>
    %299 = arith.negf %298 : vector<8x128xf32>
    %300 = math.exp %299 : vector<8x128xf32>
    %cst_119 = arith.constant 1.000000e+00 : f32
    %301 = vector.broadcast %cst_119 : f32 to vector<8x128xf32>
    %302 = arith.addf %301, %300 : vector<8x128xf32>
    %303 = arith.divf %301, %302 : vector<8x128xf32>
    %304 = math.tanh %298 : vector<8x128xf32>
    %305 = vector.extract_strided_slice %303 {offsets = [0, 0], sizes = [8, 32], strides = [1, 1]} : vector<8x128xf32> to vector<8x32xf32>
    %306 = vector.extract_strided_slice %303 {offsets = [0, 32], sizes = [8, 32], strides = [1, 1]} : vector<8x128xf32> to vector<8x32xf32>
    %307 = vector.extract_strided_slice %304 {offsets = [0, 64], sizes = [8, 32], strides = [1, 1]} : vector<8x128xf32> to vector<8x32xf32>
    %308 = vector.extract_strided_slice %303 {offsets = [0, 96], sizes = [8, 32], strides = [1, 1]} : vector<8x128xf32> to vector<8x32xf32>
    %309 = arith.mulf %306, %259 : vector<8x32xf32>
    %310 = arith.mulf %305, %307 : vector<8x32xf32>
    %311 = arith.addf %309, %310 : vector<8x32xf32>
    %312 = math.tanh %311 : vector<8x32xf32>
    %313 = arith.mulf %308, %312 : vector<8x32xf32>
    %c0_120 = arith.constant 0 : index
    %c0_121 = arith.constant 0 : index
    %314 = vector.load %arg5[%c0_120, %c0_121] : memref<64x128xf32, #tpu.memory_space<vmem>>, vector<32x128xf32>
    %cst_122 = arith.constant dense<0.000000e+00> : vector<8x128xf32>
    %315 = tpu.matmul %313, %314, %cst_122 {dimension_numbers = #tpu.dot_dimension_numbers<[1], [0], [0], [1], [0, 0, 1, 1], [], []>} : vector<8x32xf32>, vector<32x128xf32>, vector<8x128xf32> -> vector<8x128xf32>
    %316 = arith.addf %315, %8 : vector<8x128xf32>
    %c0_123 = arith.constant 0 : index
    %c0_124 = arith.constant 0 : index
    %317 = vector.load %arg3[%c0_123, %c0_124] : memref<64x256xf32, #tpu.memory_space<vmem>>, vector<32x256xf32>
    %cst_125 = arith.constant dense<0.000000e+00> : vector<8x256xf32>
    %318 = tpu.matmul %313, %317, %cst_125 {dimension_numbers = #tpu.dot_dimension_numbers<[1], [0], [0], [1], [0, 0, 1, 1], [], []>} : vector<8x32xf32>, vector<32x256xf32>, vector<8x256xf32> -> vector<8x256xf32>
    %c32_126 = arith.constant 32 : index
    %c0_127 = arith.constant 0 : index
    %319 = vector.load %arg3[%c32_126, %c0_127] : memref<64x256xf32, #tpu.memory_space<vmem>>, vector<32x256xf32>
    %cst_128 = arith.constant dense<0.000000e+00> : vector<8x256xf32>
    %320 = tpu.matmul %311, %319, %cst_128 {dimension_numbers = #tpu.dot_dimension_numbers<[1], [0], [0], [1], [0, 0, 1, 1], [], []>} : vector<8x32xf32>, vector<32x256xf32>, vector<8x256xf32> -> vector<8x256xf32>
    %321 = arith.addf %318, %320 : vector<8x256xf32>
    %322 = arith.addf %321, %1 : vector<8x256xf32>
    %323 = math.tanh %322 : vector<8x256xf32>
    %c0_129 = arith.constant 0 : index
    %c0_130 = arith.constant 0 : index
    %324 = vector.load %arg4[%c0_129, %c0_130] : memref<256x8xf32, #tpu.memory_space<vmem>>, vector<256x8xf32>
    %cst_131 = arith.constant dense<0.000000e+00> : vector<8x8xf32>
    %325 = tpu.matmul %323, %324, %cst_131 {dimension_numbers = #tpu.dot_dimension_numbers<[1], [0], [0], [1], [0, 0, 1, 1], [], []>} : vector<8x256xf32>, vector<256x8xf32>, vector<8x8xf32> -> vector<8x8xf32>
    %cst_132 = arith.constant dense<0xFF800000> : vector<8xf32>
    %326 = vector.multi_reduction <maximumf>, %325, %cst_132 [1] : vector<8x8xf32> to vector<8xf32>
    %327 = vector.shape_cast %326 : vector<8xf32> to vector<8x1xf32>
    %328 = vector.broadcast %327 : vector<8x1xf32> to vector<8x8xf32>
    %329 = arith.subf %325, %328 : vector<8x8xf32>
    %330 = math.exp %329 : vector<8x8xf32>
    %cst_133 = arith.constant dense<0.000000e+00> : vector<8xf32>
    %331 = vector.multi_reduction <add>, %330, %cst_133 [1] : vector<8x8xf32> to vector<8xf32>
    %332 = vector.shape_cast %331 : vector<8xf32> to vector<8x1xf32>
    %333 = tpu.reciprocal %332 {approx = true} : vector<8x1xf32> -> vector<8x1xf32>
    %334 = arith.mulf %332, %333 : vector<8x1xf32>
    %cst_134 = arith.constant 2.000000e+00 : f32
    %335 = vector.broadcast %cst_134 : f32 to vector<8x1xf32>
    %336 = arith.subf %335, %334 : vector<8x1xf32>
    %337 = arith.mulf %333, %336 : vector<8x1xf32>
    %338 = vector.broadcast %337 : vector<8x1xf32> to vector<8x8xf32>
    %339 = arith.mulf %330, %338 : vector<8x8xf32>
    %340 = vector.shape_cast %339 : vector<8x8xf32> to vector<8x8x1xf32>
    %341 = vector.broadcast %340 : vector<8x8x1xf32> to vector<8x8x32xf32>
    %342 = arith.mulf %341, %0 : vector<8x8x32xf32>
    %cst_135 = arith.constant dense<0.000000e+00> : vector<8x32xf32>
    %343 = vector.multi_reduction <add>, %342, %cst_135 [1] : vector<8x8x32xf32> to vector<8x32xf32>
    %344 = vector.extract_strided_slice %2 {offsets = [0, 6], sizes = [8, 1], strides = [1, 1]} : vector<8x8xf32> to vector<8x1xf32>
    %c32_136 = arith.constant 32 : index
    %c0_137 = arith.constant 0 : index
    %345 = vector.load %arg5[%c32_136, %c0_137] : memref<64x128xf32, #tpu.memory_space<vmem>>, vector<32x128xf32>
    %cst_138 = arith.constant dense<0.000000e+00> : vector<8x128xf32>
    %346 = tpu.matmul %343, %345, %cst_138 {dimension_numbers = #tpu.dot_dimension_numbers<[1], [0], [0], [1], [0, 0, 1, 1], [], []>} : vector<8x32xf32>, vector<32x128xf32>, vector<8x128xf32> -> vector<8x128xf32>
    %347 = arith.addf %316, %346 : vector<8x128xf32>
    %348 = vector.broadcast %344 : vector<8x1xf32> to vector<8x128xf32>
    %349 = arith.mulf %348, %5 : vector<8x128xf32>
    %350 = arith.addf %347, %349 : vector<8x128xf32>
    %351 = arith.negf %350 : vector<8x128xf32>
    %352 = math.exp %351 : vector<8x128xf32>
    %cst_139 = arith.constant 1.000000e+00 : f32
    %353 = vector.broadcast %cst_139 : f32 to vector<8x128xf32>
    %354 = arith.addf %353, %352 : vector<8x128xf32>
    %355 = arith.divf %353, %354 : vector<8x128xf32>
    %356 = math.tanh %350 : vector<8x128xf32>
    %357 = vector.extract_strided_slice %355 {offsets = [0, 0], sizes = [8, 32], strides = [1, 1]} : vector<8x128xf32> to vector<8x32xf32>
    %358 = vector.extract_strided_slice %355 {offsets = [0, 32], sizes = [8, 32], strides = [1, 1]} : vector<8x128xf32> to vector<8x32xf32>
    %359 = vector.extract_strided_slice %356 {offsets = [0, 64], sizes = [8, 32], strides = [1, 1]} : vector<8x128xf32> to vector<8x32xf32>
    %360 = vector.extract_strided_slice %355 {offsets = [0, 96], sizes = [8, 32], strides = [1, 1]} : vector<8x128xf32> to vector<8x32xf32>
    %361 = arith.mulf %358, %311 : vector<8x32xf32>
    %362 = arith.mulf %357, %359 : vector<8x32xf32>
    %363 = arith.addf %361, %362 : vector<8x32xf32>
    %364 = math.tanh %363 : vector<8x32xf32>
    %365 = arith.mulf %360, %364 : vector<8x32xf32>
    %c0_140 = arith.constant 0 : index
    %c0_141 = arith.constant 0 : index
    %366 = vector.load %arg5[%c0_140, %c0_141] : memref<64x128xf32, #tpu.memory_space<vmem>>, vector<32x128xf32>
    %cst_142 = arith.constant dense<0.000000e+00> : vector<8x128xf32>
    %367 = tpu.matmul %365, %366, %cst_142 {dimension_numbers = #tpu.dot_dimension_numbers<[1], [0], [0], [1], [0, 0, 1, 1], [], []>} : vector<8x32xf32>, vector<32x128xf32>, vector<8x128xf32> -> vector<8x128xf32>
    %368 = arith.addf %367, %8 : vector<8x128xf32>
    %c0_143 = arith.constant 0 : index
    %c0_144 = arith.constant 0 : index
    %369 = vector.load %arg3[%c0_143, %c0_144] : memref<64x256xf32, #tpu.memory_space<vmem>>, vector<32x256xf32>
    %cst_145 = arith.constant dense<0.000000e+00> : vector<8x256xf32>
    %370 = tpu.matmul %365, %369, %cst_145 {dimension_numbers = #tpu.dot_dimension_numbers<[1], [0], [0], [1], [0, 0, 1, 1], [], []>} : vector<8x32xf32>, vector<32x256xf32>, vector<8x256xf32> -> vector<8x256xf32>
    %c32_146 = arith.constant 32 : index
    %c0_147 = arith.constant 0 : index
    %371 = vector.load %arg3[%c32_146, %c0_147] : memref<64x256xf32, #tpu.memory_space<vmem>>, vector<32x256xf32>
    %cst_148 = arith.constant dense<0.000000e+00> : vector<8x256xf32>
    %372 = tpu.matmul %363, %371, %cst_148 {dimension_numbers = #tpu.dot_dimension_numbers<[1], [0], [0], [1], [0, 0, 1, 1], [], []>} : vector<8x32xf32>, vector<32x256xf32>, vector<8x256xf32> -> vector<8x256xf32>
    %373 = arith.addf %370, %372 : vector<8x256xf32>
    %374 = arith.addf %373, %1 : vector<8x256xf32>
    %375 = math.tanh %374 : vector<8x256xf32>
    %c0_149 = arith.constant 0 : index
    %c0_150 = arith.constant 0 : index
    %376 = vector.load %arg4[%c0_149, %c0_150] : memref<256x8xf32, #tpu.memory_space<vmem>>, vector<256x8xf32>
    %cst_151 = arith.constant dense<0.000000e+00> : vector<8x8xf32>
    %377 = tpu.matmul %375, %376, %cst_151 {dimension_numbers = #tpu.dot_dimension_numbers<[1], [0], [0], [1], [0, 0, 1, 1], [], []>} : vector<8x256xf32>, vector<256x8xf32>, vector<8x8xf32> -> vector<8x8xf32>
    %cst_152 = arith.constant dense<0xFF800000> : vector<8xf32>
    %378 = vector.multi_reduction <maximumf>, %377, %cst_152 [1] : vector<8x8xf32> to vector<8xf32>
    %379 = vector.shape_cast %378 : vector<8xf32> to vector<8x1xf32>
    %380 = vector.broadcast %379 : vector<8x1xf32> to vector<8x8xf32>
    %381 = arith.subf %377, %380 : vector<8x8xf32>
    %382 = math.exp %381 : vector<8x8xf32>
    %cst_153 = arith.constant dense<0.000000e+00> : vector<8xf32>
    %383 = vector.multi_reduction <add>, %382, %cst_153 [1] : vector<8x8xf32> to vector<8xf32>
    %384 = vector.shape_cast %383 : vector<8xf32> to vector<8x1xf32>
    %385 = tpu.reciprocal %384 {approx = true} : vector<8x1xf32> -> vector<8x1xf32>
    %386 = arith.mulf %384, %385 : vector<8x1xf32>
    %cst_154 = arith.constant 2.000000e+00 : f32
    %387 = vector.broadcast %cst_154 : f32 to vector<8x1xf32>
    %388 = arith.subf %387, %386 : vector<8x1xf32>
    %389 = arith.mulf %385, %388 : vector<8x1xf32>
    %390 = vector.broadcast %389 : vector<8x1xf32> to vector<8x8xf32>
    %391 = arith.mulf %382, %390 : vector<8x8xf32>
    %392 = vector.shape_cast %391 : vector<8x8xf32> to vector<8x8x1xf32>
    %393 = vector.broadcast %392 : vector<8x8x1xf32> to vector<8x8x32xf32>
    %394 = arith.mulf %393, %0 : vector<8x8x32xf32>
    %cst_155 = arith.constant dense<0.000000e+00> : vector<8x32xf32>
    %395 = vector.multi_reduction <add>, %394, %cst_155 [1] : vector<8x8x32xf32> to vector<8x32xf32>
    %396 = vector.extract_strided_slice %2 {offsets = [0, 7], sizes = [8, 1], strides = [1, 1]} : vector<8x8xf32> to vector<8x1xf32>
    %c32_156 = arith.constant 32 : index
    %c0_157 = arith.constant 0 : index
    %397 = vector.load %arg5[%c32_156, %c0_157] : memref<64x128xf32, #tpu.memory_space<vmem>>, vector<32x128xf32>
    %cst_158 = arith.constant dense<0.000000e+00> : vector<8x128xf32>
    %398 = tpu.matmul %395, %397, %cst_158 {dimension_numbers = #tpu.dot_dimension_numbers<[1], [0], [0], [1], [0, 0, 1, 1], [], []>} : vector<8x32xf32>, vector<32x128xf32>, vector<8x128xf32> -> vector<8x128xf32>
    %399 = arith.addf %368, %398 : vector<8x128xf32>
    %400 = vector.broadcast %396 : vector<8x1xf32> to vector<8x128xf32>
    %401 = arith.mulf %400, %5 : vector<8x128xf32>
    %402 = arith.addf %399, %401 : vector<8x128xf32>
    %403 = arith.negf %402 : vector<8x128xf32>
    %404 = math.exp %403 : vector<8x128xf32>
    %cst_159 = arith.constant 1.000000e+00 : f32
    %405 = vector.broadcast %cst_159 : f32 to vector<8x128xf32>
    %406 = arith.addf %405, %404 : vector<8x128xf32>
    %407 = arith.divf %405, %406 : vector<8x128xf32>
    %408 = math.tanh %402 : vector<8x128xf32>
    %409 = vector.extract_strided_slice %407 {offsets = [0, 0], sizes = [8, 32], strides = [1, 1]} : vector<8x128xf32> to vector<8x32xf32>
    %410 = vector.extract_strided_slice %407 {offsets = [0, 32], sizes = [8, 32], strides = [1, 1]} : vector<8x128xf32> to vector<8x32xf32>
    %411 = vector.extract_strided_slice %408 {offsets = [0, 64], sizes = [8, 32], strides = [1, 1]} : vector<8x128xf32> to vector<8x32xf32>
    %412 = vector.extract_strided_slice %407 {offsets = [0, 96], sizes = [8, 32], strides = [1, 1]} : vector<8x128xf32> to vector<8x32xf32>
    %413 = arith.mulf %410, %363 : vector<8x32xf32>
    %414 = arith.mulf %409, %411 : vector<8x32xf32>
    %415 = arith.addf %413, %414 : vector<8x32xf32>
    %416 = math.tanh %415 : vector<8x32xf32>
    %417 = arith.mulf %412, %416 : vector<8x32xf32>
    %c0_160 = arith.constant 0 : index
    %c0_161 = arith.constant 0 : index
    %418 = vector.load %arg6[%c0_160, %c0_161] : memref<64x2xf32, #tpu.memory_space<vmem>>, vector<32x2xf32>
    %cst_162 = arith.constant dense<0.000000e+00> : vector<8x2xf32>
    %419 = tpu.matmul %417, %418, %cst_162 {dimension_numbers = #tpu.dot_dimension_numbers<[1], [0], [0], [1], [0, 0, 1, 1], [], []>} : vector<8x32xf32>, vector<32x2xf32>, vector<8x2xf32> -> vector<8x2xf32>
    %c32_163 = arith.constant 32 : index
    %c0_164 = arith.constant 0 : index
    %420 = vector.load %arg6[%c32_163, %c0_164] : memref<64x2xf32, #tpu.memory_space<vmem>>, vector<32x2xf32>
    %cst_165 = arith.constant dense<0.000000e+00> : vector<8x2xf32>
    %421 = tpu.matmul %395, %420, %cst_165 {dimension_numbers = #tpu.dot_dimension_numbers<[1], [0], [0], [1], [0, 0, 1, 1], [], []>} : vector<8x32xf32>, vector<32x2xf32>, vector<8x2xf32> -> vector<8x2xf32>
    %422 = arith.addf %419, %421 : vector<8x2xf32>
    %423 = vector.broadcast %9 : vector<1x2xf32> to vector<8x2xf32>
    %424 = arith.addf %422, %423 : vector<8x2xf32>
    %cst_166 = arith.constant dense<0xFF800000> : vector<8xf32>
    %425 = vector.multi_reduction <maximumf>, %424, %cst_166 [1] : vector<8x2xf32> to vector<8xf32>
    %426 = vector.shape_cast %425 : vector<8xf32> to vector<8x1xf32>
    %427 = vector.broadcast %426 : vector<8x1xf32> to vector<8x2xf32>
    %428 = arith.subf %424, %427 : vector<8x2xf32>
    %429 = math.exp %428 : vector<8x2xf32>
    %cst_167 = arith.constant dense<0.000000e+00> : vector<8xf32>
    %430 = vector.multi_reduction <add>, %429, %cst_167 [1] : vector<8x2xf32> to vector<8xf32>
    %431 = vector.shape_cast %430 : vector<8xf32> to vector<8x1xf32>
    %432 = math.log %431 : vector<8x1xf32>
    %433 = vector.broadcast %432 : vector<8x1xf32> to vector<8x2xf32>
    %434 = arith.subf %428, %433 : vector<8x2xf32>
    %c0_168 = arith.constant 0 : index
    %c0_169 = arith.constant 0 : index
    %435 = vector.load %arg8[%c0_168, %c0_169] : memref<8x2xf32, #tpu.memory_space<vmem>>, vector<8x2xf32>
    tpu.vector_store %arg8[%c0_168, %c0_169], %434 {strides = array<i32>} : memref<8x2xf32, #tpu.memory_space<vmem>>, vector<8x2xf32>,
    return
  }
}

</mosaic_0001>

<bundles_post_ra>
// kernel: tpu_custom_call.1
= control target key start
LH: loop header
LB: loop body
LE: loop exit
PB: predicated region body
PF: predicated region fallthrough
CT: control target
= control target key end

     0   :  { %vm159_vm0 = vcmask 64512   ;;  %v174_v62 = vlaneseq  ;;  %vm5719_vm1 = vmmov 0   ;;  %vm238_vm2 = vcmask 261120   ;;  %s5722_s13 = smov 64   ;;  %s5723_s14 = smov 32   ;;  %s6971_s4 = inlined_call_operand.vmem [shape: f32[256,8], index: 4, kind: input, shape index: {}]   ;;  %s6972_s1 = inlined_call_operand.vmem [shape: f32[8,256], index: 1, kind: input, shape index: {}]   ;;  %s6973_s5 = inlined_call_operand.vmem [shape: f32[64,128], index: 5, kind: input, shape index: {}]   ;;  %s6974_s2 = inlined_call_operand.vmem [shape: f32[8,8], index: 2, kind: input, shape index: {}]   ;;  %s6975_s0 = inlined_call_operand.vmem [shape: f32[8,8,32], index: 0, kind: input, shape index: {}]   ;;  %s6976_s7 = inlined_call_operand.vmem [shape: f32[1,258], index: 7, kind: input, shape index: {}]   ;;  %s6977_s3 = inlined_call_operand.vmem [shape: f32[64,256], index: 3, kind: input, shape index: {}]   ;;  %s6978_s6 = inlined_call_operand.vmem [shape: f32[64,2], index: 6, kind: input, shape index: {}]   ;;  %s6979_s8 = inlined_call_operand.vmem [shape: f32[8,2], index: 8, kind: output, shape index: {}]  }
   0x1   :  { %v73_v0 = vld [vmem:[%s6971_s4 + $0x80] sm:$0xff]  ;;  %v74_v1 = vld [vmem:[%s6971_s4 + $0x88] sm:$0xff]  ;;  %v75_v5 = vld [vmem:[%s6971_s4 + $0x90] sm:$0xff]  ;;  %vm307_vm3 = vcmask 1041409   ;;  %vm309_vm4 = vcmask 1042434   ;;  %vm311_vm5 = vcmask 1043459  }
   0x2   :  { %v57_v2 = vld [vmem:[%s6971_s4] sm:$0xff]  ;;  %v5786_v3 = vpack.c.bf16 %v74_v1, %v73_v0  ;;  %v58_v4 = vld [vmem:[%s6971_s4 + $0x8] sm:$0xff]  ;;  %v76_v6 = vld [vmem:[%s6971_s4 + $0x98] sm:$0xff]  ;;  %v175_v1 = vshrl.u32 %v174_v62, 7  ;;  %vm313_vm6 = vcmask 1044484   ;;  %vm315_vm7 = vcmask 1045509  }
   0x3   :  { %v5797_v7 = vpack.c.bf16 %v58_v4, %v57_v2  ;;  %v5799_v8 = vpack.c.bf16 %v76_v6, %v75_v5  ;;  %v59_v9 = vld [vmem:[%s6971_s4 + $0x10] sm:$0xff]  ;;  %v60_v10 = vld [vmem:[%s6971_s4 + $0x18] sm:$0xff]  ;;  %v77_v11 = vld [vmem:[%s6971_s4 + $0xa0] sm:$0xff]  ;;  %vm317_vm8 = vcmask 1046534   ;;  %vm319_vm9 = vcmask 1047559  }
   0x4   :  { %7039 = vst [vmem:[#allocation2_spill] sm:$0xff] %v5786_v3  ;;  %5054 = vmatprep.subr.bf16.mxu0 %v5786_v3  ;;  %v78_v12 = vld [vmem:[%s6971_s4 + $0xa8] sm:$0xff]  ;;  %v5815_v13 = vpack.c.bf16 %v60_v10, %v59_v9  ;;  %v61_v15 = vld [vmem:[%s6971_s4 + $0x20] sm:$0xff]  ;;  %v79_v17 = vld [vmem:[%s6971_s4 + $0xb0] sm:$0xff]  ;;  %v5952_v5 = vsub.s32 2, %v175_v1  ;;  %v5954_v6 = vsub.s32 0, %v175_v1 }
   0x5   :  { %5056 = vmatpush3.bf16.msra.mxu0 %v5797_v7  ;;  %v5818_v14 = vpack.c.bf16 %v78_v12, %v77_v11  ;;  %v62_v16 = vld [vmem:[%s6971_s4 + $0x28] sm:$0xff]  ;;  %v80_v18 = vld [vmem:[%s6971_s4 + $0xb8] sm:$0xff]  ;;  %v63_v21 = vld [vmem:[%s6971_s4 + $0x30] sm:$0xff]  ;;  %v5958_v12 = vsub.s32 1, %v175_v1  ;;  %vm4441_vm10 = vcmask 15360  }
   0x6   :  { %5058 = vmatprep.subr.bf16.mxu0 %v5799_v8  ;;  %v5833_v19 = vpack.c.bf16 %v62_v16, %v61_v15  ;;  %v5836_v20 = vpack.c.bf16 %v80_v18, %v79_v17  ;;  %v64_v22 = vld [vmem:[%s6971_s4 + $0x38] sm:$0xff]  ;;  %v81_v23 = vld [vmem:[%s6971_s4 + $0xc0] sm:$0xff]  ;;  %v82_v24 = vld [vmem:[%s6971_s4 + $0xc8] sm:$0xff]  ;;  %7043 = vst [vmem:[#allocation6_spill] sm:$0xff] %v5952_v5  ;;  %v5961_v16 = vsub.s32 3, %v175_v1  ;;  %v5964_v18 = vsub.s32 4, %v175_v1 }
   0x7   :  { %v5853_v25 = vld [vmem:[%s6972_s1 + $0x8] sm:$0xff]  ;;  %v5856_v26 = vpack.c.bf16 %v64_v22, %v63_v21  ;;  %v5860_v27 = vpack.c.bf16 %v82_v24, %v81_v23  ;;  %v65_v28 = vld [vmem:[%s6971_s4 + $0x40] sm:$0xff]  ;;  %v83_v30 = vld [vmem:[%s6971_s4 + $0xd0] sm:$0xff]  ;;  %7044 = vst [vmem:[#allocation7_spill] sm:$0xff] %v5954_v6  ;;  %v5967_v22 = vsub.s32 5, %v175_v1  ;;  %v5970_v24 = vsub.s32 6, %v175_v1 }
   0x8   :  { %5560 = vtanh.f32 %v5853_v25  ;;  %v66_v29 = vld [vmem:[%s6971_s4 + $0x48] sm:$0xff]  ;;  %v84_v31 = vld [vmem:[%s6971_s4 + $0xd8] sm:$0xff]  ;;  %v67_v34 = vld [vmem:[%s6971_s4 + $0x50] sm:$0xff]  ;;  %7045 = vst [vmem:[#allocation8_spill] sm:$0xff] %v5958_v12 }
   0x9   :  { %5060 = vmatpush3.bf16.msra.mxu0 %v5815_v13  ;;  %v5875_v32 = vpack.c.bf16 %v66_v29, %v65_v28  ;;  %v5878_v33 = vpack.c.bf16 %v84_v31, %v83_v30  ;;  %v68_v35 = vld [vmem:[%s6971_s4 + $0x58] sm:$0xff]  ;;  %v85_v36 = vld [vmem:[%s6971_s4 + $0xe0] sm:$0xff]  ;;  %v86_v37 = vld [vmem:[%s6971_s4 + $0xe8] sm:$0xff]  ;;  %7046 = vst [vmem:[#allocation9_spill] sm:$0xff] %v5961_v16  ;;  %v5973_v29 = vsub.s32 7, %v175_v1 }
   0xa   :  { %5062 = vmatprep.subr.bf16.mxu0 %v5818_v14  ;;  %v5895_v38 = vld [vmem:[%s6972_s1] sm:$0xff]  ;;  %v5898_v39 = vpack.c.bf16 %v68_v35, %v67_v34  ;;  %v5901_v40 = vpack.c.bf16 %v86_v37, %v85_v36  ;;  %v70_v42 = vld [vmem:[%s6971_s4 + $0x68] sm:$0xff]  ;;  %v87_v44 = vld [vmem:[%s6971_s4 + $0xf0] sm:$0xff]  ;;  %7047 = vst [vmem:[#allocation10_spill] sm:$0xff] %v5964_v18  ;;  %v6980_v35 = vmov 0.0|0.0  }
   0xb   :  { %v69_v41 = vld [vmem:[%s6971_s4 + $0x60] sm:$0xff]  ;;  %v88_v45 = vld [vmem:[%s6971_s4 + $0xf8] sm:$0xff]  ;;  %5562 = vtanh.f32 %v5895_v38  ;;  %v71_v48 = vld [vmem:[%s6971_s4 + $0x70] sm:$0xff]  ;;  %7048 = vst [vmem:[#allocation11_spill] sm:$0xff] %v5967_v22  ;;  %5085 = vmatprep.subr.bf16.mxu1 %v6980_v35 }
   0xc   :  { %v5917_v46 = vpack.c.bf16 %v70_v42, %v69_v41  ;;  %v5920_v47 = vpack.c.bf16 %v88_v45, %v87_v44  ;;  %v72_v49 = vld [vmem:[%s6971_s4 + $0x78] sm:$0xff]  ;;  %7049 = vst [vmem:[#allocation12_spill] sm:$0xff] %v5970_v24  ;;  %7050 = vst [vmem:[#allocation13_spill] sm:$0xff] %v5973_v29  ;;  %v295_v30 = vld [vmem:[%s6973_s5 + $0x20] sm:$0xff]  ;;  %v5721_v44 = vmov 0  }
   0xd   :  { %5064 = vmatpush3.bf16.msra.mxu0 %v5833_v19  ;;  %v5929_v50 = vpack.c.bf16 %v72_v49, %v71_v48  ;;  %v296_v31 = vld [vmem:[%s6973_s5 + $0x28] sm:$0xff]  ;;  %v297_v37 = vld [vmem:[%s6973_s5 + $0x30] sm:$0xff]  ;;  %v298_v41 = vld [vmem:[%s6973_s5 + $0x38] sm:$0xff]  ;;  %5551 = vset.pattern.permute.xlu1 %v5721_v44 }
   0xe   :  { %5066 = vmatprep.subr.bf16.mxu0 %v5836_v20  ;;  %7040 = vst [vmem:[#allocation3_spill] sm:$0xff] %v5917_v46  ;;  %7041 = vst [vmem:[#allocation4_spill] sm:$0xff] %v5920_v47  ;;  %v5981_v34 = vpack.c.bf16 %v296_v31, %v295_v30  ;;  %v5993_v42 = vpack.c.bf16 %v298_v41, %v297_v37  ;;  %v6002_v45 = vld [vmem:[%s6974_s2] sm:$0xff] }
   0xf   :  { %7042 = vst [vmem:[#allocation5_spill] sm:$0xff] %v5929_v50  ;;  %7051 = vst [vmem:[#allocation14_spill] sm:$0xff] %v6002_v45  ;;  %v6008_v49 = vld [vmem:[%s6975_s0] sm:$0xff] }
  0x10   :  { %5087 = vmatpush3.bf16.msra.mxu1 %v5981_v34  ;;  %7052 = vst [vmem:[#allocation15_spill] sm:$0xff] %v6008_v49 }
  0x11   :  { %5068 = vmatpush3.bf16.msra.mxu0 %v5856_v26  ;;  %5088 = vmatprep.subr.bf16.mxu1 %v6980_v35 }
  0x12   :  { %5070 = vmatprep.subr.bf16.mxu0 %v5860_v27  ;;  %v5561_v43 = vpop.eup %5560 }
  0x13   :  { %153 = vmatprep.mubr.f32.mxu0 %v5561_v43  ;;  %v6982_v43 = vmov 0.0  }
  0x14   :  { %4874 = vmatprep.mubr.msk.f32.mxu1 %vm5719_vm1, %v6982_v43  ;;  %5090 = vmatpush3.bf16.msra.mxu1 %v5993_v42 }
  0x15   :  { %5072 = vmatpush3.bf16.msra.mxu0 %v5875_v32  ;;  %v5563_v51 = vpop.eup %5562  ;;  %5091 = vmatprep.subr.bf16.mxu1 %v6980_v35 }
  0x16   :  { %5074 = vmatprep.subr.bf16.mxu0 %v5878_v33 }
  0x19   :  { %5076 = vmatpush3.bf16.msra.mxu0 %v5898_v39 }
  0x1a   :  { %5078 = vmatprep.subr.bf16.mxu0 %v5901_v40 }
  0x1d   :  { %5080 = vmatpush3.bf16.msra.mxu0 %v5917_v46 }
  0x1e   :  { %5082 = vmatprep.subr.bf16.mxu0 %v5920_v47 }
  0x21   :  { %5084 = vmatpush3.bf16.msra.mxu0 %v5929_v50 }
  0x22   :  { %5114 = vmatprep.subr.bf16.mxu0 %v5786_v3 }
  0x24   :  { %154 = vmatmul.mubr.f32.vlgmr.msra.gmra.mrb[0].mxu0 %v5563_v51  ;;  %v6013_v51 = vld [vmem:[%s6975_s0 + $0x8] sm:$0xff] }
  0x25   :  { %5116 = vmatpush3.bf16.msra.mxu0 %v5797_v7  ;;  %7053 = vst [vmem:[#allocation16_spill] sm:$0xff] %v6013_v51 }
  0x26   :  { %5118 = vmatprep.subr.bf16.mxu0 %v5799_v8 }
  0x29   :  { %5120 = vmatpush3.bf16.msra.mxu0 %v5815_v13 }
  0x2a   :  { %5122 = vmatprep.subr.bf16.mxu0 %v5818_v14 }
  0x2d   :  { %5124 = vmatpush3.bf16.msra.mxu0 %v5833_v19 }
  0x2e   :  { %5126 = vmatprep.subr.bf16.mxu0 %v5836_v20 }
  0x31   :  { %5128 = vmatpush3.bf16.msra.mxu0 %v5856_v26 }
  0x32   :  { %5130 = vmatprep.subr.bf16.mxu0 %v5860_v27 }
  0x35   :  { %5132 = vmatpush3.bf16.msra.mxu0 %v5875_v32 }
  0x36   :  { %5134 = vmatprep.subr.bf16.mxu0 %v5878_v33 }
  0x39   :  { %5136 = vmatpush3.bf16.msra.mxu0 %v5898_v39 }
  0x3a   :  { %5138 = vmatprep.subr.bf16.mxu0 %v5901_v40 }
  0x3d   :  { %5140 = vmatpush3.bf16.msra.mxu0 %v5917_v46 }
  0x3e   :  { %5142 = vmatprep.subr.bf16.mxu0 %v5920_v47 }
  0x41   :  { %5144 = vmatpush3.bf16.msra.mxu0 %v5929_v50 }
  0x42   :  { %5174 = vmatprep.subr.bf16.mxu0 %v5786_v3 }
  0xf7   :  { %v4533_v52 = vpop.f32.mrb[0].mxu0 }
  0xf8   :  { %v4534_v53 = vpop.f32.mrb[1].mxu0 }
  0xf9   :  { %v4535_v54 = vadd.f32 %v4534_v53, %v4533_v52  ;;  %v6018_v53 = vld [vmem:[%s6975_s0 + $0x10] sm:$0xff] }
  0xfa   :  { %7054 = vst [vmem:[#allocation17_spill] sm:$0xff] %v6018_v53 }
  0xfb   :  { %v160_v55 = vsel %vm159_vm0, %v4535_v54, -inf }
  0xfc   :  { %161 = vmax.xlane.f32.xlu0 %v160_v55 }
 0x189   :  { %v162_v56 = vpop.xlane.xlu0 %161 }
 0x18a   :  { %v163_v57 = vsub.f32 %v4535_v54, %v162_v56 }
 0x18c   :  { %v164_v58 = vmul.f32 1.442695, %v163_v57 }
 0x18e   :  { %5564 = vpow2.f32 %v164_v58  ;;  %v6026_v58 = vld [vmem:[%s6975_s0 + $0x18] sm:$0xff] }
 0x18f   :  { %7055 = vst [vmem:[#allocation18_spill] sm:$0xff] %v6026_v58 }
 0x198   :  { %v5565_v59 = vpop.eup %5564 }
 0x199   :  { %v166_v60 = vsel %vm159_vm0, %v5565_v59, 0.0 }
 0x19a   :  { %167 = vadd.xlane.f32.xlu0 %v166_v60 }
 0x227   :  { %v168_v61 = vpop.xlane.xlu0 %167 }
 0x228   :  { %5566 = vrcp.f32 %v168_v61 }
 0x232   :  { %v5567_v63 = vpop.eup %5566 }
 0x233   :  { %v170_v0 = vmul.f32 %v5567_v63, %v168_v61 }
 0x235   :  { %v171_v2 = vsub.f32 2.0, %v170_v0 }
 0x237   :  { %v172_v4 = vmul.f32 %v5567_v63, %v171_v2  ;;  %v6035_v2 = vld [vmem:[%s6975_s0 + $0x20] sm:$0xff] }
 0x238   :  { %7056 = vst [vmem:[#allocation19_spill] sm:$0xff] %v6035_v2 }
 0x239   :  { %v173_v9 = vmul.f32 %v5565_v59, %v172_v4 }
 0x23b   :  { %v191_v10 = vrot.slane %v173_v9, %v5952_v5  ;;  %v177_v11 = vrot.slane %v173_v9, %v5954_v6  ;;  %v184_v15 = vrot.slane %v173_v9, %v5958_v12  ;;  %v198_v17 = vrot.slane %v173_v9, %v5961_v16 }
 0x23c   :  { %v205_v21 = vrot.slane %v173_v9, %v5964_v18  ;;  %v212_v23 = vrot.slane %v173_v9, %v5967_v22  ;;  %v219_v28 = vrot.slane %v173_v9, %v5970_v24  ;;  %v226_v36 = vrot.slane %v173_v9, %v5973_v29 }
 0x23d   :  { %193 = vbcast.lane.b32.xlu0 %v191_v10, 256  ;;  %179 = vbcast.lane.b32.xlu1 %v177_v11, 256 }
 0x241   :  { %186 = vbcast.lane.b32.xlu1 %v184_v15, 256 }
 0x245   :  { %200 = vbcast.lane.b32.xlu1 %v198_v17, 256 }
 0x249   :  { %207 = vbcast.lane.b32.xlu1 %v205_v21, 256 }
 0x24d   :  { %214 = vbcast.lane.b32.xlu1 %v212_v23, 256  ;;  %v6042_v23 = vld [vmem:[%s6975_s0 + $0x28] sm:$0xff] }
 0x24e   :  { %7057 = vst [vmem:[#allocation20_spill] sm:$0xff] %v6042_v23 }
 0x251   :  { %221 = vbcast.lane.b32.xlu1 %v219_v28, 256 }
 0x255   :  { %228 = vbcast.lane.b32.xlu1 %v226_v36, 256 }
 0x259   :  { %396 = vperm.xlu1 %5551, %v6002_v45  }
 0x2af   :  { %v180_v48 = vpop.permute.xlu1 %179  ;;  %v194_v52 = vpop.permute.xlu0 %193 }
 0x2b0   :  { %v230_v54 = vmul.f32 %v180_v48, %v6008_v49  ;;  %v232_v57 = vmul.f32 %v194_v52, %v6018_v53 }
 0x2b2   :  { %v239_v59 = vsel %vm238_vm2, %v230_v54, 0.0  ;;  %v253_v0 = vsel %vm238_vm2, %v232_v57, 0.0  ;;  %v6049_v54 = vld [vmem:[%s6975_s0 + $0x30] sm:$0xff] }
 0x2b3   :  { %v187_v55 = vpop.permute.xlu1 %186  ;;  %v240_v1 = vrot.slane %v239_v59, 4  ;;  %v254_v15 = vrot.slane %v253_v0, 4  ;;  %7058 = vst [vmem:[#allocation21_spill] sm:$0xff] %v6049_v54 }
 0x2b4   :  { %v231_v56 = vmul.f32 %v187_v55, %v6013_v51 }
 0x2b5   :  { %v241_v21 = vadd.f32 %v240_v1, %v239_v59  ;;  %v255_v41 = vadd.f32 %v254_v15, %v253_v0 }
 0x2b6   :  { %v246_v60 = vsel %vm238_vm2, %v231_v56, 0.0 }
 0x2b7   :  { %v247_v61 = vrot.slane %v246_v60, 4  ;;  %v201_v62 = vpop.permute.xlu1 %200  ;;  %v242_v48 = vrot.slane %v241_v21, 2 }
 0x2b8   :  { %v233_v63 = vmul.f32 %v201_v62, %v6026_v58 }
 0x2b9   :  { %v248_v9 = vadd.f32 %v247_v61, %v246_v60  ;;  %v256_v61 = vrot.slane %v255_v41, 2  ;;  %v243_v0 = vadd.f32 %v242_v48, %v241_v21 }
 0x2ba   :  { %v260_v4 = vsel %vm238_vm2, %v233_v63, 0.0 }
 0x2bb   :  { %v261_v10 = vrot.slane %v260_v4, 4  ;;  %v208_v11 = vpop.permute.xlu1 %207  ;;  %v249_v30 = vrot.slane %v248_v9, 2 }
 0x2bc   :  { %v234_v17 = vmul.f32 %v208_v11, %v6035_v2 }
 0x2bd   :  { %v262_v31 = vadd.f32 %v261_v10, %v260_v4  ;;  %v250_v56 = vadd.f32 %v249_v30, %v248_v9  ;;  %v6056_v4 = vld [vmem:[%s6975_s0 + $0x38] sm:$0xff]  ;;  %v257_v30 = vadd.f32 %v256_v61, %v255_v41 }
 0x2be   :  { %v267_v28 = vsel %vm238_vm2, %v234_v17, 0.0 }
 0x2bf   :  { %v268_v36 = vrot.slane %v267_v28, 4  ;;  %v215_v37 = vpop.permute.xlu1 %214  ;;  %v263_v57 = vrot.slane %v262_v31, 2  ;;  %v251_v11 = vrot.slane %v250_v56, 1 }
 0x2c0   :  { %v235_v44 = vmul.f32 %v215_v37, %v6042_v23 }
 0x2c1   :  { %v269_v52 = vadd.f32 %v268_v36, %v267_v28  ;;  %v264_v15 = vadd.f32 %v263_v57, %v262_v31 }
 0x2c2   :  { %v274_v55 = vsel %vm238_vm2, %v235_v44, 0.0  ;;  %v244_v44 = vrot.slane %v243_v0, 1 }
 0x2c3   :  { %v275_v59 = vrot.slane %v274_v55, 4  ;;  %v222_v60 = vpop.permute.xlu1 %221  ;;  %v270_v62 = vrot.slane %v269_v52, 2 }
 0x2c4   :  { %v236_v63 = vmul.f32 %v222_v60, %v6049_v54  ;;  %v258_v54 = vrot.slane %v257_v30, 1  ;;  %v245_v31 = vadd.f32 %v244_v44, %v243_v0 }
 0x2c5   :  { %v276_v1 = vadd.f32 %v275_v59, %v274_v55  ;;  %v271_v36 = vadd.f32 %v270_v62, %v269_v52  ;;  %v252_v55 = vadd.f32 %v251_v11, %v250_v56  ;;  %v265_v59 = vrot.slane %v264_v15, 1 }
 0x2c6   :  { %v281_v10 = vsel %vm238_vm2, %v236_v63, 0.0 }
 0x2c7   :  { %v277_v17 = vrot.slane %v276_v1, 2  ;;  %v282_v9 = vrot.slane %v281_v10, 4  ;;  %v229_v28 = vpop.permute.xlu1 %228  ;;  %v272_v63 = vrot.slane %v271_v36, 1  ;;  %v308_v41 = vsel %vm307_vm3, %v252_v55, %v245_v31 }
 0x2c8   :  { %v237_v37 = vmul.f32 %v229_v28, %v6056_v4  ;;  %v266_v52 = vadd.f32 %v265_v59, %v264_v15 }
 0x2c9   :  { %v278_v60 = vadd.f32 %v277_v17, %v276_v1  ;;  %v283_v21 = vadd.f32 %v282_v9, %v281_v10  ;;  %v259_v1 = vadd.f32 %v258_v54, %v257_v30  ;;  %v273_v10 = vadd.f32 %v272_v63, %v271_v36 }
 0x2ca   :  { %v288_v48 = vsel %vm238_vm2, %v237_v37, 0.0  ;;  %v6079_v37 = vld [vmem:[%s6976_s7 + $0x1] ss:$0 sm:$0xff] }
 0x2cb   :  { %v284_v35 = vrot.slane %v283_v21, 2  ;;  %v289_v43 = vrot.slane %v288_v48, 4  ;;  %v279_v57 = vrot.slane %v278_v60, 1  ;;  %v310_v9 = vsel %vm309_vm4, %v259_v1, %v308_v41 }
 0x2cd   :  { %v285_v23 = vadd.f32 %v284_v35, %v283_v21  ;;  %v290_v2 = vadd.f32 %v289_v43, %v288_v48  ;;  %v280_v56 = vadd.f32 %v279_v57, %v278_v60  ;;  %v312_v35 = vsel %vm311_vm5, %v266_v52, %v310_v9 }
 0x2ce   :  { %v314_v43 = vsel %vm313_vm6, %v273_v10, %v312_v35  ;;  %v513_v35 = vld [vmem:[%s6977_s3 + $0x48] sm:$0xff] }
 0x2cf   :  { %v286_v61 = vrot.slane %v285_v23, 1  ;;  %v291_v62 = vrot.slane %v290_v2, 2  ;;  %v316_v28 = vsel %vm315_vm7, %v280_v56, %v314_v43  ;;  %v425_v56 = vld [vmem:[%s6973_s5] sm:$0xff]  ;;  %v515_v43 = vld [vmem:[%s6977_s3 + $0x58] sm:$0xff] }
 0x2d1   :  { %v292_v11 = vadd.f32 %v291_v62, %v290_v2  ;;  %v287_v17 = vadd.f32 %v286_v61, %v285_v23  ;;  %v7059_v2 = vmov 0.0   ;;  %v6074_v23 = vld [vmem:[%s6976_s7] ss:$0 sm:$0xff] }
 0x2d3   :  { %v293_v0 = vrot.slane %v292_v11, 1  ;;  %v318_v54 = vsel %vm317_vm8, %v287_v17, %v316_v28  ;;  %v427_v17 = vld [vmem:[%s6973_s5 + $0x10] sm:$0xff]  ;;  %v7060_v28 = vmov 0.0|0.0  }
 0x2d5   :  { %v294_v15 = vadd.f32 %v293_v0, %v292_v11  ;;  %v426_v11 = vld [vmem:[%s6973_s5 + $0x8] sm:$0xff]  ;;  %v428_v0 = vld [vmem:[%s6973_s5 + $0x18] sm:$0xff]  ;;  %s5724_s5 = smov 96  }
 0x2d6   :  { %v6097_v9 = vpack.c.bf16 %v426_v11, %v425_v56  ;;  %v504_v56 = vld [vmem:[%s6977_s3] sm:$0xff]  ;;  %v506_v11 = vld [vmem:[%s6977_s3 + $0x10] sm:$0xff] }
 0x2d7   :  { %v320_v30 = vsel %vm319_vm9, %v294_v15, %v318_v54  ;;  %v6109_v15 = vpack.c.bf16 %v428_v0, %v427_v17  ;;  %v6112_v54 = vpack.c.bf16 %v515_v43, %v513_v35  ;;  %v509_v17 = vld [vmem:[%s6977_s3 + $0x28] sm:$0xff]  ;;  %v511_v0 = vld [vmem:[%s6977_s3 + $0x38] sm:$0xff]  ;;  %v6169_v35 = vpack.c.bf16 %v506_v11, %v504_v56 }
 0x2d8   :  { %4875 = vmatmul.mubr.msk.f32.vlgmr.msra.gmra.mrb[0].mxu1 %vm238_vm2, %v320_v30  ;;  %v397_v36 = vpop.permute.xlu1 %396  ;;  %v6172_v43 = vpack.c.bf16 %v511_v0, %v509_v17 }
 0x2d9   :  { %4885 = vmatprep.mubr.msk.f32.mxu1 %vm5719_vm1, %v7059_v2  ;;  %v399_v44 = vmul.f32 %v6074_v23, %v397_v36  ;;  %5093 = vmatpush3.bf16.msra.mxu1 %v6097_v9 }
 0x2da   :  { %5094 = vmatprep.subr.bf16.mxu1 %v7060_v28 }
 0x2dd   :  { %5096 = vmatpush3.bf16.msra.mxu1 %v6109_v15 }
 0x2de   :  { %5098 = vmatprep.subr.bf16.mxu1 %v6112_v54 }
 0x3ab   :  { %v389_v60 = vpop.f32.mrb[0].mxu1 }
 0x3ac   :  { %v393_v21 = vadd.f32 %v6079_v37, %v389_v60  ;;  %v4876_v48 = vpop.f32.mrb[1].mxu1  ;;  %v512_v60 = vld [vmem:[%s6977_s3 + $0x40] sm:$0xff] }
 0x3ad   :  { %v517_v48 = vld [vmem:[%s6977_s3 + $0x68] sm:$0xff] }
 0x3ae   :  { %v400_v55 = vadd.f32 %v399_v44, %v393_v21  ;;  %v514_v21 = vld [vmem:[%s6977_s3 + $0x50] sm:$0xff] }
 0x3b0   :  { %5568 = vtanh.f32 %v400_v55  ;;  %v4462_v63 = vmul.f32 -1.442695, %v400_v55  ;;  %v519_v55 = vld [vmem:[%s6977_s3 + $0x78] sm:$0xff] }
 0x3b2   :  { %5570 = vpow2.f32 %v4462_v63  ;;  %v6134_v63 = vpack.c.bf16 %v519_v55, %v517_v48 }
 0x3ba   :  { %v5569_v59 = vpop.eup %5568 }
 0x3bb   :  { %410 = vrot.lane.b32.xlu0 %v5569_v59, %s5722_s13  ;;  %v6132_v59 = vpack.c.bf16 %v514_v21, %v512_v60 }
 0x3bc   :  { %v5571_v31 = vpop.eup %5570 }
 0x3bd   :  { %v404_v57 = vadd.f32 1.0, %v5571_v31  ;;  %v516_v31 = vld [vmem:[%s6977_s3 + $0x60] sm:$0xff] }
 0x3bf   :  { %5572 = vrcp.f32 %v404_v57  ;;  %v518_v57 = vld [vmem:[%s6977_s3 + $0x70] sm:$0xff] }
 0x3c9   :  { %v5573_v41 = vpop.eup %5572 }
 0x3ca   :  { %v408_v62 = vmul.f32 0.0, %v5573_v41 }
 0x42d   :  { %v411_v52 = vpop.permute.xlu0 %410 }
 0x42e   :  { %v413_v61 = vmul.f32 %v5573_v41, %v411_v52  ;;  %v505_v52 = vld [vmem:[%s6977_s3 + $0x8] sm:$0xff] }
 0x430   :  { %415 = vrot.lane.b32.xlu1 %v413_v61, %s5723_s14  ;;  %v507_v61 = vld [vmem:[%s6977_s3 + $0x18] sm:$0xff] }
 0x4a2   :  { %v416_v1 = vpop.permute.xlu1 %415 }
 0x4a3   :  { %v6085_v10 = vadd.f32 %v416_v1, %v408_v62  ;;  %v6150_v62 = vpack.c.bf16 %v518_v57, %v516_v31  ;;  %v6154_v1 = vpack.c.bf16 %v507_v61, %v505_v52 }
 0x4a5   :  { %5574 = vtanh.f32 %v6085_v10 }
 0x4af   :  { %v5575_v30 = vpop.eup %5574 }
 0x4b0   :  { %421 = vrot.lane.b32.xlu0 %v5575_v30, %s5722_s13  ;;  %v508_v30 = vld [vmem:[%s6977_s3 + $0x20] sm:$0xff] }
 0x4b4   :  { %521 = vrot.lane.b32.xlu0 %v6085_v10, %s5724_s5 }
 0x522   :  { %v422_v36 = vpop.permute.xlu0 %421 }
 0x523   :  { %v424_v44 = vmul.f32 %v5573_v41, %v422_v36  ;;  %v510_v36 = vld [vmem:[%s6977_s3 + $0x30] sm:$0xff] }
 0x524   :  { %v6182_v60 = vpack.c.bf16 %v510_v36, %v508_v30 }
 0x525   :  { %430 = vrot.lane.b32.xlu1 %v424_v44, %s5723_s14 }
 0x526   :  { %v522_v44 = vpop.permute.xlu0 %521 }
 0x597   :  { %v431_v41 = vpop.permute.xlu1 %430 }
 0x598   :  { %4886 = vmatmul.mubr.msk.f32.vlgmr.msra.gmra.mrb[2].mxu1 %vm238_vm2, %v431_v41 }
 0x599   :  { %5100 = vmatpush1.bf16.msra.mxu1 %v6132_v59  ;;  %589 = vmatprep.mubr.f32.mxu1 %v7059_v2 }
 0x59a   :  { %5102 = vmatprep.subr.bf16.mxu1 %v6134_v63 }
 0x59d   :  { %5104 = vmatpush1.bf16.msra.mxu1 %v6150_v62 }
 0x59e   :  { %5106 = vmatprep.subr.bf16.mxu1 %v6154_v1 }
 0x5a0   :  { %4464 = vmatmul.mubr.msk.f32.vlgmr.msra.gmra.mrb[4].mxu1 %vm238_vm2, %v522_v44 }
 0x5a1   :  { %5108 = vmatpush1.bf16.msra.mxu1 %v6169_v35  ;;  %660 = vmatprep.mubr.f32.mxu1 %v7059_v2 }
 0x5a2   :  { %5110 = vmatprep.subr.bf16.mxu1 %v6172_v43 }
 0x5a5   :  { %5112 = vmatpush1.bf16.msra.mxu1 %v6182_v60 }
 0x5a6   :  { %5145 = vmatprep.subr.bf16.mxu1 %v7060_v28 }
 0x5a8   :  { %4465 = vmatmul.mubr.msk.f32.vlgmr.msra.gmra.mrb[4].mxu1 %vm238_vm2, %v431_v41 }
 0x5a9   :  { %5147 = vmatpush3.bf16.msra.mxu1 %v5981_v34  ;;  %4896 = vmatprep.mubr.msk.f32.mxu1 %vm5719_vm1, %v7059_v2 }
 0x5aa   :  { %5148 = vmatprep.subr.bf16.mxu1 %v7060_v28 }
 0x5ad   :  { %5150 = vmatpush3.bf16.msra.mxu1 %v5993_v42 }
 0x5ae   :  { %5151 = vmatprep.subr.bf16.mxu1 %v7060_v28 }
 0x66b   :  { %v6195_v21 = vpop.f32.mrb[2].mxu1 }
 0x66c   :  { %v4887_v48 = vpop.f32.mrb[3].mxu1 }
 0x67b   :  { %v662_v55 = vpop.f32.mrb[4].mxu1 }
 0x67c   :  { %v667_v31 = vadd.f32 %v662_v55, %v5895_v38  ;;  %v664_v57 = vpop.f32.mrb[5].mxu1 }
 0x67d   :  { %v668_v41 = vadd.f32 %v664_v57, %v5853_v25 }
 0x67f   :  { %5576 = vtanh.f32 %v668_v41 }
 0x680   :  { %5578 = vtanh.f32 %v667_v31 }
 0x689   :  { %v5577_v52 = vpop.eup %5576 }
 0x68a   :  { %v5579_v61 = vpop.eup %5578  ;;  %735 = vmatprep.mubr.f32.mxu0 %v5577_v52 }
 0x68b   :  { %736 = vmatmul.mubr.f32.vlgmr.msra.gmra.mrb[2].mxu0 %v5579_v61 }
 0x68c   :  { %5176 = vmatpush3.bf16.msra.mxu0 %v5797_v7 }
 0x68d   :  { %5178 = vmatprep.subr.bf16.mxu0 %v5799_v8 }
 0x690   :  { %5180 = vmatpush3.bf16.msra.mxu0 %v5815_v13 }
 0x691   :  { %5182 = vmatprep.subr.bf16.mxu0 %v5818_v14 }
 0x694   :  { %5184 = vmatpush3.bf16.msra.mxu0 %v5833_v19 }
 0x695   :  { %5186 = vmatprep.subr.bf16.mxu0 %v5836_v20 }
 0x698   :  { %5188 = vmatpush3.bf16.msra.mxu0 %v5856_v26 }
 0x699   :  { %5190 = vmatprep.subr.bf16.mxu0 %v5860_v27 }
 0x69c   :  { %5192 = vmatpush3.bf16.msra.mxu0 %v5875_v32 }
 0x69d   :  { %5194 = vmatprep.subr.bf16.mxu0 %v5878_v33 }
 0x6a0   :  { %5196 = vmatpush3.bf16.msra.mxu0 %v5898_v39 }
 0x6a1   :  { %5198 = vmatprep.subr.bf16.mxu0 %v5901_v40 }
 0x6a4   :  { %5200 = vmatpush3.bf16.msra.mxu0 %v5917_v46 }
 0x6a5   :  { %5202 = vmatprep.subr.bf16.mxu0 %v5920_v47 }
 0x6a8   :  { %5204 = vmatpush3.bf16.msra.mxu0 %v5929_v50 }
 0x6a9   :  { %5234 = vmatprep.subr.bf16.mxu0 %v5786_v3  ;;  %v7063_v3 = vld [vmem:[#allocation21_spill] sm:$0xff] }
 0x75e   :  { %v4578_v25 = vpop.f32.mrb[2].mxu0 }
 0x75f   :  { %v4579_v56 = vpop.f32.mrb[3].mxu0 }
 0x760   :  { %v4580_v11 = vadd.f32 %v4579_v56, %v4578_v25 }
 0x762   :  { %v741_v17 = vsel %vm159_vm0, %v4580_v11, -inf }
 0x763   :  { %742 = vmax.xlane.f32.xlu1 %v741_v17 }
 0x7f0   :  { %v743_v0 = vpop.xlane.xlu1 %742 }
 0x7f1   :  { %v744_v30 = vsub.f32 %v4580_v11, %v743_v0 }
 0x7f3   :  { %v745_v36 = vmul.f32 1.442695, %v744_v30 }
 0x7f5   :  { %5580 = vpow2.f32 %v745_v36 }
 0x7ff   :  { %v5581_v44 = vpop.eup %5580 }
 0x800   :  { %v747_v48 = vsel %vm159_vm0, %v5581_v44, 0.0 }
 0x801   :  { %748 = vadd.xlane.f32.xlu0 %v747_v48  ;;  %v5725_v48 = vmov 1  }
 0x802   :  { %5552 = vset.pattern.permute.xlu1 %v5725_v48 }
 0x88e   :  { %v749_v55 = vpop.xlane.xlu0 %748 }
 0x88f   :  { %5582 = vrcp.f32 %v749_v55 }
 0x899   :  { %v5583_v31 = vpop.eup %5582 }
 0x89a   :  { %v751_v57 = vmul.f32 %v5583_v31, %v749_v55 }
 0x89c   :  { %v752_v41 = vsub.f32 2.0, %v751_v57 }
 0x89e   :  { %v753_v52 = vmul.f32 %v5583_v31, %v752_v41 }
 0x8a0   :  { %v754_v61 = vmul.f32 %v5581_v44, %v753_v52 }
 0x8a2   :  { %v765_v25 = vrot.slane %v754_v61, %v5958_v12  ;;  %v758_v56 = vrot.slane %v754_v61, %v5954_v6  ;;  %v772_v11 = vrot.slane %v754_v61, %v5952_v5  ;;  %v779_v17 = vrot.slane %v754_v61, %v5961_v16 }
 0x8a3   :  { %v786_v0 = vrot.slane %v754_v61, %v5964_v18  ;;  %v793_v30 = vrot.slane %v754_v61, %v5967_v22  ;;  %v800_v36 = vrot.slane %v754_v61, %v5970_v24  ;;  %v807_v44 = vrot.slane %v754_v61, %v5973_v29  ;;  %v7061_v29 = vld [vmem:[#allocation19_spill] sm:$0xff]  ;;  %v7062_v22 = vld [vmem:[#allocation20_spill] sm:$0xff] }
 0x8a4   :  { %767 = vbcast.lane.b32.xlu1 %v765_v25, 256  ;;  %760 = vbcast.lane.b32.xlu0 %v758_v56, 256 }
 0x8a8   :  { %774 = vbcast.lane.b32.xlu1 %v772_v11, 256  ;;  %781 = vbcast.lane.b32.xlu0 %v779_v17, 256 }
 0x8ac   :  { %788 = vbcast.lane.b32.xlu1 %v786_v0, 256  ;;  %795 = vbcast.lane.b32.xlu0 %v793_v30, 256 }
 0x8b0   :  { %802 = vbcast.lane.b32.xlu1 %v800_v36, 256  ;;  %809 = vbcast.lane.b32.xlu0 %v807_v44, 256 }
 0x8b4   :  { %964 = vperm.xlu1 %5552, %v6002_v45  }
 0x916   :  { %v768_v55 = vpop.permute.xlu1 %767  ;;  %v761_v31 = vpop.permute.xlu0 %760 }
 0x917   :  { %v812_v57 = vmul.f32 %v768_v55, %v6013_v51  ;;  %v811_v41 = vmul.f32 %v761_v31, %v6008_v49 }
 0x919   :  { %v826_v52 = vsel %vm238_vm2, %v812_v57, 0.0  ;;  %v819_v25 = vsel %vm238_vm2, %v811_v41, 0.0 }
 0x91a   :  { %v827_v56 = vrot.slane %v826_v52, 4  ;;  %v820_v11 = vrot.slane %v819_v25, 4  ;;  %v775_v17 = vpop.permute.xlu1 %774  ;;  %v782_v61 = vpop.permute.xlu0 %781 }
 0x91b   :  { %v813_v0 = vmul.f32 %v775_v17, %v6018_v53  ;;  %v814_v30 = vmul.f32 %v782_v61, %v6026_v58 }
 0x91c   :  { %v828_v36 = vadd.f32 %v827_v56, %v826_v52  ;;  %v821_v44 = vadd.f32 %v820_v11, %v819_v25 }
 0x91d   :  { %v833_v48 = vsel %vm238_vm2, %v813_v0, 0.0  ;;  %v840_v55 = vsel %vm238_vm2, %v814_v30, 0.0 }
 0x91e   :  { %v829_v51 = vrot.slane %v828_v36, 2  ;;  %v822_v31 = vrot.slane %v821_v44, 2  ;;  %v834_v49 = vrot.slane %v833_v48, 4  ;;  %v841_v57 = vrot.slane %v840_v55, 4  ;;  %v789_v45 = vpop.permute.xlu1 %788  ;;  %v796_v41 = vpop.permute.xlu0 %795 }
 0x91f   :  { %v815_v24 = vmul.f32 %v789_v45, %v7061_v29  ;;  %v816_v18 = vmul.f32 %v796_v41, %v7062_v22 }
 0x920   :  { %v830_v16 = vadd.f32 %v829_v51, %v828_v36  ;;  %v823_v17 = vadd.f32 %v822_v31, %v821_v44  ;;  %v835_v53 = vadd.f32 %v834_v49, %v833_v48  ;;  %v842_v61 = vadd.f32 %v841_v57, %v840_v55 }
 0x921   :  { %v847_v52 = vsel %vm238_vm2, %v815_v24, 0.0  ;;  %v854_v25 = vsel %vm238_vm2, %v816_v18, 0.0 }
 0x922   :  { %v831_v56 = vrot.slane %v830_v16, 1  ;;  %v824_v11 = vrot.slane %v823_v17, 1  ;;  %v836_v0 = vrot.slane %v835_v53, 2  ;;  %v843_v30 = vrot.slane %v842_v61, 2  ;;  %v803_v58 = vpop.permute.xlu1 %802  ;;  %v810_v5 = vpop.permute.xlu0 %809 }
 0x923   :  { %v848_v6 = vrot.slane %v847_v52, 4  ;;  %v855_v12 = vrot.slane %v854_v25, 4  ;;  %v817_v45 = vmul.f32 %v803_v58, %v7063_v3  ;;  %v818_v41 = vmul.f32 %v810_v5, %v6056_v4 }
 0x924   :  { %v832_v51 = vadd.f32 %v831_v56, %v830_v16  ;;  %v837_v36 = vadd.f32 %v836_v0, %v835_v53  ;;  %v844_v49 = vadd.f32 %v843_v30, %v842_v61  ;;  %v825_v55 = vadd.f32 %v824_v11, %v823_v17 }
 0x925   :  { %v849_v44 = vadd.f32 %v848_v6, %v847_v52  ;;  %v856_v48 = vadd.f32 %v855_v12, %v854_v25  ;;  %v861_v24 = vsel %vm238_vm2, %v817_v45, 0.0  ;;  %v868_v18 = vsel %vm238_vm2, %v818_v41, 0.0 }
 0x926   :  { %v838_v31 = vrot.slane %v837_v36, 1  ;;  %v845_v57 = vrot.slane %v844_v49, 1  ;;  %v862_v22 = vrot.slane %v861_v24, 4  ;;  %v869_v47 = vrot.slane %v868_v18, 4 }
 0x927   :  { %v850_v29 = vrot.slane %v849_v44, 2  ;;  %v857_v50 = vrot.slane %v856_v48, 2  ;;  %v883_v53 = vsel %vm307_vm3, %v832_v51, %v825_v55 }
 0x928   :  { %v839_v46 = vadd.f32 %v838_v31, %v837_v36  ;;  %v863_v58 = vadd.f32 %v862_v22, %v861_v24  ;;  %v870_v16 = vadd.f32 %v869_v47, %v868_v18  ;;  %v846_v6 = vadd.f32 %v845_v57, %v844_v49 }
 0x929   :  { %v851_v3 = vadd.f32 %v850_v29, %v849_v44  ;;  %v858_v5 = vadd.f32 %v857_v50, %v856_v48  ;;  %v501_v49 = vadd.f32 %v6079_v37, %v6195_v21 }
 0x92a   :  { %v864_v12 = vrot.slane %v863_v58, 2  ;;  %v884_v61 = vsel %vm309_vm4, %v839_v46, %v883_v53  ;;  %v871_v17 = vrot.slane %v870_v16, 2 }
 0x92b   :  { %v852_v52 = vrot.slane %v851_v3, 1  ;;  %v859_v25 = vrot.slane %v858_v5, 1  ;;  %v885_v45 = vsel %vm311_vm5, %v846_v6, %v884_v61 }
 0x92c   :  { %v865_v56 = vadd.f32 %v864_v12, %v863_v58  ;;  %v872_v30 = vadd.f32 %v871_v17, %v870_v16 }
 0x92d   :  { %v853_v11 = vadd.f32 %v852_v52, %v851_v3  ;;  %v860_v0 = vadd.f32 %v859_v25, %v858_v5 }
 0x92e   :  { %v866_v41 = vrot.slane %v865_v56, 1  ;;  %v873_v22 = vrot.slane %v872_v30, 1 }
 0x92f   :  { %v886_v50 = vsel %vm313_vm6, %v853_v11, %v885_v45 }
 0x930   :  { %v867_v47 = vadd.f32 %v866_v41, %v865_v56  ;;  %v874_v29 = vadd.f32 %v873_v22, %v872_v30  ;;  %v887_v51 = vsel %vm315_vm7, %v860_v0, %v886_v50  ;;  %v6294_v22 = vld [vmem:[%s6972_s1 + $0x8] sm:$0xff] }
 0x932   :  { %v888_v36 = vsel %vm317_vm8, %v867_v47, %v887_v51  ;;  %v7065_v51 = vld [vmem:[#allocation4_spill] sm:$0xff] }
 0x933   :  { %v889_v46 = vsel %vm319_vm9, %v874_v29, %v888_v36  ;;  %v965_v3 = vpop.permute.xlu1 %964  ;;  %v7066_v36 = vld [vmem:[#allocation5_spill] sm:$0xff] }
 0x934   :  { %4897 = vmatmul.mubr.msk.f32.vlgmr.msra.gmra.mrb[6].mxu1 %vm238_vm2, %v889_v46  ;;  %v967_v44 = vmul.f32 %v6074_v23, %v965_v3  ;;  %v7067_v46 = vld [vmem:[#allocation2_spill] sm:$0xff] }
 0x935   :  { %5153 = vmatpush3.bf16.msra.mxu1 %v6097_v9  ;;  %4907 = vmatprep.mubr.msk.f32.mxu1 %vm5719_vm1, %v7059_v2 }
 0x936   :  { %5154 = vmatprep.subr.bf16.mxu1 %v7060_v28 }
 0x939   :  { %5156 = vmatpush3.bf16.msra.mxu1 %v6109_v15 }
 0x93a   :  { %5158 = vmatprep.subr.bf16.mxu1 %v6112_v54 }
 0xa07   :  { %v958_v48 = vpop.f32.mrb[6].mxu1 }
 0xa08   :  { %v962_v24 = vadd.f32 %v958_v48, %v501_v49  ;;  %v4898_v18 = vpop.f32.mrb[7].mxu1 }
 0xa0a   :  { %v968_v55 = vadd.f32 %v967_v44, %v962_v24 }
 0xa0c   :  { %5584 = vtanh.f32 %v968_v55  ;;  %v4467_v57 = vmul.f32 -1.442695, %v968_v55 }
 0xa0e   :  { %5586 = vpow2.f32 %v4467_v57 }
 0xa16   :  { %v5585_v31 = vpop.eup %5584 }
 0xa17   :  { %978 = vrot.lane.b32.xlu0 %v5585_v31, %s5722_s13 }
 0xa18   :  { %v5587_v58 = vpop.eup %5586 }
 0xa19   :  { %v972_v5 = vadd.f32 1.0, %v5587_v58 }
 0xa1b   :  { %5588 = vrcp.f32 %v972_v5 }
 0xa25   :  { %v5589_v16 = vpop.eup %5588 }
 0xa26   :  { %v976_v21 = vmul.f32 %v5589_v16, %v6085_v10 }
 0xa89   :  { %v979_v53 = vpop.permute.xlu0 %978 }
 0xa8a   :  { %v981_v6 = vmul.f32 %v5589_v16, %v979_v53 }
 0xa8c   :  { %983 = vrot.lane.b32.xlu1 %v981_v6, %s5723_s14 }
 0xafe   :  { %v984_v12 = vpop.permute.xlu1 %983 }
 0xaff   :  { %v6262_v61 = vadd.f32 %v984_v12, %v976_v21  ;;  %v7068_v12 = vld [vmem:[#allocation8_spill] sm:$0xff] }
 0xb01   :  { %5590 = vtanh.f32 %v6262_v61 }
 0xb0b   :  { %v5591_v52 = vpop.eup %5590 }
 0xb0c   :  { %989 = vrot.lane.b32.xlu0 %v5591_v52, %s5722_s13 }
 0xb10   :  { %1069 = vrot.lane.b32.xlu0 %v6262_v61, %s5724_s5 }
 0xb7e   :  { %v990_v25 = vpop.permute.xlu0 %989 }
 0xb7f   :  { %v992_v17 = vmul.f32 %v5589_v16, %v990_v25  ;;  %v7069_v25 = vld [vmem:[#allocation7_spill] sm:$0xff] }
 0xb81   :  { %994 = vrot.lane.b32.xlu1 %v992_v17, %s5723_s14 }
 0xb82   :  { %v1070_v10 = vpop.permute.xlu0 %1069 }
 0xbf3   :  { %v995_v56 = vpop.permute.xlu1 %994 }
 0xbf4   :  { %4908 = vmatmul.mubr.msk.f32.vlgmr.msra.gmra.mrb[8].mxu1 %vm238_vm2, %v995_v56 }
 0xbf5   :  { %5160 = vmatpush1.bf16.msra.mxu1 %v6132_v59  ;;  %1137 = vmatprep.mubr.f32.mxu1 %v7059_v2 }
 0xbf6   :  { %5162 = vmatprep.subr.bf16.mxu1 %v6134_v63 }
 0xbf9   :  { %5164 = vmatpush1.bf16.msra.mxu1 %v6150_v62 }
 0xbfa   :  { %5166 = vmatprep.subr.bf16.mxu1 %v6154_v1 }
 0xbfc   :  { %4469 = vmatmul.mubr.msk.f32.vlgmr.msra.gmra.mrb[10].mxu1 %vm238_vm2, %v1070_v10 }
 0xbfd   :  { %5168 = vmatpush1.bf16.msra.mxu1 %v6169_v35  ;;  %1208 = vmatprep.mubr.f32.mxu1 %v7059_v2 }
 0xbfe   :  { %5170 = vmatprep.subr.bf16.mxu1 %v6172_v43 }
 0xc01   :  { %5172 = vmatpush1.bf16.msra.mxu1 %v6182_v60 }
 0xc02   :  { %5205 = vmatprep.subr.bf16.mxu1 %v7060_v28 }
 0xc04   :  { %4470 = vmatmul.mubr.msk.f32.vlgmr.msra.gmra.mrb[10].mxu1 %vm238_vm2, %v995_v56  ;;  %v7070_v56 = vld [vmem:[#allocation6_spill] sm:$0xff] }
 0xc05   :  { %5207 = vmatpush3.bf16.msra.mxu1 %v5981_v34  ;;  %4918 = vmatprep.mubr.msk.f32.mxu1 %vm5719_vm1, %v7059_v2 }
 0xc06   :  { %5208 = vmatprep.subr.bf16.mxu1 %v7060_v28 }
 0xc09   :  { %5210 = vmatpush3.bf16.msra.mxu1 %v5993_v42 }
 0xc0a   :  { %5211 = vmatprep.subr.bf16.mxu1 %v7060_v28 }
 0xcc7   :  { %v6288_v11 = vpop.f32.mrb[8].mxu1 }
 0xcc8   :  { %v4909_v0 = vpop.f32.mrb[9].mxu1 }
 0xcc9   :  { %v7071_v0 = vld [vmem:[#allocation9_spill] sm:$0xff] }
 0xcd7   :  { %v1210_v30 = vpop.f32.mrb[10].mxu1 }
 0xcd8   :  { %v1215_v45 = vadd.f32 %v1210_v30, %v5895_v38  ;;  %v1212_v41 = vpop.f32.mrb[11].mxu1  ;;  %v7064_v38 = vld [vmem:[#allocation3_spill] sm:$0xff] }
 0xcd9   :  { %v1216_v50 = vadd.f32 %v6294_v22, %v1212_v41 }
 0xcdb   :  { %5592 = vtanh.f32 %v1216_v50  ;;  %v7073_v50 = vld [vmem:[#allocation11_spill] sm:$0xff] }
 0xcdc   :  { %5594 = vtanh.f32 %v1215_v45  ;;  %v7072_v45 = vld [vmem:[#allocation10_spill] sm:$0xff] }
 0xce5   :  { %v5593_v47 = vpop.eup %5592 }
 0xce6   :  { %v5595_v29 = vpop.eup %5594  ;;  %1283 = vmatprep.mubr.f32.mxu0 %v5593_v47 }
 0xce7   :  { %1284 = vmatmul.mubr.f32.vlgmr.msra.gmra.mrb[4].mxu0 %v5595_v29  ;;  %v7074_v29 = vld [vmem:[#allocation12_spill] sm:$0xff] }
 0xce8   :  { %5236 = vmatpush3.bf16.msra.mxu0 %v5797_v7 }
 0xce9   :  { %5238 = vmatprep.subr.bf16.mxu0 %v5799_v8 }
 0xcec   :  { %5240 = vmatpush3.bf16.msra.mxu0 %v5815_v13 }
 0xced   :  { %5242 = vmatprep.subr.bf16.mxu0 %v5818_v14 }
 0xcf0   :  { %5244 = vmatpush3.bf16.msra.mxu0 %v5833_v19 }
 0xcf1   :  { %5246 = vmatprep.subr.bf16.mxu0 %v5836_v20 }
 0xcf4   :  { %5248 = vmatpush3.bf16.msra.mxu0 %v5856_v26 }
 0xcf5   :  { %5250 = vmatprep.subr.bf16.mxu0 %v5860_v27 }
 0xcf8   :  { %5252 = vmatpush3.bf16.msra.mxu0 %v5875_v32 }
 0xcf9   :  { %5254 = vmatprep.subr.bf16.mxu0 %v5878_v33 }
 0xcfc   :  { %5256 = vmatpush3.bf16.msra.mxu0 %v5898_v39 }
 0xcfd   :  { %5258 = vmatprep.subr.bf16.mxu0 %v5901_v40 }
 0xd00   :  { %5260 = vmatpush3.bf16.msra.mxu0 %v7064_v38 }
 0xd01   :  { %5262 = vmatprep.subr.bf16.mxu0 %v7065_v51 }
 0xd04   :  { %5264 = vmatpush3.bf16.msra.mxu0 %v7066_v36 }
 0xd05   :  { %5294 = vmatprep.subr.bf16.mxu0 %v7067_v46  ;;  %v7083_v46 = vld [vmem:[#allocation21_spill] sm:$0xff] }
 0xdba   :  { %v4623_v3 = vpop.f32.mrb[4].mxu0 }
 0xdbb   :  { %v4624_v49 = vpop.f32.mrb[5].mxu0 }
 0xdbc   :  { %v4625_v44 = vadd.f32 %v4624_v49, %v4623_v3  ;;  %v7075_v49 = vld [vmem:[#allocation13_spill] sm:$0xff] }
 0xdbe   :  { %v1289_v48 = vsel %vm159_vm0, %v4625_v44, -inf }
 0xdbf   :  { %1290 = vmax.xlane.f32.xlu1 %v1289_v48  ;;  %v5726_v48 = vmov 2  }
 0xdc0   :  { %5553 = vset.pattern.permute.xlu1 %v5726_v48 }
 0xe4c   :  { %v1291_v24 = vpop.xlane.xlu1 %1290 }
 0xe4d   :  { %v1292_v18 = vsub.f32 %v4625_v44, %v1291_v24  ;;  %v7076_v24 = vld [vmem:[#allocation14_spill] sm:$0xff] }
 0xe4f   :  { %v1293_v55 = vmul.f32 1.442695, %v1292_v18 }
 0xe51   :  { %5596 = vpow2.f32 %v1293_v55 }
 0xe5b   :  { %v5597_v31 = vpop.eup %5596 }
 0xe5c   :  { %v1295_v57 = vsel %vm159_vm0, %v5597_v31, 0.0 }
 0xe5d   :  { %1296 = vadd.xlane.f32.xlu0 %v1295_v57 }
 0xeea   :  { %v1297_v58 = vpop.xlane.xlu0 %1296 }
 0xeeb   :  { %5598 = vrcp.f32 %v1297_v58 }
 0xef5   :  { %v5599_v5 = vpop.eup %5598 }
 0xef6   :  { %v1299_v16 = vmul.f32 %v5599_v5, %v1297_v58  ;;  %v7078_v58 = vld [vmem:[#allocation15_spill] sm:$0xff] }
 0xef8   :  { %v1300_v53 = vsub.f32 2.0, %v1299_v16 }
 0xefa   :  { %v1301_v6 = vmul.f32 %v5599_v5, %v1300_v53 }
 0xefc   :  { %v1302_v21 = vmul.f32 %v5597_v31, %v1301_v6  ;;  %v7077_v31 = vld [vmem:[#allocation16_spill] sm:$0xff] }
 0xefe   :  { %v1313_v52 = vrot.slane %v1302_v21, %v7068_v12  ;;  %v1306_v17 = vrot.slane %v1302_v21, %v7069_v25  ;;  %v1320_v10 = vrot.slane %v1302_v21, %v7070_v56  ;;  %v1327_v30 = vrot.slane %v1302_v21, %v7071_v0 }
 0xeff   :  { %v1334_v41 = vrot.slane %v1302_v21, %v7072_v45  ;;  %v1341_v47 = vrot.slane %v1302_v21, %v7073_v50  ;;  %v1348_v3 = vrot.slane %v1302_v21, %v7074_v29  ;;  %v1355_v44 = vrot.slane %v1302_v21, %v7075_v49  ;;  %v7081_v49 = vld [vmem:[#allocation19_spill] sm:$0xff]  ;;  %v7082_v50 = vld [vmem:[#allocation20_spill] sm:$0xff] }
 0xf00   :  { %1315 = vbcast.lane.b32.xlu1 %v1313_v52, 256  ;;  %1308 = vbcast.lane.b32.xlu0 %v1306_v17, 256 }
 0xf04   :  { %1322 = vbcast.lane.b32.xlu1 %v1320_v10, 256  ;;  %1329 = vbcast.lane.b32.xlu0 %v1327_v30, 256  ;;  %v7079_v10 = vld [vmem:[#allocation17_spill] sm:$0xff] }
 0xf08   :  { %1336 = vbcast.lane.b32.xlu1 %v1334_v41, 256  ;;  %1343 = vbcast.lane.b32.xlu0 %v1341_v47, 256  ;;  %v7080_v41 = vld [vmem:[#allocation18_spill] sm:$0xff] }
 0xf0c   :  { %1350 = vbcast.lane.b32.xlu1 %v1348_v3, 256  ;;  %1357 = vbcast.lane.b32.xlu0 %v1355_v44, 256 }
 0xf10   :  { %1512 = vperm.xlu1 %5553, %v7076_v24  }
 0xf72   :  { %v1316_v18 = vpop.permute.xlu1 %1315  ;;  %v1309_v55 = vpop.permute.xlu0 %1308 }
 0xf73   :  { %v1360_v57 = vmul.f32 %v1316_v18, %v7077_v31  ;;  %v1359_v5 = vmul.f32 %v1309_v55, %v7078_v58 }
 0xf75   :  { %v1374_v16 = vsel %vm238_vm2, %v1360_v57, 0.0  ;;  %v1367_v53 = vsel %vm238_vm2, %v1359_v5, 0.0 }
 0xf76   :  { %v1375_v6 = vrot.slane %v1374_v16, 4  ;;  %v1368_v52 = vrot.slane %v1367_v53, 4  ;;  %v1323_v17 = vpop.permute.xlu1 %1322  ;;  %v1330_v21 = vpop.permute.xlu0 %1329 }
 0xf77   :  { %v1361_v30 = vmul.f32 %v1323_v17, %v7079_v10  ;;  %v1362_v47 = vmul.f32 %v1330_v21, %v7080_v41 }
 0xf78   :  { %v1376_v3 = vadd.f32 %v1375_v6, %v1374_v16  ;;  %v1369_v44 = vadd.f32 %v1368_v52, %v1367_v53 }
 0xf79   :  { %v1381_v48 = vsel %vm238_vm2, %v1361_v30, 0.0  ;;  %v1388_v24 = vsel %vm238_vm2, %v1362_v47, 0.0 }
 0xf7a   :  { %v1377_v18 = vrot.slane %v1376_v3, 2  ;;  %v1370_v55 = vrot.slane %v1369_v44, 2  ;;  %v1382_v31 = vrot.slane %v1381_v48, 4  ;;  %v1389_v57 = vrot.slane %v1388_v24, 4  ;;  %v1337_v58 = vpop.permute.xlu1 %1336  ;;  %v1344_v5 = vpop.permute.xlu0 %1343 }
 0xf7b   :  { %v1363_v29 = vmul.f32 %v1337_v58, %v7081_v49  ;;  %v1364_v45 = vmul.f32 %v1344_v5, %v7082_v50 }
 0xf7c   :  { %v1378_v0 = vadd.f32 %v1377_v18, %v1376_v3  ;;  %v1371_v17 = vadd.f32 %v1370_v55, %v1369_v44  ;;  %v1383_v10 = vadd.f32 %v1382_v31, %v1381_v48  ;;  %v1390_v21 = vadd.f32 %v1389_v57, %v1388_v24 }
 0xf7d   :  { %v1395_v16 = vsel %vm238_vm2, %v1363_v29, 0.0  ;;  %v1402_v53 = vsel %vm238_vm2, %v1364_v45, 0.0 }
 0xf7e   :  { %v1379_v6 = vrot.slane %v1378_v0, 1  ;;  %v1372_v52 = vrot.slane %v1371_v17, 1  ;;  %v1384_v30 = vrot.slane %v1383_v10, 2  ;;  %v1391_v41 = vrot.slane %v1390_v21, 2  ;;  %v1351_v47 = vpop.permute.xlu1 %1350  ;;  %v1358_v56 = vpop.permute.xlu0 %1357 }
 0xf7f   :  { %v1396_v25 = vrot.slane %v1395_v16, 4  ;;  %v1403_v12 = vrot.slane %v1402_v53, 4  ;;  %v1365_v49 = vmul.f32 %v1351_v47, %v7083_v46  ;;  %v1366_v50 = vmul.f32 %v1358_v56, %v6056_v4 }
 0xf80   :  { %v1380_v3 = vadd.f32 %v1379_v6, %v1378_v0  ;;  %v1385_v44 = vadd.f32 %v1384_v30, %v1383_v10  ;;  %v1392_v48 = vadd.f32 %v1391_v41, %v1390_v21  ;;  %v1373_v55 = vadd.f32 %v1372_v52, %v1371_v17 }
 0xf81   :  { %v1397_v24 = vadd.f32 %v1396_v25, %v1395_v16  ;;  %v1404_v18 = vadd.f32 %v1403_v12, %v1402_v53  ;;  %v1409_v29 = vsel %vm238_vm2, %v1365_v49, 0.0  ;;  %v1416_v45 = vsel %vm238_vm2, %v1366_v50, 0.0 }
 0xf82   :  { %v1386_v31 = vrot.slane %v1385_v44, 1  ;;  %v1393_v57 = vrot.slane %v1392_v48, 1  ;;  %v1410_v58 = vrot.slane %v1409_v29, 4  ;;  %v1417_v51 = vrot.slane %v1416_v45, 4 }
 0xf83   :  { %v1398_v5 = vrot.slane %v1397_v24, 2  ;;  %v1405_v36 = vrot.slane %v1404_v18, 2  ;;  %v1431_v0 = vsel %vm307_vm3, %v1380_v3, %v1373_v55 }
 0xf84   :  { %v1387_v38 = vadd.f32 %v1386_v31, %v1385_v44  ;;  %v1411_v46 = vadd.f32 %v1410_v58, %v1409_v29  ;;  %v1418_v56 = vadd.f32 %v1417_v51, %v1416_v45  ;;  %v1394_v25 = vadd.f32 %v1393_v57, %v1392_v48 }
 0xf85   :  { %v1399_v47 = vadd.f32 %v1398_v5, %v1397_v24  ;;  %v1406_v4 = vadd.f32 %v1405_v36, %v1404_v18  ;;  %v1065_v18 = vadd.f32 %v6079_v37, %v6288_v11 }
 0xf86   :  { %v1412_v12 = vrot.slane %v1411_v46, 2  ;;  %v1432_v10 = vsel %vm309_vm4, %v1387_v38, %v1431_v0  ;;  %v1419_v17 = vrot.slane %v1418_v56, 2 }
 0xf87   :  { %v1400_v21 = vrot.slane %v1399_v47, 1  ;;  %v1407_v16 = vrot.slane %v1406_v4, 1  ;;  %v1433_v41 = vsel %vm311_vm5, %v1394_v25, %v1432_v10 }
 0xf88   :  { %v1413_v53 = vadd.f32 %v1412_v12, %v1411_v46  ;;  %v1420_v30 = vadd.f32 %v1419_v17, %v1418_v56 }
 0xf89   :  { %v1401_v6 = vadd.f32 %v1400_v21, %v1399_v47  ;;  %v1408_v52 = vadd.f32 %v1407_v16, %v1406_v4 }
 0xf8a   :  { %v1414_v49 = vrot.slane %v1413_v53, 1  ;;  %v1421_v36 = vrot.slane %v1420_v30, 1 }
 0xf8b   :  { %v1434_v50 = vsel %vm313_vm6, %v1401_v6, %v1433_v41  ;;  %v6391_v6 = vld [vmem:[%s6972_s1] sm:$0xff] }
 0xf8c   :  { %v1415_v51 = vadd.f32 %v1414_v49, %v1413_v53  ;;  %v1422_v44 = vadd.f32 %v1421_v36, %v1420_v30  ;;  %v1435_v3 = vsel %vm315_vm7, %v1408_v52, %v1434_v50  ;;  %v7084_v36 = vld [vmem:[#allocation3_spill] sm:$0xff] }
 0xf8e   :  { %v1436_v48 = vsel %vm317_vm8, %v1415_v51, %v1435_v3  ;;  %v7085_v51 = vld [vmem:[#allocation4_spill] sm:$0xff]  ;;  %v7087_v3 = vld [vmem:[#allocation2_spill] sm:$0xff] }
 0xf8f   :  { %v1437_v38 = vsel %vm319_vm9, %v1422_v44, %v1436_v48  ;;  %v1513_v24 = vpop.permute.xlu1 %1512  ;;  %v7086_v44 = vld [vmem:[#allocation5_spill] sm:$0xff] }
 0xf90   :  { %4919 = vmatmul.mubr.msk.f32.vlgmr.msra.gmra.mrb[12].mxu1 %vm238_vm2, %v1437_v38  ;;  %v1515_v29 = vmul.f32 %v6074_v23, %v1513_v24 }
 0xf91   :  { %5213 = vmatpush3.bf16.msra.mxu1 %v6097_v9  ;;  %4929 = vmatprep.mubr.msk.f32.mxu1 %vm5719_vm1, %v7059_v2 }
 0xf92   :  { %5214 = vmatprep.subr.bf16.mxu1 %v7060_v28 }
 0xf95   :  { %5216 = vmatpush3.bf16.msra.mxu1 %v6109_v15 }
 0xf96   :  { %5218 = vmatprep.subr.bf16.mxu1 %v6112_v54 }
0x1063   :  { %v1506_v45 = vpop.f32.mrb[12].mxu1 }
0x1064   :  { %v1510_v55 = vadd.f32 %v1506_v45, %v1065_v18  ;;  %v4920_v31 = vpop.f32.mrb[13].mxu1 }
0x1066   :  { %v1516_v57 = vadd.f32 %v1515_v29, %v1510_v55 }
0x1068   :  { %5600 = vtanh.f32 %v1516_v57  ;;  %v4472_v5 = vmul.f32 -1.442695, %v1516_v57 }
0x106a   :  { %5602 = vpow2.f32 %v4472_v5 }
0x1072   :  { %v5601_v58 = vpop.eup %5600 }
0x1073   :  { %1526 = vrot.lane.b32.xlu0 %v5601_v58, %s5722_s13 }
0x1074   :  { %v5603_v46 = vpop.eup %5602 }
0x1075   :  { %v1520_v47 = vadd.f32 1.0, %v5603_v46 }
0x1077   :  { %5604 = vrcp.f32 %v1520_v47 }
0x1081   :  { %v5605_v4 = vpop.eup %5604 }
0x1082   :  { %v1524_v23 = vmul.f32 %v5605_v4, %v6262_v61 }
0x10e5   :  { %v1527_v56 = vpop.permute.xlu0 %1526 }
0x10e6   :  { %v1529_v0 = vmul.f32 %v5605_v4, %v1527_v56 }
0x10e8   :  { %1531 = vrot.lane.b32.xlu1 %v1529_v0, %s5723_s14  ;;  %v7088_v0 = vld [vmem:[#allocation8_spill] sm:$0xff] }
0x115a   :  { %v1532_v37 = vpop.permute.xlu1 %1531 }
0x115b   :  { %v6360_v11 = vadd.f32 %v1532_v37, %v1524_v23  ;;  %v7089_v37 = vld [vmem:[#allocation7_spill] sm:$0xff] }
0x115d   :  { %5606 = vtanh.f32 %v6360_v11 }
0x1167   :  { %v5607_v25 = vpop.eup %5606 }
0x1168   :  { %1537 = vrot.lane.b32.xlu0 %v5607_v25, %s5722_s13 }
0x116c   :  { %1617 = vrot.lane.b32.xlu0 %v6360_v11, %s5724_s5 }
0x11da   :  { %v1538_v12 = vpop.permute.xlu0 %1537 }
0x11db   :  { %v1540_v10 = vmul.f32 %v5605_v4, %v1538_v12  ;;  %v7090_v12 = vld [vmem:[#allocation6_spill] sm:$0xff] }
0x11dd   :  { %1542 = vrot.lane.b32.xlu1 %v1540_v10, %s5723_s14 }
0x11de   :  { %v1618_v61 = vpop.permute.xlu0 %1617 }
0x124f   :  { %v1543_v21 = vpop.permute.xlu1 %1542 }
0x1250   :  { %4930 = vmatmul.mubr.msk.f32.vlgmr.msra.gmra.mrb[14].mxu1 %vm238_vm2, %v1543_v21 }
0x1251   :  { %5220 = vmatpush1.bf16.msra.mxu1 %v6132_v59  ;;  %1685 = vmatprep.mubr.f32.mxu1 %v7059_v2 }
0x1252   :  { %5222 = vmatprep.subr.bf16.mxu1 %v6134_v63 }
0x1255   :  { %5224 = vmatpush1.bf16.msra.mxu1 %v6150_v62 }
0x1256   :  { %5226 = vmatprep.subr.bf16.mxu1 %v6154_v1 }
0x1258   :  { %4474 = vmatmul.mubr.msk.f32.vlgmr.msra.gmra.mrb[16].mxu1 %vm238_vm2, %v1618_v61 }
0x1259   :  { %5228 = vmatpush1.bf16.msra.mxu1 %v6169_v35  ;;  %1756 = vmatprep.mubr.f32.mxu1 %v7059_v2 }
0x125a   :  { %5230 = vmatprep.subr.bf16.mxu1 %v6172_v43 }
0x125d   :  { %5232 = vmatpush1.bf16.msra.mxu1 %v6182_v60 }
0x125e   :  { %5265 = vmatprep.subr.bf16.mxu1 %v7060_v28 }
0x1260   :  { %4475 = vmatmul.mubr.msk.f32.vlgmr.msra.gmra.mrb[16].mxu1 %vm238_vm2, %v1543_v21  ;;  %v7091_v21 = vld [vmem:[#allocation9_spill] sm:$0xff] }
0x1261   :  { %5267 = vmatpush3.bf16.msra.mxu1 %v5981_v34  ;;  %4940 = vmatprep.mubr.msk.f32.mxu1 %vm5719_vm1, %v7059_v2 }
0x1262   :  { %5268 = vmatprep.subr.bf16.mxu1 %v7060_v28 }
0x1265   :  { %5270 = vmatpush3.bf16.msra.mxu1 %v5993_v42 }
0x1266   :  { %5271 = vmatprep.subr.bf16.mxu1 %v7060_v28 }
0x1323   :  { %v6386_v16 = vpop.f32.mrb[14].mxu1 }
0x1324   :  { %v4931_v17 = vpop.f32.mrb[15].mxu1 }
0x1325   :  { %v7092_v17 = vld [vmem:[#allocation10_spill] sm:$0xff] }
0x1333   :  { %v1758_v53 = vpop.f32.mrb[16].mxu1 }
0x1334   :  { %v1763_v52 = vadd.f32 %v6391_v6, %v1758_v53  ;;  %v1760_v30 = vpop.f32.mrb[17].mxu1 }
0x1335   :  { %v1764_v41 = vadd.f32 %v6294_v22, %v1760_v30 }
0x1337   :  { %5608 = vtanh.f32 %v1764_v41  ;;  %v7094_v41 = vld [vmem:[#allocation12_spill] sm:$0xff] }
0x1338   :  { %5610 = vtanh.f32 %v1763_v52  ;;  %v7093_v52 = vld [vmem:[#allocation11_spill] sm:$0xff] }
0x1341   :  { %v5609_v49 = vpop.eup %5608 }
0x1342   :  { %v5611_v50 = vpop.eup %5610  ;;  %1831 = vmatprep.mubr.f32.mxu0 %v5609_v49 }
0x1343   :  { %1832 = vmatmul.mubr.f32.vlgmr.msra.gmra.mrb[6].mxu0 %v5611_v50  ;;  %v7095_v50 = vld [vmem:[#allocation13_spill] sm:$0xff] }
0x1344   :  { %5296 = vmatpush3.bf16.msra.mxu0 %v5797_v7 }
0x1345   :  { %5298 = vmatprep.subr.bf16.mxu0 %v5799_v8 }
0x1348   :  { %5300 = vmatpush3.bf16.msra.mxu0 %v5815_v13 }
0x1349   :  { %5302 = vmatprep.subr.bf16.mxu0 %v5818_v14 }
0x134c   :  { %5304 = vmatpush3.bf16.msra.mxu0 %v5833_v19 }
0x134d   :  { %5306 = vmatprep.subr.bf16.mxu0 %v5836_v20 }
0x1350   :  { %5308 = vmatpush3.bf16.msra.mxu0 %v5856_v26 }
0x1351   :  { %5310 = vmatprep.subr.bf16.mxu0 %v5860_v27 }
0x1354   :  { %5312 = vmatpush3.bf16.msra.mxu0 %v5875_v32 }
0x1355   :  { %5314 = vmatprep.subr.bf16.mxu0 %v5878_v33 }
0x1358   :  { %5316 = vmatpush3.bf16.msra.mxu0 %v5898_v39 }
0x1359   :  { %5318 = vmatprep.subr.bf16.mxu0 %v5901_v40 }
0x135c   :  { %5320 = vmatpush3.bf16.msra.mxu0 %v7084_v36 }
0x135d   :  { %5322 = vmatprep.subr.bf16.mxu0 %v7085_v51 }
0x1360   :  { %5324 = vmatpush3.bf16.msra.mxu0 %v7086_v44 }
0x1361   :  { %5354 = vmatprep.subr.bf16.mxu0 %v7087_v3 }
0x1416   :  { %v4668_v48 = vpop.f32.mrb[6].mxu0 }
0x1417   :  { %v4669_v38 = vpop.f32.mrb[7].mxu0 }
0x1418   :  { %v4670_v24 = vadd.f32 %v4669_v38, %v4668_v48  ;;  %v5727_v38 = vmov 3  }
0x1419   :  { %5554 = vset.pattern.permute.xlu1 %v5727_v38 }
0x141a   :  { %v1837_v18 = vsel %vm159_vm0, %v4670_v24, -inf }
0x141b   :  { %1838 = vmax.xlane.f32.xlu1 %v1837_v18 }
0x14a8   :  { %v1839_v29 = vpop.xlane.xlu1 %1838 }
0x14a9   :  { %v1840_v45 = vsub.f32 %v4670_v24, %v1839_v29  ;;  %v6424_v24 = vld [vmem:[%s6974_s2] sm:$0xff] }
0x14aa   :  { %7096 = vst [vmem:[#allocation14_spill] sm:$0xff] %v6424_v24 }
0x14ab   :  { %v1841_v55 = vmul.f32 1.442695, %v1840_v45  ;;  %v6430_v45 = vld [vmem:[%s6975_s0 + $0x8] sm:$0xff] }
0x14ac   :  { %7097 = vst [vmem:[#allocation16_spill] sm:$0xff] %v6430_v45 }
0x14ad   :  { %5612 = vpow2.f32 %v1841_v55 }
0x14b7   :  { %v5613_v31 = vpop.eup %5612 }
0x14b8   :  { %v1843_v57 = vsel %vm159_vm0, %v5613_v31, 0.0 }
0x14b9   :  { %1844 = vadd.xlane.f32.xlu0 %v1843_v57 }
0x1546   :  { %v1845_v58 = vpop.xlane.xlu0 %1844 }
0x1547   :  { %5614 = vrcp.f32 %v1845_v58 }
0x1551   :  { %v5615_v5 = vpop.eup %5614 }
0x1552   :  { %v1847_v46 = vmul.f32 %v5615_v5, %v1845_v58 }
0x1554   :  { %v1848_v47 = vsub.f32 2.0, %v1847_v46 }
0x1556   :  { %v1849_v4 = vmul.f32 %v5615_v5, %v1848_v47 }
0x1558   :  { %v1850_v56 = vmul.f32 %v5613_v31, %v1849_v4  ;;  %v6436_v31 = vld [vmem:[%s6975_s0] sm:$0xff] }
0x1559   :  { %7098 = vst [vmem:[#allocation15_spill] sm:$0xff] %v6436_v31 }
0x155a   :  { %v1861_v23 = vrot.slane %v1850_v56, %v7088_v0  ;;  %v1854_v25 = vrot.slane %v1850_v56, %v7089_v37  ;;  %v1868_v10 = vrot.slane %v1850_v56, %v7090_v12  ;;  %v1875_v61 = vrot.slane %v1850_v56, %v7091_v21 }
0x155b   :  { %v1882_v53 = vrot.slane %v1850_v56, %v7092_v17  ;;  %v1889_v30 = vrot.slane %v1850_v56, %v7093_v52  ;;  %v1896_v49 = vrot.slane %v1850_v56, %v7094_v41  ;;  %v1903_v48 = vrot.slane %v1850_v56, %v7095_v50 }
0x155c   :  { %1863 = vbcast.lane.b32.xlu1 %v1861_v23, 256  ;;  %1856 = vbcast.lane.b32.xlu0 %v1854_v25, 256  ;;  %v6444_v23 = vld [vmem:[%s6975_s0 + $0x10] sm:$0xff] }
0x155d   :  { %7099 = vst [vmem:[#allocation17_spill] sm:$0xff] %v6444_v23 }
0x1560   :  { %1870 = vbcast.lane.b32.xlu1 %v1868_v10, 256  ;;  %1877 = vbcast.lane.b32.xlu0 %v1875_v61, 256  ;;  %v6450_v10 = vld [vmem:[%s6975_s0 + $0x18] sm:$0xff] }
0x1561   :  { %7100 = vst [vmem:[#allocation18_spill] sm:$0xff] %v6450_v10 }
0x1564   :  { %1884 = vbcast.lane.b32.xlu1 %v1882_v53, 256  ;;  %1891 = vbcast.lane.b32.xlu0 %v1889_v30, 256 }
0x1568   :  { %1898 = vbcast.lane.b32.xlu1 %v1896_v49, 256  ;;  %1905 = vbcast.lane.b32.xlu0 %v1903_v48, 256 }
0x156c   :  { %2060 = vperm.xlu1 %5554, %v6424_v24  }
0x15ce   :  { %v1864_v18 = vpop.permute.xlu1 %1863  ;;  %v1857_v29 = vpop.permute.xlu0 %1856 }
0x15cf   :  { %v1908_v55 = vmul.f32 %v6430_v45, %v1864_v18  ;;  %v1907_v57 = vmul.f32 %v6436_v31, %v1857_v29 }
0x15d1   :  { %v1922_v58 = vsel %vm238_vm2, %v1908_v55, 0.0  ;;  %v1915_v5 = vsel %vm238_vm2, %v1907_v57, 0.0 }
0x15d2   :  { %v1923_v46 = vrot.slane %v1922_v58, 4  ;;  %v1916_v47 = vrot.slane %v1915_v5, 4  ;;  %v1871_v4 = vpop.permute.xlu1 %1870  ;;  %v1878_v56 = vpop.permute.xlu0 %1877 }
0x15d3   :  { %v1909_v25 = vmul.f32 %v6444_v23, %v1871_v4  ;;  %v1910_v61 = vmul.f32 %v6450_v10, %v1878_v56  ;;  %v6458_v4 = vld [vmem:[%s6975_s0 + $0x20] sm:$0xff] }
0x15d4   :  { %v1924_v53 = vadd.f32 %v1923_v46, %v1922_v58  ;;  %v1917_v30 = vadd.f32 %v1916_v47, %v1915_v5  ;;  %7101 = vst [vmem:[#allocation19_spill] sm:$0xff] %v6458_v4  ;;  %v6464_v58 = vld [vmem:[%s6975_s0 + $0x28] sm:$0xff] }
0x15d5   :  { %v1929_v49 = vsel %vm238_vm2, %v1909_v25, 0.0  ;;  %v1936_v48 = vsel %vm238_vm2, %v1910_v61, 0.0  ;;  %7102 = vst [vmem:[#allocation20_spill] sm:$0xff] %v6464_v58 }
0x15d6   :  { %v1925_v38 = vrot.slane %v1924_v53, 2  ;;  %v1918_v18 = vrot.slane %v1917_v30, 2  ;;  %v1930_v29 = vrot.slane %v1929_v49, 4  ;;  %v1937_v55 = vrot.slane %v1936_v48, 4  ;;  %v1885_v57 = vpop.permute.xlu1 %1884  ;;  %v1892_v31 = vpop.permute.xlu0 %1891 }
0x15d7   :  { %v1911_v23 = vmul.f32 %v6458_v4, %v1885_v57  ;;  %v1912_v5 = vmul.f32 %v6464_v58, %v1892_v31  ;;  %v6472_v31 = vld [vmem:[%s6975_s0 + $0x30] sm:$0xff] }
0x15d8   :  { %v1926_v46 = vadd.f32 %v1925_v38, %v1924_v53  ;;  %v1919_v47 = vadd.f32 %v1918_v18, %v1917_v30  ;;  %v1931_v56 = vadd.f32 %v1930_v29, %v1929_v49  ;;  %v1938_v25 = vadd.f32 %v1937_v55, %v1936_v48  ;;  %7103 = vst [vmem:[#allocation21_spill] sm:$0xff] %v6472_v31 }
0x15d9   :  { %v1943_v61 = vsel %vm238_vm2, %v1911_v23, 0.0  ;;  %v1950_v10 = vsel %vm238_vm2, %v1912_v5, 0.0  ;;  %v6478_v23 = vld [vmem:[%s6975_s0 + $0x38] sm:$0xff] }
0x15da   :  { %v1927_v45 = vrot.slane %v1926_v46, 1  ;;  %v1920_v24 = vrot.slane %v1919_v47, 1  ;;  %v1932_v50 = vrot.slane %v1931_v56, 2  ;;  %v1939_v41 = vrot.slane %v1938_v25, 2  ;;  %v1899_v57 = vpop.permute.xlu1 %1898  ;;  %v1906_v4 = vpop.permute.xlu0 %1905 }
0x15db   :  { %v1944_v52 = vrot.slane %v1943_v61, 4  ;;  %v1951_v17 = vrot.slane %v1950_v10, 4  ;;  %v1913_v53 = vmul.f32 %v6472_v31, %v1899_v57  ;;  %v1914_v30 = vmul.f32 %v6478_v23, %v1906_v4 }
0x15dc   :  { %v1928_v49 = vadd.f32 %v1927_v45, %v1926_v46  ;;  %v1933_v48 = vadd.f32 %v1932_v50, %v1931_v56  ;;  %v1940_v38 = vadd.f32 %v1939_v41, %v1938_v25  ;;  %v1921_v58 = vadd.f32 %v1920_v24, %v1919_v47 }
0x15dd   :  { %v1945_v18 = vadd.f32 %v1944_v52, %v1943_v61  ;;  %v1952_v29 = vadd.f32 %v1951_v17, %v1950_v10  ;;  %v1957_v55 = vsel %vm238_vm2, %v1913_v53, 0.0  ;;  %v1964_v5 = vsel %vm238_vm2, %v1914_v30, 0.0 }
0x15de   :  { %v1934_v21 = vrot.slane %v1933_v48, 1  ;;  %v1941_v12 = vrot.slane %v1940_v38, 1  ;;  %v1958_v57 = vrot.slane %v1957_v55, 4  ;;  %v1965_v0 = vrot.slane %v1964_v5, 4 }
0x15df   :  { %v1946_v31 = vrot.slane %v1945_v18, 2  ;;  %v1953_v37 = vrot.slane %v1952_v29, 2  ;;  %v1979_v41 = vsel %vm307_vm3, %v1928_v49, %v1921_v58 }
0x15e0   :  { %v1935_v3 = vadd.f32 %v1934_v21, %v1933_v48  ;;  %v1959_v44 = vadd.f32 %v1958_v57, %v1957_v55  ;;  %v1966_v45 = vadd.f32 %v1965_v0, %v1964_v5  ;;  %v1942_v52 = vadd.f32 %v1941_v12, %v1940_v38  ;;  %v6507_v48 = vld [vmem:[%s6976_s7] ss:$0 sm:$0xff] }
0x15e1   :  { %v1947_v51 = vadd.f32 %v1946_v31, %v1945_v18  ;;  %v1954_v4 = vadd.f32 %v1953_v37, %v1952_v29 }
0x15e2   :  { %v1960_v17 = vrot.slane %v1959_v44, 2  ;;  %v1980_v50 = vsel %vm309_vm4, %v1935_v3, %v1979_v41  ;;  %v1967_v24 = vrot.slane %v1966_v45, 2 }
0x15e3   :  { %v1948_v10 = vrot.slane %v1947_v51, 1  ;;  %v1955_v46 = vrot.slane %v1954_v4, 1  ;;  %v1981_v53 = vsel %vm311_vm5, %v1942_v52, %v1980_v50 }
0x15e4   :  { %v1961_v47 = vadd.f32 %v1960_v17, %v1959_v44  ;;  %v1968_v61 = vadd.f32 %v1967_v24, %v1966_v45  ;;  %v6500_v44 = vld [vmem:[%s6976_s7 + $0x1] ss:$0 sm:$0xff] }
0x15e5   :  { %v1949_v56 = vadd.f32 %v1948_v10, %v1947_v51  ;;  %v1956_v25 = vadd.f32 %v1955_v46, %v1954_v4  ;;  %v1613_v49 = vadd.f32 %v6500_v44, %v6386_v16 }
0x15e6   :  { %v1962_v21 = vrot.slane %v1961_v47, 1  ;;  %v1969_v37 = vrot.slane %v1968_v61, 1 }
0x15e7   :  { %v1982_v31 = vsel %vm313_vm6, %v1949_v56, %v1981_v53 }
0x15e8   :  { %v1963_v0 = vadd.f32 %v1962_v21, %v1961_v47  ;;  %v1970_v30 = vadd.f32 %v1969_v37, %v1968_v61  ;;  %v1983_v12 = vsel %vm315_vm7, %v1956_v25, %v1982_v31 }
0x15ea   :  { %v1984_v58 = vsel %vm317_vm8, %v1963_v0, %v1983_v12 }
0x15eb   :  { %v1985_v3 = vsel %vm319_vm9, %v1970_v30, %v1984_v58  ;;  %v2061_v51 = vpop.permute.xlu1 %2060  ;;  %v7105_v58 = vld [vmem:[#allocation5_spill] sm:$0xff] }
0x15ec   :  { %4941 = vmatmul.mubr.msk.f32.vlgmr.msra.gmra.mrb[18].mxu1 %vm238_vm2, %v1985_v3  ;;  %v2063_v38 = vmul.f32 %v6507_v48, %v2061_v51  ;;  %v7106_v3 = vld [vmem:[#allocation2_spill] sm:$0xff] }
0x15ed   :  { %5273 = vmatpush3.bf16.msra.mxu1 %v6097_v9  ;;  %4951 = vmatprep.mubr.msk.f32.mxu1 %vm5719_vm1, %v7059_v2 }
0x15ee   :  { %5274 = vmatprep.subr.bf16.mxu1 %v7060_v28 }
0x15f1   :  { %5276 = vmatpush3.bf16.msra.mxu1 %v6109_v15 }
0x15f2   :  { %5278 = vmatprep.subr.bf16.mxu1 %v6112_v54 }
0x16bf   :  { %v2054_v18 = vpop.f32.mrb[18].mxu1 }
0x16c0   :  { %v2058_v29 = vadd.f32 %v2054_v18, %v1613_v49  ;;  %v4942_v55 = vpop.f32.mrb[19].mxu1 }
0x16c2   :  { %v2064_v5 = vadd.f32 %v2063_v38, %v2058_v29 }
0x16c4   :  { %5616 = vtanh.f32 %v2064_v5  ;;  %v4477_v4 = vmul.f32 -1.442695, %v2064_v5 }
0x16c6   :  { %5618 = vpow2.f32 %v4477_v4 }
0x16ce   :  { %v5617_v57 = vpop.eup %5616 }
0x16cf   :  { %2074 = vrot.lane.b32.xlu0 %v5617_v57, %s5722_s13 }
0x16d0   :  { %v5619_v45 = vpop.eup %5618 }
0x16d1   :  { %v2068_v41 = vadd.f32 1.0, %v5619_v45 }
0x16d3   :  { %5620 = vrcp.f32 %v2068_v41 }
0x16dd   :  { %v5621_v16 = vpop.eup %5620 }
0x16de   :  { %v2072_v50 = vmul.f32 %v5621_v16, %v6360_v11 }
0x1741   :  { %v2075_v52 = vpop.permute.xlu0 %2074 }
0x1742   :  { %v2077_v17 = vmul.f32 %v5621_v16, %v2075_v52 }
0x1744   :  { %2079 = vrot.lane.b32.xlu1 %v2077_v17, %s5723_s14 }
0x17b6   :  { %v2080_v10 = vpop.permute.xlu1 %2079 }
0x17b7   :  { %v6513_v46 = vadd.f32 %v2080_v10, %v2072_v50  ;;  %v7107_v10 = vld [vmem:[#allocation8_spill] sm:$0xff] }
0x17b9   :  { %5622 = vtanh.f32 %v6513_v46 }
0x17c3   :  { %v5623_v24 = vpop.eup %5622 }
0x17c4   :  { %2085 = vrot.lane.b32.xlu0 %v5623_v24, %s5722_s13 }
0x17c8   :  { %2165 = vrot.lane.b32.xlu0 %v6513_v46, %s5724_s5 }
0x1836   :  { %v2086_v47 = vpop.permute.xlu0 %2085 }
0x1837   :  { %v2088_v56 = vmul.f32 %v5621_v16, %v2086_v47  ;;  %v7108_v47 = vld [vmem:[#allocation7_spill] sm:$0xff] }
0x1839   :  { %2090 = vrot.lane.b32.xlu1 %v2088_v56, %s5723_s14 }
0x183a   :  { %v2166_v11 = vpop.permute.xlu0 %2165 }
0x18ab   :  { %v2091_v25 = vpop.permute.xlu1 %2090 }
0x18ac   :  { %4952 = vmatmul.mubr.msk.f32.vlgmr.msra.gmra.mrb[20].mxu1 %vm238_vm2, %v2091_v25 }
0x18ad   :  { %5280 = vmatpush1.bf16.msra.mxu1 %v6132_v59  ;;  %2233 = vmatprep.mubr.f32.mxu1 %v7059_v2 }
0x18ae   :  { %5282 = vmatprep.subr.bf16.mxu1 %v6134_v63 }
0x18b1   :  { %5284 = vmatpush1.bf16.msra.mxu1 %v6150_v62 }
0x18b2   :  { %5286 = vmatprep.subr.bf16.mxu1 %v6154_v1 }
0x18b4   :  { %4479 = vmatmul.mubr.msk.f32.vlgmr.msra.gmra.mrb[22].mxu1 %vm238_vm2, %v2166_v11 }
0x18b5   :  { %5288 = vmatpush1.bf16.msra.mxu1 %v6169_v35  ;;  %2304 = vmatprep.mubr.f32.mxu1 %v7059_v2 }
0x18b6   :  { %5290 = vmatprep.subr.bf16.mxu1 %v6172_v43 }
0x18b9   :  { %5292 = vmatpush1.bf16.msra.mxu1 %v6182_v60 }
0x18ba   :  { %5325 = vmatprep.subr.bf16.mxu1 %v7060_v28 }
0x18bc   :  { %4480 = vmatmul.mubr.msk.f32.vlgmr.msra.gmra.mrb[22].mxu1 %vm238_vm2, %v2091_v25  ;;  %v7109_v25 = vld [vmem:[#allocation6_spill] sm:$0xff] }
0x18bd   :  { %5327 = vmatpush3.bf16.msra.mxu1 %v5981_v34  ;;  %4962 = vmatprep.mubr.msk.f32.mxu1 %vm5719_vm1, %v7059_v2 }
0x18be   :  { %5328 = vmatprep.subr.bf16.mxu1 %v7060_v28 }
0x18c1   :  { %5330 = vmatpush3.bf16.msra.mxu1 %v5993_v42 }
0x18c2   :  { %5331 = vmatprep.subr.bf16.mxu1 %v7060_v28 }
0x197f   :  { %v6539_v61 = vpop.f32.mrb[20].mxu1 }
0x1980   :  { %v4953_v53 = vpop.f32.mrb[21].mxu1 }
0x1981   :  { %v7110_v53 = vld [vmem:[#allocation9_spill] sm:$0xff] }
0x198f   :  { %v2306_v21 = vpop.f32.mrb[22].mxu1 }
0x1990   :  { %v2311_v31 = vadd.f32 %v6391_v6, %v2306_v21  ;;  %v2308_v37 = vpop.f32.mrb[23].mxu1 }
0x1991   :  { %v2312_v0 = vadd.f32 %v6294_v22, %v2308_v37  ;;  %v7104_v22 = vld [vmem:[#allocation4_spill] sm:$0xff] }
0x1993   :  { %5624 = vtanh.f32 %v2312_v0  ;;  %v7112_v0 = vld [vmem:[#allocation11_spill] sm:$0xff] }
0x1994   :  { %5626 = vtanh.f32 %v2311_v31  ;;  %v7111_v31 = vld [vmem:[#allocation10_spill] sm:$0xff] }
0x199d   :  { %v5625_v30 = vpop.eup %5624 }
0x199e   :  { %v5627_v12 = vpop.eup %5626  ;;  %2379 = vmatprep.mubr.f32.mxu0 %v5625_v30 }
0x199f   :  { %2380 = vmatmul.mubr.f32.vlgmr.msra.gmra.mrb[8].mxu0 %v5627_v12  ;;  %v7113_v12 = vld [vmem:[#allocation12_spill] sm:$0xff] }
0x19a0   :  { %5356 = vmatpush3.bf16.msra.mxu0 %v5797_v7 }
0x19a1   :  { %5358 = vmatprep.subr.bf16.mxu0 %v5799_v8 }
0x19a4   :  { %5360 = vmatpush3.bf16.msra.mxu0 %v5815_v13 }
0x19a5   :  { %5362 = vmatprep.subr.bf16.mxu0 %v5818_v14 }
0x19a8   :  { %5364 = vmatpush3.bf16.msra.mxu0 %v5833_v19 }
0x19a9   :  { %5366 = vmatprep.subr.bf16.mxu0 %v5836_v20 }
0x19ac   :  { %5368 = vmatpush3.bf16.msra.mxu0 %v5856_v26 }
0x19ad   :  { %5370 = vmatprep.subr.bf16.mxu0 %v5860_v27 }
0x19b0   :  { %5372 = vmatpush3.bf16.msra.mxu0 %v5875_v32 }
0x19b1   :  { %5374 = vmatprep.subr.bf16.mxu0 %v5878_v33 }
0x19b4   :  { %5376 = vmatpush3.bf16.msra.mxu0 %v5898_v39 }
0x19b5   :  { %5378 = vmatprep.subr.bf16.mxu0 %v5901_v40 }
0x19b8   :  { %5380 = vmatpush3.bf16.msra.mxu0 %v7084_v36 }
0x19b9   :  { %5382 = vmatprep.subr.bf16.mxu0 %v7104_v22 }
0x19bc   :  { %5384 = vmatpush3.bf16.msra.mxu0 %v7105_v58 }
0x19bd   :  { %5414 = vmatprep.subr.bf16.mxu0 %v7106_v3  ;;  %v7122_v3 = vld [vmem:[#allocation21_spill] sm:$0xff] }
0x1a72   :  { %v4713_v51 = vpop.f32.mrb[8].mxu0 }
0x1a73   :  { %v4714_v49 = vpop.f32.mrb[9].mxu0 }
0x1a74   :  { %v4715_v38 = vadd.f32 %v4714_v49, %v4713_v51  ;;  %v7114_v49 = vld [vmem:[#allocation13_spill] sm:$0xff] }
0x1a76   :  { %v2385_v18 = vsel %vm159_vm0, %v4715_v38, -inf }
0x1a77   :  { %2386 = vmax.xlane.f32.xlu1 %v2385_v18  ;;  %v5728_v18 = vmov 4  }
0x1a78   :  { %5555 = vset.pattern.permute.xlu1 %v5728_v18 }
0x1b04   :  { %v2387_v29 = vpop.xlane.xlu1 %2386 }
0x1b05   :  { %v2388_v55 = vsub.f32 %v4715_v38, %v2387_v29  ;;  %v7115_v29 = vld [vmem:[#allocation14_spill] sm:$0xff] }
0x1b07   :  { %v2389_v5 = vmul.f32 1.442695, %v2388_v55 }
0x1b09   :  { %5628 = vpow2.f32 %v2389_v5 }
0x1b13   :  { %v5629_v57 = vpop.eup %5628 }
0x1b14   :  { %v2391_v4 = vsel %vm159_vm0, %v5629_v57, 0.0 }
0x1b15   :  { %2392 = vadd.xlane.f32.xlu0 %v2391_v4 }
0x1ba2   :  { %v2393_v45 = vpop.xlane.xlu0 %2392 }
0x1ba3   :  { %5630 = vrcp.f32 %v2393_v45 }
0x1bad   :  { %v5631_v41 = vpop.eup %5630 }
0x1bae   :  { %v2395_v16 = vmul.f32 %v5631_v41, %v2393_v45  ;;  %v7117_v45 = vld [vmem:[#allocation15_spill] sm:$0xff] }
0x1bb0   :  { %v2396_v52 = vsub.f32 2.0, %v2395_v16 }
0x1bb2   :  { %v2397_v17 = vmul.f32 %v5631_v41, %v2396_v52 }
0x1bb4   :  { %v2398_v50 = vmul.f32 %v5629_v57, %v2397_v17  ;;  %v7116_v57 = vld [vmem:[#allocation16_spill] sm:$0xff] }
0x1bb6   :  { %v2409_v24 = vrot.slane %v2398_v50, %v7107_v10  ;;  %v2402_v56 = vrot.slane %v2398_v50, %v7108_v47  ;;  %v2416_v11 = vrot.slane %v2398_v50, %v7109_v25  ;;  %v2423_v21 = vrot.slane %v2398_v50, %v7110_v53 }
0x1bb7   :  { %v2430_v37 = vrot.slane %v2398_v50, %v7111_v31  ;;  %v2437_v30 = vrot.slane %v2398_v50, %v7112_v0  ;;  %v2444_v51 = vrot.slane %v2398_v50, %v7113_v12  ;;  %v2451_v38 = vrot.slane %v2398_v50, %v7114_v49  ;;  %v7120_v49 = vld [vmem:[#allocation19_spill] sm:$0xff]  ;;  %v7121_v0 = vld [vmem:[#allocation20_spill] sm:$0xff] }
0x1bb8   :  { %2411 = vbcast.lane.b32.xlu1 %v2409_v24, 256  ;;  %2404 = vbcast.lane.b32.xlu0 %v2402_v56, 256 }
0x1bbc   :  { %2418 = vbcast.lane.b32.xlu1 %v2416_v11, 256  ;;  %2425 = vbcast.lane.b32.xlu0 %v2423_v21, 256  ;;  %v7118_v11 = vld [vmem:[#allocation17_spill] sm:$0xff] }
0x1bc0   :  { %2432 = vbcast.lane.b32.xlu1 %v2430_v37, 256  ;;  %2439 = vbcast.lane.b32.xlu0 %v2437_v30, 256  ;;  %v7119_v37 = vld [vmem:[#allocation18_spill] sm:$0xff] }
0x1bc4   :  { %2446 = vbcast.lane.b32.xlu1 %v2444_v51, 256  ;;  %2453 = vbcast.lane.b32.xlu0 %v2451_v38, 256 }
0x1bc8   :  { %2608 = vperm.xlu1 %5555, %v7115_v29  }
0x1c2a   :  { %v2412_v55 = vpop.permute.xlu1 %2411  ;;  %v2405_v5 = vpop.permute.xlu0 %2404 }
0x1c2b   :  { %v2456_v4 = vmul.f32 %v7116_v57, %v2412_v55  ;;  %v2455_v41 = vmul.f32 %v7117_v45, %v2405_v5 }
0x1c2d   :  { %v2470_v16 = vsel %vm238_vm2, %v2456_v4, 0.0  ;;  %v2463_v52 = vsel %vm238_vm2, %v2455_v41, 0.0 }
0x1c2e   :  { %v2471_v17 = vrot.slane %v2470_v16, 4  ;;  %v2464_v24 = vrot.slane %v2463_v52, 4  ;;  %v2419_v56 = vpop.permute.xlu1 %2418  ;;  %v2426_v50 = vpop.permute.xlu0 %2425 }
0x1c2f   :  { %v2457_v21 = vmul.f32 %v7118_v11, %v2419_v56  ;;  %v2458_v30 = vmul.f32 %v7119_v37, %v2426_v50 }
0x1c30   :  { %v2472_v51 = vadd.f32 %v2471_v17, %v2470_v16  ;;  %v2465_v38 = vadd.f32 %v2464_v24, %v2463_v52 }
0x1c31   :  { %v2477_v18 = vsel %vm238_vm2, %v2457_v21, 0.0  ;;  %v2484_v55 = vsel %vm238_vm2, %v2458_v30, 0.0 }
0x1c32   :  { %v2473_v57 = vrot.slane %v2472_v51, 2  ;;  %v2466_v5 = vrot.slane %v2465_v38, 2  ;;  %v2478_v45 = vrot.slane %v2477_v18, 4  ;;  %v2485_v4 = vrot.slane %v2484_v55, 4  ;;  %v2433_v29 = vpop.permute.xlu1 %2432  ;;  %v2440_v41 = vpop.permute.xlu0 %2439 }
0x1c33   :  { %v2459_v12 = vmul.f32 %v7120_v49, %v2433_v29  ;;  %v2460_v31 = vmul.f32 %v7121_v0, %v2440_v41 }
0x1c34   :  { %v2474_v53 = vadd.f32 %v2473_v57, %v2472_v51  ;;  %v2467_v56 = vadd.f32 %v2466_v5, %v2465_v38  ;;  %v2479_v11 = vadd.f32 %v2478_v45, %v2477_v18  ;;  %v2486_v50 = vadd.f32 %v2485_v4, %v2484_v55 }
0x1c35   :  { %v2491_v16 = vsel %vm238_vm2, %v2459_v12, 0.0  ;;  %v2498_v52 = vsel %vm238_vm2, %v2460_v31, 0.0 }
0x1c36   :  { %v2475_v17 = vrot.slane %v2474_v53, 1  ;;  %v2468_v24 = vrot.slane %v2467_v56, 1  ;;  %v2480_v21 = vrot.slane %v2479_v11, 2  ;;  %v2487_v30 = vrot.slane %v2486_v50, 2  ;;  %v2447_v37 = vpop.permute.xlu1 %2446  ;;  %v2454_v25 = vpop.permute.xlu0 %2453 }
0x1c37   :  { %v2492_v47 = vrot.slane %v2491_v16, 4  ;;  %v2499_v10 = vrot.slane %v2498_v52, 4  ;;  %v2461_v29 = vmul.f32 %v7122_v3, %v2447_v37  ;;  %v2462_v41 = vmul.f32 %v6478_v23, %v2454_v25 }
0x1c38   :  { %v2476_v57 = vadd.f32 %v2475_v17, %v2474_v53  ;;  %v2481_v51 = vadd.f32 %v2480_v21, %v2479_v11  ;;  %v2488_v45 = vadd.f32 %v2487_v30, %v2486_v50  ;;  %v2469_v55 = vadd.f32 %v2468_v24, %v2467_v56 }
0x1c39   :  { %v2493_v38 = vadd.f32 %v2492_v47, %v2491_v16  ;;  %v2500_v18 = vadd.f32 %v2499_v10, %v2498_v52  ;;  %v2505_v12 = vsel %vm238_vm2, %v2461_v29, 0.0  ;;  %v2512_v31 = vsel %vm238_vm2, %v2462_v41, 0.0 }
0x1c3a   :  { %v2482_v5 = vrot.slane %v2481_v51, 1  ;;  %v2489_v4 = vrot.slane %v2488_v45, 1  ;;  %v2506_v0 = vrot.slane %v2505_v12, 4  ;;  %v2513_v22 = vrot.slane %v2512_v31, 4 }
0x1c3b   :  { %v2494_v49 = vrot.slane %v2493_v38, 2  ;;  %v2501_v58 = vrot.slane %v2500_v18, 2  ;;  %v2527_v11 = vsel %vm307_vm3, %v2476_v57, %v2469_v55 }
0x1c3c   :  { %v2483_v36 = vadd.f32 %v2482_v5, %v2481_v51  ;;  %v2507_v37 = vadd.f32 %v2506_v0, %v2505_v12  ;;  %v2514_v53 = vadd.f32 %v2513_v22, %v2512_v31  ;;  %v2490_v47 = vadd.f32 %v2489_v4, %v2488_v45 }
0x1c3d   :  { %v2495_v3 = vadd.f32 %v2494_v49, %v2493_v38  ;;  %v2502_v25 = vadd.f32 %v2501_v58, %v2500_v18  ;;  %v2161_v45 = vadd.f32 %v6500_v44, %v6539_v61 }
0x1c3e   :  { %v2508_v10 = vrot.slane %v2507_v37, 2  ;;  %v2528_v50 = vsel %vm309_vm4, %v2483_v36, %v2527_v11  ;;  %v2515_v56 = vrot.slane %v2514_v53, 2 }
0x1c3f   :  { %v2496_v16 = vrot.slane %v2495_v3, 1  ;;  %v2503_v52 = vrot.slane %v2502_v25, 1  ;;  %v2529_v29 = vsel %vm311_vm5, %v2490_v47, %v2528_v50 }
0x1c40   :  { %v2509_v17 = vadd.f32 %v2508_v10, %v2507_v37  ;;  %v2516_v30 = vadd.f32 %v2515_v56, %v2514_v53 }
0x1c41   :  { %v2497_v24 = vadd.f32 %v2496_v16, %v2495_v3  ;;  %v2504_v21 = vadd.f32 %v2503_v52, %v2502_v25 }
0x1c42   :  { %v2510_v41 = vrot.slane %v2509_v17, 1  ;;  %v2517_v58 = vrot.slane %v2516_v30, 1 }
0x1c43   :  { %v2530_v0 = vsel %vm313_vm6, %v2497_v24, %v2529_v29 }
0x1c44   :  { %v2511_v22 = vadd.f32 %v2510_v41, %v2509_v17  ;;  %v2518_v49 = vadd.f32 %v2517_v58, %v2516_v30  ;;  %v2531_v57 = vsel %vm315_vm7, %v2504_v21, %v2530_v0  ;;  %v6638_v0 = vld [vmem:[%s6972_s1 + $0x8] sm:$0xff] }
0x1c46   :  { %v2532_v51 = vsel %vm317_vm8, %v2511_v22, %v2531_v57  ;;  %v7124_v57 = vld [vmem:[#allocation4_spill] sm:$0xff] }
0x1c47   :  { %v2533_v36 = vsel %vm319_vm9, %v2518_v49, %v2532_v51  ;;  %v2609_v3 = vpop.permute.xlu1 %2608  ;;  %v7125_v51 = vld [vmem:[#allocation5_spill] sm:$0xff] }
0x1c48   :  { %4963 = vmatmul.mubr.msk.f32.vlgmr.msra.gmra.mrb[24].mxu1 %vm238_vm2, %v2533_v36  ;;  %v2611_v38 = vmul.f32 %v6507_v48, %v2609_v3  ;;  %v7126_v36 = vld [vmem:[#allocation2_spill] sm:$0xff] }
0x1c49   :  { %5333 = vmatpush3.bf16.msra.mxu1 %v6097_v9  ;;  %4973 = vmatprep.mubr.msk.f32.mxu1 %vm5719_vm1, %v7059_v2 }
0x1c4a   :  { %5334 = vmatprep.subr.bf16.mxu1 %v7060_v28 }
0x1c4d   :  { %5336 = vmatpush3.bf16.msra.mxu1 %v6109_v15 }
0x1c4e   :  { %5338 = vmatprep.subr.bf16.mxu1 %v6112_v54 }
0x1d1b   :  { %v2602_v18 = vpop.f32.mrb[24].mxu1 }
0x1d1c   :  { %v2606_v12 = vadd.f32 %v2602_v18, %v2161_v45  ;;  %v4964_v31 = vpop.f32.mrb[25].mxu1 }
0x1d1e   :  { %v2612_v55 = vadd.f32 %v2611_v38, %v2606_v12 }
0x1d20   :  { %5632 = vtanh.f32 %v2612_v55  ;;  %v4482_v4 = vmul.f32 -1.442695, %v2612_v55 }
0x1d22   :  { %5634 = vpow2.f32 %v4482_v4 }
0x1d2a   :  { %v5633_v5 = vpop.eup %5632 }
0x1d2b   :  { %2622 = vrot.lane.b32.xlu0 %v5633_v5, %s5722_s13 }
0x1d2c   :  { %v5635_v37 = vpop.eup %5634 }
0x1d2d   :  { %v2616_v25 = vadd.f32 1.0, %v5635_v37 }
0x1d2f   :  { %5636 = vrcp.f32 %v2616_v25 }
0x1d39   :  { %v5637_v53 = vpop.eup %5636 }
0x1d3a   :  { %v2620_v61 = vmul.f32 %v5637_v53, %v6513_v46 }
0x1d9d   :  { %v2623_v11 = vpop.permute.xlu0 %2622 }
0x1d9e   :  { %v2625_v47 = vmul.f32 %v5637_v53, %v2623_v11 }
0x1da0   :  { %2627 = vrot.lane.b32.xlu1 %v2625_v47, %s5723_s14 }
0x1e12   :  { %v2628_v10 = vpop.permute.xlu1 %2627 }
0x1e13   :  { %v6606_v50 = vadd.f32 %v2628_v10, %v2620_v61  ;;  %v7127_v10 = vld [vmem:[#allocation8_spill] sm:$0xff] }
0x1e15   :  { %5638 = vtanh.f32 %v6606_v50 }
0x1e1f   :  { %v5639_v16 = vpop.eup %5638 }
0x1e20   :  { %2633 = vrot.lane.b32.xlu0 %v5639_v16, %s5722_s13 }
0x1e24   :  { %2713 = vrot.lane.b32.xlu0 %v6606_v50, %s5724_s5 }
0x1e92   :  { %v2634_v52 = vpop.permute.xlu0 %2633 }
0x1e93   :  { %v2636_v56 = vmul.f32 %v5637_v53, %v2634_v52  ;;  %v7128_v52 = vld [vmem:[#allocation7_spill] sm:$0xff] }
0x1e95   :  { %2638 = vrot.lane.b32.xlu1 %v2636_v56, %s5723_s14 }
0x1e96   :  { %v2714_v46 = vpop.permute.xlu0 %2713 }
0x1f07   :  { %v2639_v17 = vpop.permute.xlu1 %2638 }
0x1f08   :  { %4974 = vmatmul.mubr.msk.f32.vlgmr.msra.gmra.mrb[26].mxu1 %vm238_vm2, %v2639_v17 }
0x1f09   :  { %5340 = vmatpush1.bf16.msra.mxu1 %v6132_v59  ;;  %2781 = vmatprep.mubr.f32.mxu1 %v7059_v2 }
0x1f0a   :  { %5342 = vmatprep.subr.bf16.mxu1 %v6134_v63 }
0x1f0d   :  { %5344 = vmatpush1.bf16.msra.mxu1 %v6150_v62 }
0x1f0e   :  { %5346 = vmatprep.subr.bf16.mxu1 %v6154_v1 }
0x1f10   :  { %4484 = vmatmul.mubr.msk.f32.vlgmr.msra.gmra.mrb[28].mxu1 %vm238_vm2, %v2714_v46 }
0x1f11   :  { %5348 = vmatpush1.bf16.msra.mxu1 %v6169_v35  ;;  %2852 = vmatprep.mubr.f32.mxu1 %v7059_v2 }
0x1f12   :  { %5350 = vmatprep.subr.bf16.mxu1 %v6172_v43 }
0x1f15   :  { %5352 = vmatpush1.bf16.msra.mxu1 %v6182_v60 }
0x1f16   :  { %5385 = vmatprep.subr.bf16.mxu1 %v7060_v28 }
0x1f18   :  { %4485 = vmatmul.mubr.msk.f32.vlgmr.msra.gmra.mrb[28].mxu1 %vm238_vm2, %v2639_v17  ;;  %v7129_v17 = vld [vmem:[#allocation6_spill] sm:$0xff] }
0x1f19   :  { %5387 = vmatpush3.bf16.msra.mxu1 %v5981_v34  ;;  %4984 = vmatprep.mubr.msk.f32.mxu1 %vm5719_vm1, %v7059_v2 }
0x1f1a   :  { %5388 = vmatprep.subr.bf16.mxu1 %v7060_v28 }
0x1f1d   :  { %5390 = vmatpush3.bf16.msra.mxu1 %v5993_v42 }
0x1f1e   :  { %5391 = vmatprep.subr.bf16.mxu1 %v7060_v28 }
0x1fdb   :  { %v6632_v24 = vpop.f32.mrb[26].mxu1 }
0x1fdc   :  { %v4975_v21 = vpop.f32.mrb[27].mxu1 }
0x1fdd   :  { %v7130_v21 = vld [vmem:[#allocation9_spill] sm:$0xff] }
0x1feb   :  { %v2854_v30 = vpop.f32.mrb[28].mxu1 }
0x1fec   :  { %v2859_v29 = vadd.f32 %v6391_v6, %v2854_v30  ;;  %v2856_v41 = vpop.f32.mrb[29].mxu1  ;;  %v7123_v6 = vld [vmem:[#allocation3_spill] sm:$0xff] }
0x1fed   :  { %v2860_v58 = vadd.f32 %v6638_v0, %v2856_v41 }
0x1fef   :  { %5640 = vtanh.f32 %v2860_v58  ;;  %v7132_v58 = vld [vmem:[#allocation11_spill] sm:$0xff] }
0x1ff0   :  { %5642 = vtanh.f32 %v2859_v29  ;;  %v7131_v29 = vld [vmem:[#allocation10_spill] sm:$0xff] }
0x1ff9   :  { %v5641_v22 = vpop.eup %5640 }
0x1ffa   :  { %v5643_v49 = vpop.eup %5642  ;;  %2927 = vmatprep.mubr.f32.mxu0 %v5641_v22 }
0x1ffb   :  { %2928 = vmatmul.mubr.f32.vlgmr.msra.gmra.mrb[10].mxu0 %v5643_v49  ;;  %v7133_v49 = vld [vmem:[#allocation12_spill] sm:$0xff] }
0x1ffc   :  { %5416 = vmatpush3.bf16.msra.mxu0 %v5797_v7 }
0x1ffd   :  { %5418 = vmatprep.subr.bf16.mxu0 %v5799_v8 }
0x2000   :  { %5420 = vmatpush3.bf16.msra.mxu0 %v5815_v13 }
0x2001   :  { %5422 = vmatprep.subr.bf16.mxu0 %v5818_v14 }
0x2004   :  { %5424 = vmatpush3.bf16.msra.mxu0 %v5833_v19 }
0x2005   :  { %5426 = vmatprep.subr.bf16.mxu0 %v5836_v20 }
0x2008   :  { %5428 = vmatpush3.bf16.msra.mxu0 %v5856_v26 }
0x2009   :  { %5430 = vmatprep.subr.bf16.mxu0 %v5860_v27 }
0x200c   :  { %5432 = vmatpush3.bf16.msra.mxu0 %v5875_v32 }
0x200d   :  { %5434 = vmatprep.subr.bf16.mxu0 %v5878_v33 }
0x2010   :  { %5436 = vmatpush3.bf16.msra.mxu0 %v5898_v39 }
0x2011   :  { %5438 = vmatprep.subr.bf16.mxu0 %v5901_v40 }
0x2014   :  { %5440 = vmatpush3.bf16.msra.mxu0 %v7123_v6 }
0x2015   :  { %5442 = vmatprep.subr.bf16.mxu0 %v7124_v57 }
0x2018   :  { %5444 = vmatpush3.bf16.msra.mxu0 %v7125_v51 }
0x2019   :  { %5474 = vmatprep.subr.bf16.mxu0 %v7126_v36 }
0x20ce   :  { %v4758_v3 = vpop.f32.mrb[10].mxu0 }
0x20cf   :  { %v4759_v45 = vpop.f32.mrb[11].mxu0 }
0x20d0   :  { %v4760_v38 = vadd.f32 %v4759_v45, %v4758_v3  ;;  %v7134_v3 = vld [vmem:[#allocation13_spill] sm:$0xff] }
0x20d2   :  { %v2933_v18 = vsel %vm159_vm0, %v4760_v38, -inf }
0x20d3   :  { %2934 = vmax.xlane.f32.xlu1 %v2933_v18  ;;  %v7135_v18 = vld [vmem:[#allocation14_spill] sm:$0xff] }
0x2160   :  { %v2935_v12 = vpop.xlane.xlu1 %2934 }
0x2161   :  { %v2936_v31 = vsub.f32 %v4760_v38, %v2935_v12  ;;  %v5729_v38 = vmov 5  }
0x2162   :  { %5556 = vset.pattern.permute.xlu1 %v5729_v38 }
0x2163   :  { %v2937_v55 = vmul.f32 1.442695, %v2936_v31 }
0x2165   :  { %5644 = vpow2.f32 %v2937_v55  ;;  %v7136_v55 = vld [vmem:[#allocation16_spill] sm:$0xff] }
0x216f   :  { %v5645_v5 = vpop.eup %5644 }
0x2170   :  { %v2939_v4 = vsel %vm159_vm0, %v5645_v5, 0.0 }
0x2171   :  { %2940 = vadd.xlane.f32.xlu0 %v2939_v4  ;;  %v7137_v4 = vld [vmem:[#allocation15_spill] sm:$0xff] }
0x21fe   :  { %v2941_v37 = vpop.xlane.xlu0 %2940 }
0x21ff   :  { %5646 = vrcp.f32 %v2941_v37 }
0x2209   :  { %v5647_v25 = vpop.eup %5646 }
0x220a   :  { %v2943_v53 = vmul.f32 %v5647_v25, %v2941_v37 }
0x220c   :  { %v2944_v11 = vsub.f32 2.0, %v2943_v53 }
0x220e   :  { %v2945_v47 = vmul.f32 %v5647_v25, %v2944_v11 }
0x2210   :  { %v2946_v61 = vmul.f32 %v5645_v5, %v2945_v47 }
0x2212   :  { %v2957_v16 = vrot.slane %v2946_v61, %v7127_v10  ;;  %v2950_v56 = vrot.slane %v2946_v61, %v7128_v52  ;;  %v2964_v46 = vrot.slane %v2946_v61, %v7129_v17  ;;  %v2971_v30 = vrot.slane %v2946_v61, %v7130_v21  ;;  %v7142_v10 = vld [vmem:[#allocation21_spill] sm:$0xff] }
0x2213   :  { %v2978_v41 = vrot.slane %v2946_v61, %v7131_v29  ;;  %v2985_v22 = vrot.slane %v2946_v61, %v7132_v58  ;;  %v2992_v36 = vrot.slane %v2946_v61, %v7133_v49  ;;  %v2999_v45 = vrot.slane %v2946_v61, %v7134_v3  ;;  %v7141_v49 = vld [vmem:[#allocation20_spill] sm:$0xff] }
0x2214   :  { %2959 = vbcast.lane.b32.xlu1 %v2957_v16, 256  ;;  %2952 = vbcast.lane.b32.xlu0 %v2950_v56, 256  ;;  %v7138_v56 = vld [vmem:[#allocation17_spill] sm:$0xff] }
0x2218   :  { %2966 = vbcast.lane.b32.xlu1 %v2964_v46, 256  ;;  %2973 = vbcast.lane.b32.xlu0 %v2971_v30, 256  ;;  %v7139_v30 = vld [vmem:[#allocation18_spill] sm:$0xff] }
0x221c   :  { %2980 = vbcast.lane.b32.xlu1 %v2978_v41, 256  ;;  %2987 = vbcast.lane.b32.xlu0 %v2985_v22, 256 }
0x2220   :  { %2994 = vbcast.lane.b32.xlu1 %v2992_v36, 256  ;;  %3001 = vbcast.lane.b32.xlu0 %v2999_v45, 256 }
0x2224   :  { %3156 = vperm.xlu1 %5556, %v7135_v18  }
0x2286   :  { %v2960_v12 = vpop.permute.xlu1 %2959  ;;  %v2953_v31 = vpop.permute.xlu0 %2952 }
0x2287   :  { %v3004_v5 = vmul.f32 %v7136_v55, %v2960_v12  ;;  %v3003_v37 = vmul.f32 %v7137_v4, %v2953_v31 }
0x2289   :  { %v3018_v25 = vsel %vm238_vm2, %v3004_v5, 0.0  ;;  %v3011_v53 = vsel %vm238_vm2, %v3003_v37, 0.0  ;;  %v7140_v37 = vld [vmem:[#allocation19_spill] sm:$0xff] }
0x228a   :  { %v3019_v11 = vrot.slane %v3018_v25, 4  ;;  %v3012_v47 = vrot.slane %v3011_v53, 4  ;;  %v2967_v16 = vpop.permute.xlu1 %2966  ;;  %v2974_v61 = vpop.permute.xlu0 %2973 }
0x228b   :  { %v3005_v46 = vmul.f32 %v7138_v56, %v2967_v16  ;;  %v3006_v41 = vmul.f32 %v7139_v30, %v2974_v61 }
0x228c   :  { %v3020_v22 = vadd.f32 %v3019_v11, %v3018_v25  ;;  %v3013_v36 = vadd.f32 %v3012_v47, %v3011_v53 }
0x228d   :  { %v3025_v45 = vsel %vm238_vm2, %v3005_v46, 0.0  ;;  %v3032_v38 = vsel %vm238_vm2, %v3006_v41, 0.0 }
0x228e   :  { %v3021_v18 = vrot.slane %v3020_v22, 2  ;;  %v3014_v12 = vrot.slane %v3013_v36, 2  ;;  %v3026_v31 = vrot.slane %v3025_v45, 4  ;;  %v3033_v55 = vrot.slane %v3032_v38, 4  ;;  %v2981_v5 = vpop.permute.xlu1 %2980  ;;  %v2988_v4 = vpop.permute.xlu0 %2987 }
0x228f   :  { %v3007_v3 = vmul.f32 %v7140_v37, %v2981_v5  ;;  %v3008_v58 = vmul.f32 %v7141_v49, %v2988_v4 }
0x2290   :  { %v3022_v29 = vadd.f32 %v3021_v18, %v3020_v22  ;;  %v3015_v16 = vadd.f32 %v3014_v12, %v3013_v36  ;;  %v3027_v56 = vadd.f32 %v3026_v31, %v3025_v45  ;;  %v3034_v61 = vadd.f32 %v3033_v55, %v3032_v38 }
0x2291   :  { %v3039_v25 = vsel %vm238_vm2, %v3007_v3, 0.0  ;;  %v3046_v53 = vsel %vm238_vm2, %v3008_v58, 0.0 }
0x2292   :  { %v3023_v11 = vrot.slane %v3022_v29, 1  ;;  %v3016_v47 = vrot.slane %v3015_v16, 1  ;;  %v3028_v46 = vrot.slane %v3027_v56, 2  ;;  %v3035_v30 = vrot.slane %v3034_v61, 2  ;;  %v2995_v41 = vpop.permute.xlu1 %2994  ;;  %v3002_v21 = vpop.permute.xlu0 %3001 }
0x2293   :  { %v3040_v17 = vrot.slane %v3039_v25, 4  ;;  %v3047_v52 = vrot.slane %v3046_v53, 4  ;;  %v3009_v5 = vmul.f32 %v7142_v10, %v2995_v41  ;;  %v3010_v49 = vmul.f32 %v6478_v23, %v3002_v21 }
0x2294   :  { %v3024_v22 = vadd.f32 %v3023_v11, %v3022_v29  ;;  %v3029_v36 = vadd.f32 %v3028_v46, %v3027_v56  ;;  %v3036_v45 = vadd.f32 %v3035_v30, %v3034_v61  ;;  %v3017_v12 = vadd.f32 %v3016_v47, %v3015_v16 }
0x2295   :  { %v3041_v38 = vadd.f32 %v3040_v17, %v3039_v25  ;;  %v3048_v18 = vadd.f32 %v3047_v52, %v3046_v53  ;;  %v3053_v3 = vsel %vm238_vm2, %v3009_v5, 0.0  ;;  %v3060_v58 = vsel %vm238_vm2, %v3010_v49, 0.0 }
0x2296   :  { %v3030_v31 = vrot.slane %v3029_v36, 1  ;;  %v3037_v55 = vrot.slane %v3036_v45, 1  ;;  %v3054_v4 = vrot.slane %v3053_v3, 4  ;;  %v3061_v57 = vrot.slane %v3060_v58, 4 }
0x2297   :  { %v3042_v37 = vrot.slane %v3041_v38, 2  ;;  %v3049_v51 = vrot.slane %v3048_v18, 2  ;;  %v3075_v29 = vsel %vm307_vm3, %v3024_v22, %v3017_v12 }
0x2298   :  { %v3031_v6 = vadd.f32 %v3030_v31, %v3029_v36  ;;  %v3055_v10 = vadd.f32 %v3054_v4, %v3053_v3  ;;  %v3062_v21 = vadd.f32 %v3061_v57, %v3060_v58  ;;  %v3038_v17 = vadd.f32 %v3037_v55, %v3036_v45 }
0x2299   :  { %v3043_v41 = vadd.f32 %v3042_v37, %v3041_v38  ;;  %v3050_v23 = vadd.f32 %v3049_v51, %v3048_v18  ;;  %v2709_v18 = vadd.f32 %v6500_v44, %v6632_v24 }
0x229a   :  { %v3056_v52 = vrot.slane %v3055_v10, 2  ;;  %v3076_v56 = vsel %vm309_vm4, %v3031_v6, %v3075_v29  ;;  %v3063_v16 = vrot.slane %v3062_v21, 2 }
0x229b   :  { %v3044_v61 = vrot.slane %v3043_v41, 1  ;;  %v3051_v25 = vrot.slane %v3050_v23, 1  ;;  %v3077_v30 = vsel %vm311_vm5, %v3038_v17, %v3076_v56 }
0x229c   :  { %v3057_v53 = vadd.f32 %v3056_v52, %v3055_v10  ;;  %v3064_v46 = vadd.f32 %v3063_v16, %v3062_v21 }
0x229d   :  { %v3045_v11 = vadd.f32 %v3044_v61, %v3043_v41  ;;  %v3052_v47 = vadd.f32 %v3051_v25, %v3050_v23 }
0x229e   :  { %v3058_v5 = vrot.slane %v3057_v53, 1  ;;  %v3065_v51 = vrot.slane %v3064_v46, 1 }
0x229f   :  { %v3078_v49 = vsel %vm313_vm6, %v3045_v11, %v3077_v30  ;;  %v6735_v11 = vld [vmem:[%s6972_s1] sm:$0xff] }
0x22a0   :  { %v3059_v57 = vadd.f32 %v3058_v5, %v3057_v53  ;;  %v3066_v36 = vadd.f32 %v3065_v51, %v3064_v46  ;;  %v3079_v22 = vsel %vm315_vm7, %v3052_v47, %v3078_v49 }
0x22a2   :  { %v3080_v45 = vsel %vm317_vm8, %v3059_v57, %v3079_v22 }
0x22a3   :  { %v3081_v6 = vsel %vm319_vm9, %v3066_v36, %v3080_v45  ;;  %v3157_v38 = vpop.permute.xlu1 %3156 }
0x22a4   :  { %4985 = vmatmul.mubr.msk.f32.vlgmr.msra.gmra.mrb[30].mxu1 %vm238_vm2, %v3081_v6  ;;  %v3159_v3 = vmul.f32 %v6507_v48, %v3157_v38  ;;  %v7146_v38 = vld [vmem:[#allocation8_spill] sm:$0xff] }
0x22a5   :  { %5393 = vmatpush3.bf16.msra.mxu1 %v6097_v9  ;;  %4995 = vmatprep.mubr.msk.f32.mxu1 %vm5719_vm1, %v7059_v2 }
0x22a6   :  { %5394 = vmatprep.subr.bf16.mxu1 %v7060_v28 }
0x22a9   :  { %5396 = vmatpush3.bf16.msra.mxu1 %v6109_v15 }
0x22aa   :  { %5398 = vmatprep.subr.bf16.mxu1 %v6112_v54 }
0x2377   :  { %v3150_v58 = vpop.f32.mrb[30].mxu1 }
0x2378   :  { %v3154_v12 = vadd.f32 %v3150_v58, %v2709_v18  ;;  %v4986_v31 = vpop.f32.mrb[31].mxu1 }
0x237a   :  { %v3160_v55 = vadd.f32 %v3159_v3, %v3154_v12  ;;  %v7147_v3 = vld [vmem:[#allocation7_spill] sm:$0xff]  ;;  %v7148_v12 = vld [vmem:[#allocation6_spill] sm:$0xff] }
0x237c   :  { %5648 = vtanh.f32 %v3160_v55  ;;  %v4487_v37 = vmul.f32 -1.442695, %v3160_v55  ;;  %v7149_v55 = vld [vmem:[#allocation9_spill] sm:$0xff] }
0x237e   :  { %5650 = vpow2.f32 %v4487_v37  ;;  %v7150_v37 = vld [vmem:[#allocation10_spill] sm:$0xff] }
0x2386   :  { %v5649_v4 = vpop.eup %5648 }
0x2387   :  { %3170 = vrot.lane.b32.xlu0 %v5649_v4, %s5722_s13 }
0x2388   :  { %v5651_v10 = vpop.eup %5650 }
0x2389   :  { %v3164_v41 = vadd.f32 1.0, %v5651_v10 }
0x238b   :  { %5652 = vrcp.f32 %v3164_v41  ;;  %v7151_v41 = vld [vmem:[#allocation11_spill] sm:$0xff] }
0x2395   :  { %v5653_v23 = vpop.eup %5652 }
0x2396   :  { %v3168_v44 = vmul.f32 %v5653_v23, %v6606_v50 }
0x23f9   :  { %v3171_v21 = vpop.permute.xlu0 %3170 }
0x23fa   :  { %v3173_v29 = vmul.f32 %v5653_v23, %v3171_v21  ;;  %v7152_v21 = vld [vmem:[#allocation12_spill] sm:$0xff] }
0x23fc   :  { %3175 = vrot.lane.b32.xlu1 %v3173_v29, %s5723_s14 }
0x246e   :  { %v3176_v48 = vpop.permute.xlu1 %3175 }
0x246f   :  { %v6704_v24 = vadd.f32 %v3176_v48, %v3168_v44  ;;  %v7153_v44 = vld [vmem:[#allocation13_spill] sm:$0xff] }
0x2471   :  { %5654 = vtanh.f32 %v6704_v24 }
0x247b   :  { %v5655_v17 = vpop.eup %5654 }
0x247c   :  { %3181 = vrot.lane.b32.xlu0 %v5655_v17, %s5722_s13  ;;  %v5730_v17 = vmov 6  }
0x247d   :  { %5557 = vset.pattern.permute.xlu1 %v5730_v17 }
0x2480   :  { %3261 = vrot.lane.b32.xlu0 %v6704_v24, %s5724_s5 }
0x24ee   :  { %v3182_v52 = vpop.permute.xlu0 %3181 }
0x24ef   :  { %v3184_v56 = vmul.f32 %v5653_v23, %v3182_v52  ;;  %v6767_v52 = vld [vmem:[%s6974_s2] sm:$0xff] }
0x24f1   :  { %3186 = vrot.lane.b32.xlu1 %v3184_v56, %s5723_s14 }
0x24f2   :  { %v3262_v50 = vpop.permute.xlu0 %3261 }
0x2563   :  { %v3187_v61 = vpop.permute.xlu1 %3186 }
0x2564   :  { %4996 = vmatmul.mubr.msk.f32.vlgmr.msra.gmra.mrb[32].mxu1 %vm238_vm2, %v3187_v61 }
0x2565   :  { %5400 = vmatpush1.bf16.msra.mxu1 %v6132_v59  ;;  %3329 = vmatprep.mubr.f32.mxu1 %v7059_v2 }
0x2566   :  { %5402 = vmatprep.subr.bf16.mxu1 %v6134_v63 }
0x2569   :  { %5404 = vmatpush1.bf16.msra.mxu1 %v6150_v62 }
0x256a   :  { %5406 = vmatprep.subr.bf16.mxu1 %v6154_v1 }
0x256c   :  { %4489 = vmatmul.mubr.msk.f32.vlgmr.msra.gmra.mrb[34].mxu1 %vm238_vm2, %v3262_v50  ;;  %v6773_v50 = vld [vmem:[%s6975_s0 + $0x8] sm:$0xff] }
0x256d   :  { %5408 = vmatpush1.bf16.msra.mxu1 %v6169_v35  ;;  %3400 = vmatprep.mubr.f32.mxu1 %v7059_v2 }
0x256e   :  { %5410 = vmatprep.subr.bf16.mxu1 %v6172_v43 }
0x2571   :  { %5412 = vmatpush1.bf16.msra.mxu1 %v6182_v60 }
0x2572   :  { %5445 = vmatprep.subr.bf16.mxu1 %v7060_v28 }
0x2574   :  { %4490 = vmatmul.mubr.msk.f32.vlgmr.msra.gmra.mrb[34].mxu1 %vm238_vm2, %v3187_v61 }
0x2575   :  { %5447 = vmatpush3.bf16.msra.mxu1 %v5981_v34  ;;  %5006 = vmatprep.mubr.msk.f32.mxu1 %vm5719_vm1, %v7059_v2 }
0x2576   :  { %5448 = vmatprep.subr.bf16.mxu1 %v7060_v28 }
0x2579   :  { %5450 = vmatpush3.bf16.msra.mxu1 %v5993_v42 }
0x257a   :  { %5451 = vmatprep.subr.bf16.mxu1 %v7060_v28 }
0x2637   :  { %v6730_v25 = vpop.f32.mrb[32].mxu1 }
0x2638   :  { %v4997_v16 = vpop.f32.mrb[33].mxu1 }
0x2647   :  { %v3402_v53 = vpop.f32.mrb[34].mxu1 }
0x2648   :  { %v3407_v47 = vadd.f32 %v6735_v11, %v3402_v53  ;;  %v3404_v46 = vpop.f32.mrb[35].mxu1  ;;  %v6779_v53 = vld [vmem:[%s6975_s0] sm:$0xff] }
0x2649   :  { %v3408_v30 = vadd.f32 %v6638_v0, %v3404_v46 }
0x264b   :  { %5656 = vtanh.f32 %v3408_v30 }
0x264c   :  { %5658 = vtanh.f32 %v3407_v47 }
0x2655   :  { %v5657_v5 = vpop.eup %5656 }
0x2656   :  { %v5659_v49 = vpop.eup %5658  ;;  %3475 = vmatprep.mubr.f32.mxu0 %v5657_v5 }
0x2657   :  { %3476 = vmatmul.mubr.f32.vlgmr.msra.gmra.mrb[12].mxu0 %v5659_v49 }
0x2658   :  { %5476 = vmatpush3.bf16.msra.mxu0 %v5797_v7  ;;  %v7143_v7 = vld [vmem:[#allocation3_spill] sm:$0xff] }
0x2659   :  { %5478 = vmatprep.subr.bf16.mxu0 %v5799_v8  ;;  %v7144_v8 = vld [vmem:[#allocation4_spill] sm:$0xff] }
0x265c   :  { %5480 = vmatpush3.bf16.msra.mxu0 %v5815_v13  ;;  %v7145_v13 = vld [vmem:[#allocation5_spill] sm:$0xff] }
0x265d   :  { %5482 = vmatprep.subr.bf16.mxu0 %v5818_v14 }
0x2660   :  { %5484 = vmatpush3.bf16.msra.mxu0 %v5833_v19 }
0x2661   :  { %5486 = vmatprep.subr.bf16.mxu0 %v5836_v20 }
0x2664   :  { %5488 = vmatpush3.bf16.msra.mxu0 %v5856_v26 }
0x2665   :  { %5490 = vmatprep.subr.bf16.mxu0 %v5860_v27 }
0x2668   :  { %5492 = vmatpush3.bf16.msra.mxu0 %v5875_v32 }
0x2669   :  { %5494 = vmatprep.subr.bf16.mxu0 %v5878_v33 }
0x266c   :  { %5496 = vmatpush3.bf16.msra.mxu0 %v5898_v39 }
0x266d   :  { %5498 = vmatprep.subr.bf16.mxu0 %v5901_v40 }
0x2670   :  { %5500 = vmatpush3.bf16.msra.mxu0 %v7143_v7 }
0x2671   :  { %5502 = vmatprep.subr.bf16.mxu0 %v7144_v8 }
0x2674   :  { %5504 = vmatpush3.bf16.msra.mxu0 %v7145_v13  ;;  %v6787_v13 = vld [vmem:[%s6975_s0 + $0x10] sm:$0xff] }
0x272a   :  { %v4803_v14 = vpop.f32.mrb[12].mxu0 }
0x272b   :  { %v4804_v19 = vpop.f32.mrb[13].mxu0 }
0x272c   :  { %v4805_v20 = vadd.f32 %v4804_v19, %v4803_v14  ;;  %v6793_v19 = vld [vmem:[%s6975_s0 + $0x18] sm:$0xff] }
0x272e   :  { %v3481_v26 = vsel %vm159_vm0, %v4805_v20, -inf }
0x272f   :  { %3482 = vmax.xlane.f32.xlu1 %v3481_v26 }
0x27bc   :  { %v3483_v27 = vpop.xlane.xlu1 %3482 }
0x27bd   :  { %v3484_v32 = vsub.f32 %v4805_v20, %v3483_v27 }
0x27bf   :  { %v3485_v51 = vmul.f32 1.442695, %v3484_v32 }
0x27c1   :  { %5660 = vpow2.f32 %v3485_v51 }
0x27cb   :  { %v5661_v33 = vpop.eup %5660 }
0x27cc   :  { %v3487_v39 = vsel %vm159_vm0, %v5661_v33, 0.0 }
0x27cd   :  { %3488 = vadd.xlane.f32.xlu0 %v3487_v39 }
0x285a   :  { %v3489_v40 = vpop.xlane.xlu0 %3488 }
0x285b   :  { %5662 = vrcp.f32 %v3489_v40 }
0x2865   :  { %v5663_v57 = vpop.eup %5662 }
0x2866   :  { %v3491_v36 = vmul.f32 %v5663_v57, %v3489_v40 }
0x2868   :  { %v3492_v22 = vsub.f32 2.0, %v3491_v36 }
0x286a   :  { %v3493_v45 = vmul.f32 %v5663_v57, %v3492_v22 }
0x286c   :  { %v3494_v6 = vmul.f32 %v5661_v33, %v3493_v45  ;;  %v6801_v45 = vld [vmem:[%s6975_s0 + $0x20] sm:$0xff] }
0x286d   :  { %7154 = vst [vmem:[#allocation2_spill] sm:$0xff] %v6801_v45 }
0x286e   :  { %v3505_v18 = vrot.slane %v3494_v6, %v7146_v38  ;;  %v3498_v58 = vrot.slane %v3494_v6, %v7147_v3  ;;  %v3512_v31 = vrot.slane %v3494_v6, %v7148_v12  ;;  %v3519_v4 = vrot.slane %v3494_v6, %v7149_v55 }
0x286f   :  { %v3526_v10 = vrot.slane %v3494_v6, %v7150_v37  ;;  %v3533_v23 = vrot.slane %v3494_v6, %v7151_v41  ;;  %v3540_v29 = vrot.slane %v3494_v6, %v7152_v21  ;;  %v3547_v48 = vrot.slane %v3494_v6, %v7153_v44 }
0x2870   :  { %3507 = vbcast.lane.b32.xlu1 %v3505_v18, 256  ;;  %3500 = vbcast.lane.b32.xlu0 %v3498_v58, 256  ;;  %v6807_v18 = vld [vmem:[%s6975_s0 + $0x28] sm:$0xff] }
0x2871   :  { %7155 = vst [vmem:[#allocation14_spill] sm:$0xff] %v6807_v18 }
0x2874   :  { %3514 = vbcast.lane.b32.xlu1 %v3512_v31, 256  ;;  %3521 = vbcast.lane.b32.xlu0 %v3519_v4, 256 }
0x2878   :  { %3528 = vbcast.lane.b32.xlu1 %v3526_v10, 256  ;;  %3535 = vbcast.lane.b32.xlu0 %v3533_v23, 256 }
0x287c   :  { %3542 = vbcast.lane.b32.xlu1 %v3540_v29, 256  ;;  %3549 = vbcast.lane.b32.xlu0 %v3547_v48, 256 }
0x2880   :  { %3704 = vperm.xlu1 %5557, %v6767_v52  }
0x28e2   :  { %v3508_v56 = vpop.permute.xlu1 %3507  ;;  %v3501_v61 = vpop.permute.xlu0 %3500 }
0x28e3   :  { %v3552_v16 = vmul.f32 %v6773_v50, %v3508_v56  ;;  %v3551_v47 = vmul.f32 %v6779_v53, %v3501_v61 }
0x28e5   :  { %v3566_v46 = vsel %vm238_vm2, %v3552_v16, 0.0  ;;  %v3559_v30 = vsel %vm238_vm2, %v3551_v47, 0.0 }
0x28e6   :  { %v3567_v5 = vrot.slane %v3566_v46, 4  ;;  %v3560_v49 = vrot.slane %v3559_v30, 4  ;;  %v3515_v7 = vpop.permute.xlu1 %3514  ;;  %v3522_v8 = vpop.permute.xlu0 %3521 }
0x28e7   :  { %v3553_v14 = vmul.f32 %v6787_v13, %v3515_v7  ;;  %v3554_v20 = vmul.f32 %v6793_v19, %v3522_v8  ;;  %v6821_v8 = vld [vmem:[%s6975_s0 + $0x38] sm:$0xff] }
0x28e8   :  { %v3568_v26 = vadd.f32 %v3567_v5, %v3566_v46  ;;  %v3561_v27 = vadd.f32 %v3560_v49, %v3559_v30  ;;  %v6815_v49 = vld [vmem:[%s6975_s0 + $0x30] sm:$0xff] }
0x28e9   :  { %v3573_v32 = vsel %vm238_vm2, %v3553_v14, 0.0  ;;  %v3580_v51 = vsel %vm238_vm2, %v3554_v20, 0.0  ;;  %7156 = vst [vmem:[#allocation16_spill] sm:$0xff] %v6815_v49 }
0x28ea   :  { %v3569_v33 = vrot.slane %v3568_v26, 2  ;;  %v3562_v39 = vrot.slane %v3561_v27, 2  ;;  %v3574_v40 = vrot.slane %v3573_v32, 4  ;;  %v3581_v57 = vrot.slane %v3580_v51, 4  ;;  %v3529_v36 = vpop.permute.xlu1 %3528  ;;  %v3536_v22 = vpop.permute.xlu0 %3535 }
0x28eb   :  { %v3555_v6 = vmul.f32 %v6801_v45, %v3529_v36  ;;  %v3556_v58 = vmul.f32 %v6807_v18, %v3536_v22 }
0x28ec   :  { %v3570_v31 = vadd.f32 %v3569_v33, %v3568_v26  ;;  %v3563_v4 = vadd.f32 %v3562_v39, %v3561_v27  ;;  %v3575_v10 = vadd.f32 %v3574_v40, %v3573_v32  ;;  %v3582_v23 = vadd.f32 %v3581_v57, %v3580_v51 }
0x28ed   :  { %v3587_v29 = vsel %vm238_vm2, %v3555_v6, 0.0  ;;  %v3594_v48 = vsel %vm238_vm2, %v3556_v58, 0.0 }
0x28ee   :  { %v3571_v17 = vrot.slane %v3570_v31, 1  ;;  %v3564_v56 = vrot.slane %v3563_v4, 1  ;;  %v3576_v61 = vrot.slane %v3575_v10, 2  ;;  %v3583_v16 = vrot.slane %v3582_v23, 2  ;;  %v3543_v47 = vpop.permute.xlu1 %3542  ;;  %v3550_v46 = vpop.permute.xlu0 %3549 }
0x28ef   :  { %v3588_v30 = vrot.slane %v3587_v29, 4  ;;  %v3595_v5 = vrot.slane %v3594_v48, 4  ;;  %v3557_v7 = vmul.f32 %v6815_v49, %v3543_v47  ;;  %v3558_v14 = vmul.f32 %v6821_v8, %v3550_v46 }
0x28f0   :  { %v3572_v20 = vadd.f32 %v3571_v17, %v3570_v31  ;;  %v3577_v26 = vadd.f32 %v3576_v61, %v3575_v10  ;;  %v3584_v27 = vadd.f32 %v3583_v16, %v3582_v23  ;;  %v3565_v40 = vadd.f32 %v3564_v56, %v3563_v4 }
0x28f1   :  { %v3589_v32 = vadd.f32 %v3588_v30, %v3587_v29  ;;  %v3596_v51 = vadd.f32 %v3595_v5, %v3594_v48  ;;  %v3601_v33 = vsel %vm238_vm2, %v3557_v7, 0.0  ;;  %v3608_v39 = vsel %vm238_vm2, %v3558_v14, 0.0 }
0x28f2   :  { %v3578_v57 = vrot.slane %v3577_v26, 1  ;;  %v3585_v36 = vrot.slane %v3584_v27, 1  ;;  %v3602_v22 = vrot.slane %v3601_v33, 4  ;;  %v3609_v47 = vrot.slane %v3608_v39, 4 }
0x28f3   :  { %v3590_v6 = vrot.slane %v3589_v32, 2  ;;  %v3597_v58 = vrot.slane %v3596_v51, 2  ;;  %v3623_v10 = vsel %vm307_vm3, %v3572_v20, %v3565_v40 }
0x28f4   :  { %v3579_v49 = vadd.f32 %v3578_v57, %v3577_v26  ;;  %v3603_v18 = vadd.f32 %v3602_v22, %v3601_v33  ;;  %v3610_v31 = vadd.f32 %v3609_v47, %v3608_v39  ;;  %v3586_v23 = vadd.f32 %v3585_v36, %v3584_v27 }
0x28f5   :  { %v3591_v45 = vadd.f32 %v3590_v6, %v3589_v32  ;;  %v3598_v46 = vadd.f32 %v3597_v58, %v3596_v51 }
0x28f6   :  { %v3604_v29 = vrot.slane %v3603_v18, 2  ;;  %v3624_v48 = vsel %vm309_vm4, %v3579_v49, %v3623_v10  ;;  %v3611_v4 = vrot.slane %v3610_v31, 2 }
0x28f7   :  { %v3592_v17 = vrot.slane %v3591_v45, 1  ;;  %v3599_v61 = vrot.slane %v3598_v46, 1  ;;  %v3625_v7 = vsel %vm311_vm5, %v3586_v23, %v3624_v48 }
0x28f8   :  { %v3605_v56 = vadd.f32 %v3604_v29, %v3603_v18  ;;  %v3612_v5 = vadd.f32 %v3611_v4, %v3610_v31  ;;  %v6843_v18 = vld [vmem:[%s6976_s7 + $0x1] ss:$0 sm:$0xff] }
0x28f9   :  { %v3593_v16 = vadd.f32 %v3592_v17, %v3591_v45  ;;  %v3600_v30 = vadd.f32 %v3599_v61, %v3598_v46  ;;  %v3257_v39 = vadd.f32 %v6843_v18, %v6730_v25 }
0x28fa   :  { %v3606_v14 = vrot.slane %v3605_v56, 1  ;;  %v3613_v32 = vrot.slane %v3612_v5, 1 }
0x28fb   :  { %v3626_v26 = vsel %vm313_vm6, %v3593_v16, %v3625_v7 }
0x28fc   :  { %v3607_v51 = vadd.f32 %v3606_v14, %v3605_v56  ;;  %v3614_v33 = vadd.f32 %v3613_v32, %v3612_v5  ;;  %v3627_v20 = vsel %vm315_vm7, %v3600_v30, %v3626_v26 }
0x28fe   :  { %v3628_v27 = vsel %vm317_vm8, %v3607_v51, %v3627_v20 }
0x28ff   :  { %v3629_v49 = vsel %vm319_vm9, %v3614_v33, %v3628_v27  ;;  %v3705_v45 = vpop.permute.xlu1 %3704 }
0x2900   :  { %5007 = vmatmul.mubr.msk.f32.vlgmr.msra.gmra.mrb[36].mxu1 %vm238_vm2, %v3629_v49 }
0x2901   :  { %5453 = vmatpush3.bf16.msra.mxu1 %v6097_v9  ;;  %5017 = vmatprep.mubr.msk.f32.mxu1 %vm5719_vm1, %v7059_v2  ;;  %v6850_v9 = vld [vmem:[%s6976_s7] ss:$0 sm:$0xff] }
0x2902   :  { %5454 = vmatprep.subr.bf16.mxu1 %v7060_v28  ;;  %v3707_v40 = vmul.f32 %v6850_v9, %v3705_v45 }
0x2905   :  { %5456 = vmatpush3.bf16.msra.mxu1 %v6109_v15 }
0x2906   :  { %5458 = vmatprep.subr.bf16.mxu1 %v6112_v54 }
0x29d3   :  { %v3698_v57 = vpop.f32.mrb[36].mxu1 }
0x29d4   :  { %v3702_v15 = vadd.f32 %v3698_v57, %v3257_v39  ;;  %v5008_v36 = vpop.f32.mrb[37].mxu1 }
0x29d6   :  { %v3708_v54 = vadd.f32 %v3707_v40, %v3702_v15 }
0x29d8   :  { %5664 = vtanh.f32 %v3708_v54  ;;  %v4492_v6 = vmul.f32 -1.442695, %v3708_v54 }
0x29da   :  { %5666 = vpow2.f32 %v4492_v6 }
0x29e2   :  { %v5665_v22 = vpop.eup %5664 }
0x29e3   :  { %3718 = vrot.lane.b32.xlu0 %v5665_v22, %s5722_s13 }
0x29e4   :  { %v5667_v58 = vpop.eup %5666 }
0x29e5   :  { %v3712_v47 = vadd.f32 1.0, %v5667_v58 }
0x29e7   :  { %5668 = vrcp.f32 %v3712_v47 }
0x29f1   :  { %v5669_v25 = vpop.eup %5668 }
0x29f2   :  { %v3716_v10 = vmul.f32 %v5669_v25, %v6704_v24 }
0x2a55   :  { %v3719_v46 = vpop.permute.xlu0 %3718 }
0x2a56   :  { %v3721_v31 = vmul.f32 %v5669_v25, %v3719_v46 }
0x2a58   :  { %3723 = vrot.lane.b32.xlu1 %v3721_v31, %s5723_s14 }
0x2aca   :  { %v3724_v23 = vpop.permute.xlu1 %3723 }
0x2acb   :  { %v6856_v29 = vadd.f32 %v3724_v23, %v3716_v10 }
0x2acd   :  { %5670 = vtanh.f32 %v6856_v29 }
0x2ad7   :  { %v5671_v48 = vpop.eup %5670 }
0x2ad8   :  { %3729 = vrot.lane.b32.xlu0 %v5671_v48, %s5722_s13 }
0x2adc   :  { %3809 = vrot.lane.b32.xlu0 %v6856_v29, %s5724_s5 }
0x2b4a   :  { %v3730_v17 = vpop.permute.xlu0 %3729 }
0x2b4b   :  { %v3732_v61 = vmul.f32 %v5669_v25, %v3730_v17 }
0x2b4d   :  { %3734 = vrot.lane.b32.xlu1 %v3732_v61, %s5723_s14 }
0x2b4e   :  { %v3810_v24 = vpop.permute.xlu0 %3809 }
0x2bbf   :  { %v3735_v4 = vpop.permute.xlu1 %3734 }
0x2bc0   :  { %5018 = vmatmul.mubr.msk.f32.vlgmr.msra.gmra.mrb[38].mxu1 %vm238_vm2, %v3735_v4 }
0x2bc1   :  { %5460 = vmatpush1.bf16.msra.mxu1 %v6132_v59  ;;  %3877 = vmatprep.mubr.f32.mxu1 %v7059_v2 }
0x2bc2   :  { %5462 = vmatprep.subr.bf16.mxu1 %v6134_v63 }
0x2bc5   :  { %5464 = vmatpush1.bf16.msra.mxu1 %v6150_v62 }
0x2bc6   :  { %5466 = vmatprep.subr.bf16.mxu1 %v6154_v1 }
0x2bc8   :  { %4494 = vmatmul.mubr.msk.f32.vlgmr.msra.gmra.mrb[40].mxu1 %vm238_vm2, %v3810_v24 }
0x2bc9   :  { %5468 = vmatpush1.bf16.msra.mxu1 %v6169_v35  ;;  %3948 = vmatprep.mubr.f32.mxu1 %v7059_v2 }
0x2bca   :  { %5470 = vmatprep.subr.bf16.mxu1 %v6172_v43 }
0x2bcd   :  { %5472 = vmatpush1.bf16.msra.mxu1 %v6182_v60 }
0x2bce   :  { %5505 = vmatprep.subr.bf16.mxu1 %v7060_v28 }
0x2bd0   :  { %4495 = vmatmul.mubr.msk.f32.vlgmr.msra.gmra.mrb[40].mxu1 %vm238_vm2, %v3735_v4  ;;  %v7157_v4 = vld [vmem:[#allocation2_spill] sm:$0xff] }
0x2bd1   :  { %5507 = vmatpush3.bf16.msra.mxu1 %v5981_v34  ;;  %5028 = vmatprep.mubr.msk.f32.mxu1 %vm5719_vm1, %v7059_v2 }
0x2bd2   :  { %5508 = vmatprep.subr.bf16.mxu1 %v7060_v28 }
0x2bd5   :  { %5510 = vmatpush3.bf16.msra.mxu1 %v5993_v42 }
0x2bd6   :  { %5511 = vmatprep.subr.bf16.mxu1 %v7060_v28 }
0x2c93   :  { %v6882_v59 = vpop.f32.mrb[38].mxu1 }
0x2c94   :  { %v5019_v63 = vpop.f32.mrb[39].mxu1 }
0x2c95   :  { %v7158_v63 = vld [vmem:[#allocation14_spill] sm:$0xff] }
0x2ca3   :  { %v3950_v62 = vpop.f32.mrb[40].mxu1 }
0x2ca4   :  { %v3955_v1 = vadd.f32 %v6735_v11, %v3950_v62  ;;  %v3952_v35 = vpop.f32.mrb[41].mxu1 }
0x2ca5   :  { %v3956_v43 = vadd.f32 %v6638_v0, %v3952_v35 }
0x2ca7   :  { %5672 = vtanh.f32 %v3956_v43 }
0x2ca8   :  { %5674 = vtanh.f32 %v3955_v1 }
0x2cb1   :  { %v5673_v34 = vpop.eup %5672 }
0x2cb2   :  { %v5675_v60 = vpop.eup %5674  ;;  %4023 = vmatprep.mubr.f32.mxu0 %v5673_v34 }
0x2cb3   :  { %4024 = vmatmul.mubr.f32.vlgmr.msra.gmra.mrb[14].mxu0 %v5675_v60 }
0x2d86   :  { %v4848_v56 = vpop.f32.mrb[14].mxu0 }
0x2d87   :  { %v4849_v16 = vpop.f32.mrb[15].mxu0 }
0x2d88   :  { %v4850_v42 = vadd.f32 %v4849_v16, %v4848_v56 }
0x2d8a   :  { %v4029_v30 = vsel %vm159_vm0, %v4850_v42, -inf }
0x2d8b   :  { %4030 = vmax.xlane.f32.xlu1 %v4029_v30 }
0x2e18   :  { %v4031_v5 = vpop.xlane.xlu1 %4030 }
0x2e19   :  { %v4032_v7 = vsub.f32 %v4850_v42, %v4031_v5 }
0x2e1b   :  { %v4033_v14 = vmul.f32 1.442695, %v4032_v7 }
0x2e1d   :  { %5676 = vpow2.f32 %v4033_v14 }
0x2e27   :  { %v5677_v11 = vpop.eup %5676 }
0x2e28   :  { %v4035_v26 = vsel %vm159_vm0, %v5677_v11, 0.0 }
0x2e29   :  { %4036 = vadd.xlane.f32.xlu0 %v4035_v26 }
0x2eb6   :  { %v4037_v0 = vpop.xlane.xlu0 %4036 }
0x2eb7   :  { %5678 = vrcp.f32 %v4037_v0 }
0x2ec1   :  { %v5679_v32 = vpop.eup %5678 }
0x2ec2   :  { %v4039_v51 = vmul.f32 %v5679_v32, %v4037_v0 }
0x2ec4   :  { %v4040_v33 = vsub.f32 2.0, %v4039_v51 }
0x2ec6   :  { %v4041_v20 = vmul.f32 %v5679_v32, %v4040_v33 }
0x2ec8   :  { %v4042_v27 = vmul.f32 %v5677_v11, %v4041_v20  ;;  %v7159_v11 = vld [vmem:[#allocation16_spill] sm:$0xff] }
0x2eca   :  { %v4053_v49 = vrot.slane %v4042_v27, %v7146_v38  ;;  %v4046_v45 = vrot.slane %v4042_v27, %v7147_v3  ;;  %v4060_v39 = vrot.slane %v4042_v27, %v7148_v12  ;;  %v4067_v40 = vrot.slane %v4042_v27, %v7149_v55 }
0x2ecb   :  { %v4074_v57 = vrot.slane %v4042_v27, %v7150_v37  ;;  %v4081_v15 = vrot.slane %v4042_v27, %v7151_v41  ;;  %v4088_v36 = vrot.slane %v4042_v27, %v7152_v21  ;;  %v4095_v38 = vrot.slane %v4042_v27, %v7153_v44 }
0x2ecc   :  { %4055 = vbcast.lane.b32.xlu1 %v4053_v49, 256  ;;  %4048 = vbcast.lane.b32.xlu0 %v4046_v45, 256  ;;  %v5731_v3 = vmov 7  }
0x2ecd   :  { %5558 = vset.pattern.permute.xlu1 %v5731_v3  ;;  %5559 = vset.pattern.permute.xlu0 %v5731_v3 }
0x2ed0   :  { %4062 = vbcast.lane.b32.xlu1 %v4060_v39, 256  ;;  %4069 = vbcast.lane.b32.xlu0 %v4067_v40, 256 }
0x2ed4   :  { %4076 = vbcast.lane.b32.xlu1 %v4074_v57, 256  ;;  %4083 = vbcast.lane.b32.xlu0 %v4081_v15, 256 }
0x2ed8   :  { %4090 = vbcast.lane.b32.xlu1 %v4088_v36, 256  ;;  %4097 = vbcast.lane.b32.xlu0 %v4095_v38, 256 }
0x2edc   :  { %4252 = vperm.xlu1 %5558, %v6767_v52  }
0x2f3e   :  { %v4056_v12 = vpop.permute.xlu1 %4055  ;;  %v4049_v55 = vpop.permute.xlu0 %4048 }
0x2f3f   :  { %v4100_v54 = vmul.f32 %v6773_v50, %v4056_v12  ;;  %v4099_v37 = vmul.f32 %v6779_v53, %v4049_v55 }
0x2f41   :  { %v4114_v41 = vsel %vm238_vm2, %v4100_v54, 0.0  ;;  %v4107_v22 = vsel %vm238_vm2, %v4099_v37, 0.0 }
0x2f42   :  { %v4115_v21 = vrot.slane %v4114_v41, 4  ;;  %v4108_v6 = vrot.slane %v4107_v22, 4  ;;  %v4063_v44 = vpop.permute.xlu1 %4062  ;;  %v4070_v58 = vpop.permute.xlu0 %4069 }
0x2f43   :  { %v4101_v47 = vmul.f32 %v6787_v13, %v4063_v44  ;;  %v4102_v25 = vmul.f32 %v6793_v19, %v4070_v58 }
0x2f44   :  { %v4116_v46 = vadd.f32 %v4115_v21, %v4114_v41  ;;  %v4109_v52 = vadd.f32 %v4108_v6, %v4107_v22 }
0x2f45   :  { %v4121_v31 = vsel %vm238_vm2, %v4101_v47, 0.0  ;;  %v4128_v50 = vsel %vm238_vm2, %v4102_v25, 0.0 }
0x2f46   :  { %v4117_v10 = vrot.slane %v4116_v46, 2  ;;  %v4110_v53 = vrot.slane %v4109_v52, 2  ;;  %v4122_v23 = vrot.slane %v4121_v31, 4  ;;  %v4129_v48 = vrot.slane %v4128_v50, 4  ;;  %v4077_v17 = vpop.permute.xlu1 %4076  ;;  %v4084_v61 = vpop.permute.xlu0 %4083 }
0x2f47   :  { %v4103_v24 = vmul.f32 %v7157_v4, %v4077_v17  ;;  %v4104_v62 = vmul.f32 %v7158_v63, %v4084_v61 }
0x2f48   :  { %v4118_v1 = vadd.f32 %v4117_v10, %v4116_v46  ;;  %v4111_v13 = vadd.f32 %v4110_v53, %v4109_v52  ;;  %v4123_v35 = vadd.f32 %v4122_v23, %v4121_v31  ;;  %v4130_v19 = vadd.f32 %v4129_v48, %v4128_v50  ;;  %v4285_v53 = vld [vmem:[%s6978_s6 + $0x20] sm:$0xff]  ;;  %v4286_v23 = vld [vmem:[%s6978_s6 + $0x28] sm:$0xff] }
0x2f49   :  { %v4135_v43 = vsel %vm238_vm2, %v4103_v24, 0.0  ;;  %v4142_v34 = vsel %vm238_vm2, %v4104_v62, 0.0  ;;  %v5512_v63 = vpack.c.bf16 %v4286_v23, %v4285_v53 }
0x2f4a   :  { %v4119_v60 = vrot.slane %v4118_v1, 1  ;;  %v4112_v56 = vrot.slane %v4111_v13, 1  ;;  %v4124_v16 = vrot.slane %v4123_v35, 2  ;;  %v4131_v42 = vrot.slane %v4130_v19, 2  ;;  %v4091_v30 = vpop.permute.xlu1 %4090  ;;  %v4098_v5 = vpop.permute.xlu0 %4097 }
0x2f4b   :  { %v4136_v7 = vrot.slane %v4135_v43, 4  ;;  %v4143_v14 = vrot.slane %v4142_v34, 4  ;;  %v4105_v26 = vmul.f32 %v7159_v11, %v4091_v30  ;;  %v4106_v0 = vmul.f32 %v6821_v8, %v4098_v5 }
0x2f4c   :  { %v4120_v32 = vadd.f32 %v4119_v60, %v4118_v1  ;;  %v4125_v51 = vadd.f32 %v4124_v16, %v4123_v35  ;;  %v4132_v33 = vadd.f32 %v4131_v42, %v4130_v19  ;;  %v4113_v39 = vadd.f32 %v4112_v56, %v4111_v13  ;;  %v4287_v1 = vld [vmem:[%s6978_s6 + $0x30] sm:$0xff]  ;;  %v4288_v13 = vld [vmem:[%s6978_s6 + $0x38] sm:$0xff] }
0x2f4d   :  { %v4137_v20 = vadd.f32 %v4136_v7, %v4135_v43  ;;  %v4144_v27 = vadd.f32 %v4143_v14, %v4142_v34  ;;  %v4149_v49 = vsel %vm238_vm2, %v4105_v26, 0.0  ;;  %v4156_v45 = vsel %vm238_vm2, %v4106_v0, 0.0 }
0x2f4e   :  { %v4126_v40 = vrot.slane %v4125_v51, 1  ;;  %v4133_v57 = vrot.slane %v4132_v33, 1  ;;  %v4150_v15 = vrot.slane %v4149_v49, 4  ;;  %v4157_v3 = vrot.slane %v4156_v45, 4 }
0x2f4f   :  { %v4138_v36 = vrot.slane %v4137_v20, 2  ;;  %v4145_v38 = vrot.slane %v4144_v27, 2  ;;  %v4171_v41 = vsel %vm307_vm3, %v4120_v32, %v4113_v39  ;;  %v5515_v19 = vpack.c.bf16 %v4288_v13, %v4287_v1 }
0x2f50   :  { %v4127_v12 = vadd.f32 %v4126_v40, %v4125_v51  ;;  %v4151_v55 = vadd.f32 %v4150_v15, %v4149_v49  ;;  %v4158_v37 = vadd.f32 %v4157_v3, %v4156_v45  ;;  %v4134_v22 = vadd.f32 %v4133_v57, %v4132_v33  ;;  %v4281_v33 = vld [vmem:[%s6978_s6] sm:$0xff] }
0x2f51   :  { %v4139_v54 = vadd.f32 %v4138_v36, %v4137_v20  ;;  %v4146_v8 = vadd.f32 %v4145_v38, %v4144_v27  ;;  %v3805_v34 = vadd.f32 %v6843_v18, %v6882_v59  ;;  %v4282_v20 = vld [vmem:[%s6978_s6 + $0x8] sm:$0xff]  ;;  %v4283_v27 = vld [vmem:[%s6978_s6 + $0x10] sm:$0xff]  ;;  %v4500_v36 = vld [vmem:[%s6976_s7 + $0x2] ss:$0 sm:$0xff] }
0x2f52   :  { %v4152_v21 = vrot.slane %v4151_v55, 2  ;;  %v4172_v6 = vsel %vm309_vm4, %v4127_v12, %v4171_v41  ;;  %v4159_v47 = vrot.slane %v4158_v37, 2  ;;  %v5518_v49 = vpack.c.bf16 %v4282_v20, %v4281_v33 }
0x2f53   :  { %v4140_v44 = vrot.slane %v4139_v54, 1  ;;  %v4147_v58 = vrot.slane %v4146_v8, 1  ;;  %v4173_v50 = vsel %vm311_vm5, %v4134_v22, %v4172_v6 }
0x2f54   :  { %v4153_v25 = vadd.f32 %v4152_v21, %v4151_v55  ;;  %v4160_v31 = vadd.f32 %v4159_v47, %v4158_v37 }
0x2f55   :  { %v4141_v46 = vadd.f32 %v4140_v44, %v4139_v54  ;;  %v4148_v52 = vadd.f32 %v4147_v58, %v4146_v8 }
0x2f56   :  { %v4154_v10 = vrot.slane %v4153_v25, 1  ;;  %v4161_v17 = vrot.slane %v4160_v31, 1 }
0x2f57   :  { %v4174_v48 = vsel %vm313_vm6, %v4141_v46, %v4173_v50 }
0x2f58   :  { %v4155_v61 = vadd.f32 %v4154_v10, %v4153_v25  ;;  %v4162_v4 = vadd.f32 %v4161_v17, %v4160_v31  ;;  %v4175_v24 = vsel %vm315_vm7, %v4148_v52, %v4174_v48 }
0x2f5a   :  { %v4176_v62 = vsel %vm317_vm8, %v4155_v61, %v4175_v24 }
0x2f5b   :  { %v4177_v35 = vsel %vm319_vm9, %v4162_v4, %v4176_v62  ;;  %v4253_v43 = vpop.permute.xlu1 %4252 }
0x2f5c   :  { %5029 = vmatmul.mubr.msk.f32.vlgmr.msra.gmra.mrb[42].mxu1 %vm238_vm2, %v4177_v35  ;;  %v4255_v60 = vmul.f32 %v6850_v9, %v4253_v43 }
0x2f5d   :  { %5513 = vmatpush3.bf16.msra.mxu1 %v5512_v63  ;;  %5039 = vmatprep.mubr.msk.f32.mxu1 %vm5719_vm1, %v7059_v2 }
0x2f5e   :  { %5514 = vmatprep.subr.bf16.mxu1 %v7060_v28 }
0x2f61   :  { %5516 = vmatpush3.bf16.msra.mxu1 %v5515_v19 }
0x2f62   :  { %5517 = vmatprep.subr.bf16.mxu1 %v7060_v28 }
0x2f64   :  { %5040 = vmatmul.mubr.msk.f32.vlgmr.msra.gmra.mrb[44].mxu1 %vm238_vm2, %v4177_v35 }
0x2f65   :  { %5050 = vmatprep.mubr.msk.f32.mxu1 %vm5719_vm1, %v7059_v2  ;;  %5519 = vmatpush3.bf16.msra.mxu1 %v5518_v49 }
0x2f66   :  { %5520 = vmatprep.subr.bf16.mxu1 %v7060_v28 }
0x302f   :  { %v4246_v56 = vpop.f32.mrb[42].mxu1 }
0x3030   :  { %v4250_v16 = vadd.f32 %v4246_v56, %v3805_v34  ;;  %v5030_v42 = vpop.f32.mrb[43].mxu1 }
0x3032   :  { %v4256_v30 = vadd.f32 %v4255_v60, %v4250_v16 }
0x3034   :  { %5680 = vtanh.f32 %v4256_v30  ;;  %v4497_v11 = vmul.f32 -1.442695, %v4256_v30 }
0x3036   :  { %5682 = vpow2.f32 %v4497_v11 }
0x3037   :  { %v4355_v5 = vpop.f32.mrb[44].mxu1 }
0x3038   :  { %v5041_v7 = vpop.f32.mrb[45].mxu1 }
0x303e   :  { %v5681_v14 = vpop.eup %5680 }
0x303f   :  { %4266 = vrot.lane.b32.xlu0 %v5681_v14, %s5722_s13 }
0x3040   :  { %v5683_v26 = vpop.eup %5682 }
0x3041   :  { %v4260_v2 = vadd.f32 1.0, %v5683_v26 }
0x3043   :  { %5684 = vrcp.f32 %v4260_v2 }
0x304d   :  { %v5685_v0 = vpop.eup %5684 }
0x304e   :  { %v4264_v9 = vmul.f32 %v5685_v0, %v6856_v29  ;;  %v4284_v29 = vld [vmem:[%s6978_s6 + $0x18] sm:$0xff] }
0x304f   :  { %v5521_v45 = vpack.c.bf16 %v4284_v29, %v4283_v27 }
0x3051   :  { %5522 = vmatpush3.bf16.msra.mxu1 %v5521_v45 }
0x30b1   :  { %v4267_v32 = vpop.permute.xlu0 %4266 }
0x30b2   :  { %v4269_v18 = vmul.f32 %v5685_v0, %v4267_v32 }
0x30b4   :  { %4271 = vrot.lane.b32.xlu1 %v4269_v18, %s5723_s14 }
0x3126   :  { %v4272_v59 = vpop.permute.xlu1 %4271 }
0x3127   :  { %v4274_v51 = vadd.f32 %v4272_v59, %v4264_v9 }
0x3129   :  { %5686 = vtanh.f32 %v4274_v51 }
0x3133   :  { %v5687_v39 = vpop.eup %5686 }
0x3134   :  { %4277 = vrot.lane.b32.xlu0 %v5687_v39, %s5722_s13 }
0x31a6   :  { %v4278_v40 = vpop.permute.xlu0 %4277 }
0x31a7   :  { %v4280_v57 = vmul.f32 %v5685_v0, %v4278_v40 }
0x31a9   :  { %4360 = vrot.lane.b32.xlu1 %v4280_v57, %s5723_s14 }
0x321b   :  { %v4361_v15 = vpop.permute.xlu1 %4360 }
0x321c   :  { %5051 = vmatmul.mubr.msk.f32.vlgmr.msra.gmra.mrb[46].mxu1 %vm238_vm2, %v4361_v15 }
0x32ef   :  { %v4430_v38 = vpop.f32.mrb[46].mxu1 }
0x32f0   :  { %v4431_v3 = vadd.f32 %v4430_v38, %v4355_v5  ;;  %v5052_v12 = vpop.f32.mrb[47].mxu1 }
0x32f2   :  { %v4440_v28 = vadd.f32 %v4500_v36, %v4431_v3 }
0x32f4   :  { %v4442_v55 = vsel %vm4441_vm10, %v4440_v28, -inf }
0x32f5   :  { %4443 = vmax.xlane.f32.xlu0 %v4442_v55 }
0x3382   :  { %v4444_v54 = vpop.xlane.xlu0 %4443 }
0x3383   :  { %v4445_v8 = vsub.f32 %v4440_v28, %v4444_v54 }
0x3385   :  { %v4446_v37 = vmul.f32 1.442695, %v4445_v8 }
0x3387   :  { %5688 = vpow2.f32 %v4446_v37 }
0x3391   :  { %v5689_v41 = vpop.eup %5688 }
0x3392   :  { %v4448_v22 = vsel %vm4441_vm10, %v5689_v41, 0.0 }
0x3393   :  { %4449 = vadd.xlane.f32.xlu1 %v4448_v22 }
0x3420   :  { %v4450_v21 = vpop.xlane.xlu1 %4449 }
0x3421   :  { %5690 = vlog2.f32 %v4450_v21 }
0x342b   :  { %v5691_v6 = vpop.eup %5690 }
0x342c   :  { %v4452_v44 = vmul.f32 0.6931472, %v5691_v6 }
0x342e   :  { %v4453_v58 = vsub.f32 %v4445_v8, %v4452_v44 }
0x3430   :  { %4454 = vst.msk [vmem:[%s6979_s8] sm:$0xff] %vm4441_vm10, %v4453_v58 }

</bundles_post_ra>
